<compile_context>
chip_gen: v5e
topology: v5e:2x2
jax: 0.10.0
libtpu: 0.0.40
codegen_flags: <defaults>
</compile_context>

<pallas_src>
import numpy as np
import jax
import jax.numpy as jnp
from jax.experimental import pallas as pl
from jax.experimental.pallas import tpu as pltpu

FC_HIDDEN = 32  # nn.Linear(hidden*dir, 32) in the fc head


def gru_classifier_kernel(x_ref, w_ref, b_ref, out_ref):
    f32, bf16 = jnp.float32, jnp.bfloat16
    B = out_ref.shape[0]
    H = w_ref.shape[1]
    I = x_ref.shape[1]
    T = x_ref.shape[0] // B

    def dot(a, b):
        return jnp.dot(a, b, preferred_element_type=f32)

    # ---- static, tile-aligned slices of the packed weight slab (bf16) ----
    o = 0
    wih0_r = w_ref[o + 0 * I:o + 1 * I, :]
    wih0_z = w_ref[o + 1 * I:o + 2 * I, :]
    wih0_n = w_ref[o + 2 * I:o + 3 * I, :]
    o += 3 * I
    whh0_r = w_ref[o + 0 * H:o + 1 * H, :]
    whh0_z = w_ref[o + 1 * H:o + 2 * H, :]
    whh0_n = w_ref[o + 2 * H:o + 3 * H, :]
    o += 3 * H
    wih1_r = w_ref[o + 0 * H:o + 1 * H, :]
    wih1_z = w_ref[o + 1 * H:o + 2 * H, :]
    wih1_n = w_ref[o + 2 * H:o + 3 * H, :]
    o += 3 * H
    whh1_r = w_ref[o + 0 * H:o + 1 * H, :]
    whh1_z = w_ref[o + 1 * H:o + 2 * H, :]
    whh1_n = w_ref[o + 2 * H:o + 3 * H, :]
    o += 3 * H
    wa1 = w_ref[o:o + H, :]
    o += H
    wf1 = w_ref[o:o + H, :]

    # ---- bias slab rows (f32); broadcasts hoisted out of the loops ----
    b0_r, b0_z, b0_n = b_ref[0:1, :], b_ref[1:2, :], b_ref[2:3, :]
    bh0_n = jnp.broadcast_to(b_ref[3:4, :], (B, H))
    b1_r = jnp.broadcast_to(b_ref[4:5, :], (B, H))
    b1_z = jnp.broadcast_to(b_ref[5:6, :], (B, H))
    b1_n = jnp.broadcast_to(b_ref[6:7, :], (B, H))
    bh1_n = jnp.broadcast_to(b_ref[7:8, :], (B, H))
    ba1 = jnp.broadcast_to(b_ref[8:9, :], (B, H))
    wa2_row = jnp.broadcast_to(b_ref[9:10, :], (B, H))
    bf1 = jnp.broadcast_to(b_ref[10:11, :], (B, H))
    wf2_row = jnp.broadcast_to(b_ref[11:12, :], (B, H))
    bf2_row = b_ref[12:13, :]                  # bf2 in lane 0, zeros elsewhere

    def gru_step(gi_r, gi_z, gi_n, h, hb, w_r, w_z, w_n, bhn):
        # PyTorch GRU cell (gate order r, z, n); input-side projections and
        # folded biases are already in gi_*; only h @ Whh sits on the chain.
        # TODO(synk): keep the loop-invariant Whh staged in the MXU across the
        # unrolled steps (pltpu.matmul_push_rhs/acc_lhs/pop) once bundle dumps
        # confirm Mosaic re-pushes it per vmatmul; on v7x also use the MRB for
        # out-of-order gate pops / in-place gi+gh accumulation.
        gh_r = dot(hb, w_r)
        gh_z = dot(hb, w_z)
        gh_n = dot(hb, w_n) + bhn
        r = jax.nn.sigmoid(gi_r + gh_r)
        z = jax.nn.sigmoid(gi_z + gh_z)
        # TODO(synk): if v6e profiling shows the chain is EUP-bound, fuse the
        # r and z sigmoids into one 2H-lane sigmoid.
        n = jnp.tanh(gi_n + r * gh_n)
        return n + z * (h - n)                 # == (1 - z) * n + z * h

    # ---- layer-0 input projection hoisted & batched over all T*B rows ----
    xall = x_ref[...]                                        # (T*B, I) bf16
    gi0_r = dot(xall, wih0_r) + b0_r
    gi0_z = dot(xall, wih0_z) + b0_z
    gi0_n = dot(xall, wih0_n) + b0_n

    # ---- GRU layer 0 (fully unrolled); layer-1 input projection for step t
    # is issued right after h_t — off the critical path, hidden under the next
    # step's MXU round trip. ----
    h = jnp.zeros((B, H), f32)
    hb = jnp.zeros((B, H), bf16)
    gi1_r, gi1_z, gi1_n = [], [], []
    for t in range(T):
        lo = t * B
        h = gru_step(gi0_r[lo:lo + B], gi0_z[lo:lo + B], gi0_n[lo:lo + B],
                     h, hb, whh0_r, whh0_z, whh0_n, bh0_n)
        hb = h.astype(bf16)
        gi1_r.append(dot(hb, wih1_r) + b1_r)
        gi1_z.append(dot(hb, wih1_z) + b1_z)
        gi1_n.append(dot(hb, wih1_n) + b1_n)
    # TODO(synk): inter-layer dropout is a training-time op; identity here.

    # ---- GRU layer 1 with attention scoring interleaved per step ----
    h = jnp.zeros((B, H), f32)
    hb = jnp.zeros((B, H), bf16)
    h2b, s_blk = [], []
    for t in range(T):
        h = gru_step(gi1_r[t], gi1_z[t], gi1_n[t],
                     h, hb, whh1_r, whh1_z, whh1_n, bh1_n)
        hb = h.astype(bf16)
        h2b.append(hb)
        a_t = jnp.tanh(dot(hb, wa1) + ba1)                   # (B, H)
        # s_t = a_t @ wa2 done as mul + lane reduce (VPU + XLU, off the MXU);
        # ba2 omitted — a constant score shift cancels in the softmax.
        s_t = jnp.sum(a_t * wa2_row, axis=1, keepdims=True)  # (B, 1)
        s_blk.append(jnp.broadcast_to(s_t, (B, B)))

    # ---- fused masked softmax over time + pooling as a single matmul ----
    h2_all = jnp.concatenate(h2b, axis=0)                    # (T*B, H) bf16
    scores = jnp.concatenate(s_blk, axis=1)                  # (B, T*B), [b, t*B+k] = s_t[b]
    lane = jax.lax.broadcasted_iota(jnp.int32, (B, T * B), 1)
    row = jax.lax.broadcasted_iota(jnp.int32, (B, T * B), 0)
    keep = (lane % B) == row                                 # select column k == b
    sc = jnp.where(keep, scores, -1e30)
    m = jnp.max(sc, axis=1, keepdims=True)
    e = jnp.exp(sc - m)                                      # masked entries -> 0
    w_sel = e / jnp.sum(e, axis=1, keepdims=True)            # (B, T*B) softmax weights
    pooled = dot(w_sel.astype(bf16), h2_all)                 # (B, H) f32

    # ---- fc head: Linear -> ReLU -> (Dropout = id) -> Linear -> Sigmoid ----
    hfc = jnp.maximum(dot(pooled.astype(bf16), wf1) + bf1, 0.0)     # (B, FC=H)
    logit = (jnp.sum(hfc * wf2_row, axis=1, keepdims=True)
             + jnp.sum(bf2_row, axis=1, keepdims=True))             # (B, 1)
    out_ref[...] = jax.nn.sigmoid(logit)


def pack_params(p):
    """Pack all weights into one bf16 slab and all biases / row-vectors into one
    f32 slab so the kernel needs 3 DMAs instead of 21."""
    H = p["whh0"].shape[0]
    I = p["wih0"].shape[0]
    FC = p["wf1"].shape[1]
    assert FC == H, "packing assumes fc hidden width == GRU hidden width"
    assert I % 8 == 0 and H % 8 == 0, "keep slab row offsets sublane-aligned"

    def gates(w):                        # (K, 3H) -> [(K, H)] * 3, order (r, z, n)
        return [w[:, 0:H], w[:, H:2 * H], w[:, 2 * H:3 * H]]

    w_blocks = (gates(p["wih0"]) + gates(p["whh0"]) +
                gates(p["wih1"]) + gates(p["whh1"]) +
                [p["wa1"], p["wf1"]])
    w_slab = jnp.concatenate(w_blocks, axis=0).astype(jnp.bfloat16)

    bf2_row = jnp.zeros((1, H), jnp.float32).at[0, 0].set(p["bf2"][0, 0])
    b_rows = [
        p["bih0"][:, 0:H] + p["bhh0"][:, 0:H],            # r: b_ir + b_hr
        p["bih0"][:, H:2 * H] + p["bhh0"][:, H:2 * H],    # z: b_iz + b_hz
        p["bih0"][:, 2 * H:3 * H],                        # n: b_in (b_hn separate)
        p["bhh0"][:, 2 * H:3 * H],                        # b_hn (stays inside r*(...))
        p["bih1"][:, 0:H] + p["bhh1"][:, 0:H],
        p["bih1"][:, H:2 * H] + p["bhh1"][:, H:2 * H],
        p["bih1"][:, 2 * H:3 * H],
        p["bhh1"][:, 2 * H:3 * H],
        p["ba1"],
        p["wa2"].reshape(1, H),                           # wa2 as a row (mul+reduce)
        p["bf1"],
        p["wf2"].reshape(1, FC),                          # wf2 as a row
        bf2_row,                                          # bf2 in lane 0
        # ba2 omitted: constant shift cancels in the softmax
    ]
    b_slab = jnp.concatenate(
        b_rows + [jnp.zeros((16 - len(b_rows), H), jnp.float32)], axis=0
    ).astype(jnp.float32)
    return w_slab, b_slab


def gru_classifier_forward(x_bti, params):
    """x_bti: (B, T, input_size) float32, batch_first like the PyTorch module."""
    B, T, I = x_bti.shape
    w_slab, b_slab = pack_params(params)
    # Time-major rows (t*B + b) so per-step slices of the hoisted layer-0
    # projection are contiguous. Negligible XLA op at these sizes.
    x2d = jnp.transpose(x_bti, (1, 0, 2)).reshape(T * B, I).astype(jnp.bfloat16)

    vmem = pl.BlockSpec(memory_space=pltpu.MemorySpace.VMEM)
    return pl.pallas_call(
        gru_classifier_kernel,
        out_shape=jax.ShapeDtypeStruct((B, 1), jnp.float32),
        in_specs=[vmem, vmem, vmem],
        out_specs=vmem,
    )(x2d, w_slab, b_slab)


def init_params(key, input_size, hidden_size):
    """Deterministic parameter init (uniform, PyTorch-like scales).

    Weights are stored pre-transposed vs. PyTorch so the kernel does x @ W
    (e.g. weight_ih_l0 is (3H, I) in PyTorch -> stored as (I, 3H) here),
    gate packing order (r, z, n) as in nn.GRU.
    """
    H = hidden_size
    ks = jax.random.split(key, 16)
    sH = 1.0 / np.sqrt(H)
    sF = 1.0 / np.sqrt(FC_HIDDEN)

    def u(k, shape, scale):
        return jax.random.uniform(k, shape, jnp.float32, -scale, scale)

    return {
        "wih0": u(ks[0], (input_size, 3 * H), sH),
        "whh0": u(ks[1], (H, 3 * H), sH),
        "bih0": u(ks[2], (1, 3 * H), sH),
        "bhh0": u(ks[3], (1, 3 * H), sH),
        "wih1": u(ks[4], (H, 3 * H), sH),
        "whh1": u(ks[5], (H, 3 * H), sH),
        "bih1": u(ks[6], (1, 3 * H), sH),
        "bhh1": u(ks[7], (1, 3 * H), sH),
        "wa1": u(ks[8], (H, H), sH),
        "ba1": u(ks[9], (1, H), sH),
        "wa2": u(ks[10], (H, 1), sH),
        "ba2": u(ks[11], (1, 1), sH),
        "wf1": u(ks[12], (H, FC_HIDDEN), sH),
        "bf1": u(ks[13], (1, FC_HIDDEN), sH),
        "wf2": u(ks[14], (FC_HIDDEN, 1), sF),
        "bf2": u(ks[15], (1, 1), sF),
    }


def reference_forward(x, p):
    """Pure-JAX f32 reference mirroring PyTorch GRUClassifier (inference mode)."""
    B, T, _ = x.shape
    H = p["whh0"].shape[0]

    def cell(x_t, h, wih, whh, bih, bhh):
        gi = x_t @ wih + bih
        gh = h @ whh + bhh
        r = jax.nn.sigmoid(gi[:, :H] + gh[:, :H])
        z = jax.nn.sigmoid(gi[:, H:2 * H] + gh[:, H:2 * H])
        n = jnp.tanh(gi[:, 2 * H:] + r * gh[:, 2 * H:])
        return (1.0 - z) * n + z * h

    h = jnp.zeros((B, H), jnp.float32)
    outs1 = []
    for t in range(T):
        h = cell(x[:, t], h, p["wih0"], p["whh0"], p["bih0"], p["bhh0"])
        outs1.append(h)
    h = jnp.zeros((B, H), jnp.float32)
    outs2 = []
    for t in range(T):
        h = cell(outs1[t], h, p["wih1"], p["whh1"], p["bih1"], p["bhh1"])
        outs2.append(h)
    go = jnp.stack(outs2, axis=1)                                      # (B, T, H)
    scores = jnp.tanh(go @ p["wa1"] + p["ba1"]) @ p["wa2"] + p["ba2"]  # (B, T, 1)
    w = jax.nn.softmax(scores, axis=1)
    pooled = jnp.sum(w * go, axis=1)                                   # (B, H)
    hfc = jnp.maximum(pooled @ p["wf1"] + p["bf1"], 0.0)
    return jax.nn.sigmoid(hfc @ p["wf2"] + p["bf2"])


if __name__ == "__main__":
    key = jax.random.PRNGKey(0)
    kx, kp = jax.random.split(key)

    # Small shapes consistent with the module: batch=2, seq=8, input=16, hidden=32.
    B, T, I, H = 2, 8, 16, 32
    x = jax.random.normal(kx, (B, T, I), jnp.float32)
    params = init_params(kp, I, H)

    out = jax.block_until_ready(gru_classifier_forward(x, params))
    assert out.shape == (B, 1)

    ref = reference_forward(x, params)
    np.testing.assert_allclose(np.asarray(out), np.asarray(ref),
                               rtol=1e-2, atol=1e-2)
    print("KERNEL_OK")
</pallas_src>

<mosaic_0001>
module attributes {stable_mosaic.version = 11 : i64} {
  func.func @gru_classifier_kernel(%arg0: memref<16x16xbf16, #tpu.memory_space<vmem>>, %arg1: memref<400x32xbf16, #tpu.memory_space<vmem>>, %arg2: memref<16x32xf32, #tpu.memory_space<vmem>>, %arg3: memref<2x1xf32, #tpu.memory_space<vmem>>) attributes {dimension_semantics = [], scalar_prefetch = 0 : i64, scratch_operands = 0 : i64, tpu.core_type = #tpu.core_type<tc>} {
    %c0 = arith.constant 0 : index
    %c0_0 = arith.constant 0 : index
    %0 = vector.load %arg1[%c0, %c0_0] : memref<400x32xbf16, #tpu.memory_space<vmem>>, vector<16x32xbf16>
    %c16 = arith.constant 16 : index
    %c0_1 = arith.constant 0 : index
    %1 = vector.load %arg1[%c16, %c0_1] : memref<400x32xbf16, #tpu.memory_space<vmem>>, vector<16x32xbf16>
    %c32 = arith.constant 32 : index
    %c0_2 = arith.constant 0 : index
    %2 = vector.load %arg1[%c32, %c0_2] : memref<400x32xbf16, #tpu.memory_space<vmem>>, vector<16x32xbf16>
    %c48 = arith.constant 48 : index
    %c0_3 = arith.constant 0 : index
    %3 = vector.load %arg1[%c48, %c0_3] : memref<400x32xbf16, #tpu.memory_space<vmem>>, vector<32x32xbf16>
    %c80 = arith.constant 80 : index
    %c0_4 = arith.constant 0 : index
    %4 = vector.load %arg1[%c80, %c0_4] : memref<400x32xbf16, #tpu.memory_space<vmem>>, vector<32x32xbf16>
    %c112 = arith.constant 112 : index
    %c0_5 = arith.constant 0 : index
    %5 = vector.load %arg1[%c112, %c0_5] : memref<400x32xbf16, #tpu.memory_space<vmem>>, vector<32x32xbf16>
    %c144 = arith.constant 144 : index
    %c0_6 = arith.constant 0 : index
    %6 = vector.load %arg1[%c144, %c0_6] : memref<400x32xbf16, #tpu.memory_space<vmem>>, vector<32x32xbf16>
    %c176 = arith.constant 176 : index
    %c0_7 = arith.constant 0 : index
    %7 = vector.load %arg1[%c176, %c0_7] : memref<400x32xbf16, #tpu.memory_space<vmem>>, vector<32x32xbf16>
    %c208 = arith.constant 208 : index
    %c0_8 = arith.constant 0 : index
    %8 = vector.load %arg1[%c208, %c0_8] : memref<400x32xbf16, #tpu.memory_space<vmem>>, vector<32x32xbf16>
    %c240 = arith.constant 240 : index
    %c0_9 = arith.constant 0 : index
    %9 = vector.load %arg1[%c240, %c0_9] : memref<400x32xbf16, #tpu.memory_space<vmem>>, vector<32x32xbf16>
    %c272 = arith.constant 272 : index
    %c0_10 = arith.constant 0 : index
    %10 = vector.load %arg1[%c272, %c0_10] : memref<400x32xbf16, #tpu.memory_space<vmem>>, vector<32x32xbf16>
    %c304 = arith.constant 304 : index
    %c0_11 = arith.constant 0 : index
    %11 = vector.load %arg1[%c304, %c0_11] : memref<400x32xbf16, #tpu.memory_space<vmem>>, vector<32x32xbf16>
    %c336 = arith.constant 336 : index
    %c0_12 = arith.constant 0 : index
    %12 = vector.load %arg1[%c336, %c0_12] : memref<400x32xbf16, #tpu.memory_space<vmem>>, vector<32x32xbf16>
    %c368 = arith.constant 368 : index
    %c0_13 = arith.constant 0 : index
    %13 = vector.load %arg1[%c368, %c0_13] : memref<400x32xbf16, #tpu.memory_space<vmem>>, vector<32x32xbf16>
    %c0_14 = arith.constant 0 : index
    %c0_15 = arith.constant 0 : index
    %14 = vector.load %arg2[%c0_14, %c0_15] : memref<16x32xf32, #tpu.memory_space<vmem>>, vector<1x32xf32>
    %c1 = arith.constant 1 : index
    %c0_16 = arith.constant 0 : index
    %15 = vector.load %arg2[%c1, %c0_16] : memref<16x32xf32, #tpu.memory_space<vmem>>, vector<1x32xf32>
    %c2 = arith.constant 2 : index
    %c0_17 = arith.constant 0 : index
    %16 = vector.load %arg2[%c2, %c0_17] : memref<16x32xf32, #tpu.memory_space<vmem>>, vector<1x32xf32>
    %c3 = arith.constant 3 : index
    %c0_18 = arith.constant 0 : index
    %17 = vector.load %arg2[%c3, %c0_18] : memref<16x32xf32, #tpu.memory_space<vmem>>, vector<1x32xf32>
    %18 = vector.shape_cast %17 : vector<1x32xf32> to vector<1x32xf32>
    %19 = vector.broadcast %18 : vector<1x32xf32> to vector<2x32xf32>
    %c4 = arith.constant 4 : index
    %c0_19 = arith.constant 0 : index
    %20 = vector.load %arg2[%c4, %c0_19] : memref<16x32xf32, #tpu.memory_space<vmem>>, vector<1x32xf32>
    %21 = vector.shape_cast %20 : vector<1x32xf32> to vector<1x32xf32>
    %22 = vector.broadcast %21 : vector<1x32xf32> to vector<2x32xf32>
    %c5 = arith.constant 5 : index
    %c0_20 = arith.constant 0 : index
    %23 = vector.load %arg2[%c5, %c0_20] : memref<16x32xf32, #tpu.memory_space<vmem>>, vector<1x32xf32>
    %24 = vector.shape_cast %23 : vector<1x32xf32> to vector<1x32xf32>
    %25 = vector.broadcast %24 : vector<1x32xf32> to vector<2x32xf32>
    %c6 = arith.constant 6 : index
    %c0_21 = arith.constant 0 : index
    %26 = vector.load %arg2[%c6, %c0_21] : memref<16x32xf32, #tpu.memory_space<vmem>>, vector<1x32xf32>
    %27 = vector.shape_cast %26 : vector<1x32xf32> to vector<1x32xf32>
    %28 = vector.broadcast %27 : vector<1x32xf32> to vector<2x32xf32>
    %c7 = arith.constant 7 : index
    %c0_22 = arith.constant 0 : index
    %29 = vector.load %arg2[%c7, %c0_22] : memref<16x32xf32, #tpu.memory_space<vmem>>, vector<1x32xf32>
    %30 = vector.shape_cast %29 : vector<1x32xf32> to vector<1x32xf32>
    %31 = vector.broadcast %30 : vector<1x32xf32> to vector<2x32xf32>
    %c8 = arith.constant 8 : index
    %c0_23 = arith.constant 0 : index
    %32 = vector.load %arg2[%c8, %c0_23] : memref<16x32xf32, #tpu.memory_space<vmem>>, vector<1x32xf32>
    %33 = vector.shape_cast %32 : vector<1x32xf32> to vector<1x32xf32>
    %34 = vector.broadcast %33 : vector<1x32xf32> to vector<2x32xf32>
    %c9 = arith.constant 9 : index
    %c0_24 = arith.constant 0 : index
    %35 = vector.load %arg2[%c9, %c0_24] : memref<16x32xf32, #tpu.memory_space<vmem>>, vector<1x32xf32>
    %36 = vector.shape_cast %35 : vector<1x32xf32> to vector<1x32xf32>
    %37 = vector.broadcast %36 : vector<1x32xf32> to vector<2x32xf32>
    %c10 = arith.constant 10 : index
    %c0_25 = arith.constant 0 : index
    %38 = vector.load %arg2[%c10, %c0_25] : memref<16x32xf32, #tpu.memory_space<vmem>>, vector<1x32xf32>
    %39 = vector.shape_cast %38 : vector<1x32xf32> to vector<1x32xf32>
    %40 = vector.broadcast %39 : vector<1x32xf32> to vector<2x32xf32>
    %c11 = arith.constant 11 : index
    %c0_26 = arith.constant 0 : index
    %41 = vector.load %arg2[%c11, %c0_26] : memref<16x32xf32, #tpu.memory_space<vmem>>, vector<1x32xf32>
    %42 = vector.shape_cast %41 : vector<1x32xf32> to vector<1x32xf32>
    %43 = vector.broadcast %42 : vector<1x32xf32> to vector<2x32xf32>
    %c12 = arith.constant 12 : index
    %c0_27 = arith.constant 0 : index
    %44 = vector.load %arg2[%c12, %c0_27] : memref<16x32xf32, #tpu.memory_space<vmem>>, vector<1x32xf32>
    %c0_28 = arith.constant 0 : index
    %c0_29 = arith.constant 0 : index
    %45 = vector.load %arg0[%c0_28, %c0_29] : memref<16x16xbf16, #tpu.memory_space<vmem>>, vector<16x16xbf16>
    %cst = arith.constant dense<0.000000e+00> : vector<16x32xf32>
    %46 = tpu.matmul %45, %0, %cst {dimension_numbers = #tpu.dot_dimension_numbers<[1], [0], [0], [1], [0, 0, 1, 1], [], []>} : vector<16x16xbf16>, vector<16x32xbf16>, vector<16x32xf32> -> vector<16x32xf32>
    %47 = vector.broadcast %14 : vector<1x32xf32> to vector<16x32xf32>
    %48 = arith.addf %46, %47 : vector<16x32xf32>
    %cst_30 = arith.constant dense<0.000000e+00> : vector<16x32xf32>
    %49 = tpu.matmul %45, %1, %cst_30 {dimension_numbers = #tpu.dot_dimension_numbers<[1], [0], [0], [1], [0, 0, 1, 1], [], []>} : vector<16x16xbf16>, vector<16x32xbf16>, vector<16x32xf32> -> vector<16x32xf32>
    %50 = vector.broadcast %15 : vector<1x32xf32> to vector<16x32xf32>
    %51 = arith.addf %49, %50 : vector<16x32xf32>
    %cst_31 = arith.constant dense<0.000000e+00> : vector<16x32xf32>
    %52 = tpu.matmul %45, %2, %cst_31 {dimension_numbers = #tpu.dot_dimension_numbers<[1], [0], [0], [1], [0, 0, 1, 1], [], []>} : vector<16x16xbf16>, vector<16x32xbf16>, vector<16x32xf32> -> vector<16x32xf32>
    %53 = vector.broadcast %16 : vector<1x32xf32> to vector<16x32xf32>
    %54 = arith.addf %52, %53 : vector<16x32xf32>
    %cst_32 = arith.constant 0.000000e+00 : f32
    %55 = vector.broadcast %cst_32 : f32 to vector<2x32xf32>
    %cst_33 = arith.constant 0.000000e+00 : bf16
    %56 = vector.broadcast %cst_33 : bf16 to vector<2x32xbf16>
    %57 = vector.extract_strided_slice %48 {offsets = [0, 0], sizes = [2, 32], strides = [1, 1]} : vector<16x32xf32> to vector<2x32xf32>
    %58 = vector.extract_strided_slice %51 {offsets = [0, 0], sizes = [2, 32], strides = [1, 1]} : vector<16x32xf32> to vector<2x32xf32>
    %59 = vector.extract_strided_slice %54 {offsets = [0, 0], sizes = [2, 32], strides = [1, 1]} : vector<16x32xf32> to vector<2x32xf32>
    %cst_34 = arith.constant dense<0.000000e+00> : vector<2x32xf32>
    %60 = tpu.matmul %56, %3, %cst_34 {dimension_numbers = #tpu.dot_dimension_numbers<[1], [0], [0], [1], [0, 0, 1, 1], [], []>} : vector<2x32xbf16>, vector<32x32xbf16>, vector<2x32xf32> -> vector<2x32xf32>
    %cst_35 = arith.constant dense<0.000000e+00> : vector<2x32xf32>
    %61 = tpu.matmul %56, %4, %cst_35 {dimension_numbers = #tpu.dot_dimension_numbers<[1], [0], [0], [1], [0, 0, 1, 1], [], []>} : vector<2x32xbf16>, vector<32x32xbf16>, vector<2x32xf32> -> vector<2x32xf32>
    %cst_36 = arith.constant dense<0.000000e+00> : vector<2x32xf32>
    %62 = tpu.matmul %56, %5, %cst_36 {dimension_numbers = #tpu.dot_dimension_numbers<[1], [0], [0], [1], [0, 0, 1, 1], [], []>} : vector<2x32xbf16>, vector<32x32xbf16>, vector<2x32xf32> -> vector<2x32xf32>
    %63 = arith.addf %62, %19 : vector<2x32xf32>
    %64 = arith.addf %57, %60 : vector<2x32xf32>
    %65 = arith.negf %64 : vector<2x32xf32>
    %66 = math.exp %65 : vector<2x32xf32>
    %cst_37 = arith.constant 1.000000e+00 : f32
    %67 = vector.broadcast %cst_37 : f32 to vector<2x32xf32>
    %68 = arith.addf %67, %66 : vector<2x32xf32>
    %69 = arith.divf %67, %68 : vector<2x32xf32>
    %70 = arith.addf %58, %61 : vector<2x32xf32>
    %71 = arith.negf %70 : vector<2x32xf32>
    %72 = math.exp %71 : vector<2x32xf32>
    %cst_38 = arith.constant 1.000000e+00 : f32
    %73 = vector.broadcast %cst_38 : f32 to vector<2x32xf32>
    %74 = arith.addf %73, %72 : vector<2x32xf32>
    %75 = arith.divf %73, %74 : vector<2x32xf32>
    %76 = arith.mulf %69, %63 : vector<2x32xf32>
    %77 = arith.addf %59, %76 : vector<2x32xf32>
    %78 = math.tanh %77 : vector<2x32xf32>
    %79 = arith.subf %55, %78 : vector<2x32xf32>
    %80 = arith.mulf %75, %79 : vector<2x32xf32>
    %81 = arith.addf %78, %80 : vector<2x32xf32>
    %82 = arith.truncf %81 : vector<2x32xf32> to vector<2x32xbf16>
    %cst_39 = arith.constant dense<0.000000e+00> : vector<2x32xf32>
    %83 = tpu.matmul %82, %6, %cst_39 {dimension_numbers = #tpu.dot_dimension_numbers<[1], [0], [0], [1], [0, 0, 1, 1], [], []>} : vector<2x32xbf16>, vector<32x32xbf16>, vector<2x32xf32> -> vector<2x32xf32>
    %84 = arith.addf %83, %22 : vector<2x32xf32>
    %cst_40 = arith.constant dense<0.000000e+00> : vector<2x32xf32>
    %85 = tpu.matmul %82, %7, %cst_40 {dimension_numbers = #tpu.dot_dimension_numbers<[1], [0], [0], [1], [0, 0, 1, 1], [], []>} : vector<2x32xbf16>, vector<32x32xbf16>, vector<2x32xf32> -> vector<2x32xf32>
    %86 = arith.addf %85, %25 : vector<2x32xf32>
    %cst_41 = arith.constant dense<0.000000e+00> : vector<2x32xf32>
    %87 = tpu.matmul %82, %8, %cst_41 {dimension_numbers = #tpu.dot_dimension_numbers<[1], [0], [0], [1], [0, 0, 1, 1], [], []>} : vector<2x32xbf16>, vector<32x32xbf16>, vector<2x32xf32> -> vector<2x32xf32>
    %88 = arith.addf %87, %28 : vector<2x32xf32>
    %89 = vector.extract_strided_slice %48 {offsets = [2, 0], sizes = [2, 32], strides = [1, 1]} : vector<16x32xf32> to vector<2x32xf32>
    %90 = vector.extract_strided_slice %51 {offsets = [2, 0], sizes = [2, 32], strides = [1, 1]} : vector<16x32xf32> to vector<2x32xf32>
    %91 = vector.extract_strided_slice %54 {offsets = [2, 0], sizes = [2, 32], strides = [1, 1]} : vector<16x32xf32> to vector<2x32xf32>
    %cst_42 = arith.constant dense<0.000000e+00> : vector<2x32xf32>
    %92 = tpu.matmul %82, %3, %cst_42 {dimension_numbers = #tpu.dot_dimension_numbers<[1], [0], [0], [1], [0, 0, 1, 1], [], []>} : vector<2x32xbf16>, vector<32x32xbf16>, vector<2x32xf32> -> vector<2x32xf32>
    %cst_43 = arith.constant dense<0.000000e+00> : vector<2x32xf32>
    %93 = tpu.matmul %82, %4, %cst_43 {dimension_numbers = #tpu.dot_dimension_numbers<[1], [0], [0], [1], [0, 0, 1, 1], [], []>} : vector<2x32xbf16>, vector<32x32xbf16>, vector<2x32xf32> -> vector<2x32xf32>
    %cst_44 = arith.constant dense<0.000000e+00> : vector<2x32xf32>
    %94 = tpu.matmul %82, %5, %cst_44 {dimension_numbers = #tpu.dot_dimension_numbers<[1], [0], [0], [1], [0, 0, 1, 1], [], []>} : vector<2x32xbf16>, vector<32x32xbf16>, vector<2x32xf32> -> vector<2x32xf32>
    %95 = arith.addf %94, %19 : vector<2x32xf32>
    %96 = arith.addf %89, %92 : vector<2x32xf32>
    %97 = arith.negf %96 : vector<2x32xf32>
    %98 = math.exp %97 : vector<2x32xf32>
    %cst_45 = arith.constant 1.000000e+00 : f32
    %99 = vector.broadcast %cst_45 : f32 to vector<2x32xf32>
    %100 = arith.addf %99, %98 : vector<2x32xf32>
    %101 = arith.divf %99, %100 : vector<2x32xf32>
    %102 = arith.addf %90, %93 : vector<2x32xf32>
    %103 = arith.negf %102 : vector<2x32xf32>
    %104 = math.exp %103 : vector<2x32xf32>
    %cst_46 = arith.constant 1.000000e+00 : f32
    %105 = vector.broadcast %cst_46 : f32 to vector<2x32xf32>
    %106 = arith.addf %105, %104 : vector<2x32xf32>
    %107 = arith.divf %105, %106 : vector<2x32xf32>
    %108 = arith.mulf %101, %95 : vector<2x32xf32>
    %109 = arith.addf %91, %108 : vector<2x32xf32>
    %110 = math.tanh %109 : vector<2x32xf32>
    %111 = arith.subf %81, %110 : vector<2x32xf32>
    %112 = arith.mulf %107, %111 : vector<2x32xf32>
    %113 = arith.addf %110, %112 : vector<2x32xf32>
    %114 = arith.truncf %113 : vector<2x32xf32> to vector<2x32xbf16>
    %cst_47 = arith.constant dense<0.000000e+00> : vector<2x32xf32>
    %115 = tpu.matmul %114, %6, %cst_47 {dimension_numbers = #tpu.dot_dimension_numbers<[1], [0], [0], [1], [0, 0, 1, 1], [], []>} : vector<2x32xbf16>, vector<32x32xbf16>, vector<2x32xf32> -> vector<2x32xf32>
    %116 = arith.addf %115, %22 : vector<2x32xf32>
    %cst_48 = arith.constant dense<0.000000e+00> : vector<2x32xf32>
    %117 = tpu.matmul %114, %7, %cst_48 {dimension_numbers = #tpu.dot_dimension_numbers<[1], [0], [0], [1], [0, 0, 1, 1], [], []>} : vector<2x32xbf16>, vector<32x32xbf16>, vector<2x32xf32> -> vector<2x32xf32>
    %118 = arith.addf %117, %25 : vector<2x32xf32>
    %cst_49 = arith.constant dense<0.000000e+00> : vector<2x32xf32>
    %119 = tpu.matmul %114, %8, %cst_49 {dimension_numbers = #tpu.dot_dimension_numbers<[1], [0], [0], [1], [0, 0, 1, 1], [], []>} : vector<2x32xbf16>, vector<32x32xbf16>, vector<2x32xf32> -> vector<2x32xf32>
    %120 = arith.addf %119, %28 : vector<2x32xf32>
    %121 = vector.extract_strided_slice %48 {offsets = [4, 0], sizes = [2, 32], strides = [1, 1]} : vector<16x32xf32> to vector<2x32xf32>
    %122 = vector.extract_strided_slice %51 {offsets = [4, 0], sizes = [2, 32], strides = [1, 1]} : vector<16x32xf32> to vector<2x32xf32>
    %123 = vector.extract_strided_slice %54 {offsets = [4, 0], sizes = [2, 32], strides = [1, 1]} : vector<16x32xf32> to vector<2x32xf32>
    %cst_50 = arith.constant dense<0.000000e+00> : vector<2x32xf32>
    %124 = tpu.matmul %114, %3, %cst_50 {dimension_numbers = #tpu.dot_dimension_numbers<[1], [0], [0], [1], [0, 0, 1, 1], [], []>} : vector<2x32xbf16>, vector<32x32xbf16>, vector<2x32xf32> -> vector<2x32xf32>
    %cst_51 = arith.constant dense<0.000000e+00> : vector<2x32xf32>
    %125 = tpu.matmul %114, %4, %cst_51 {dimension_numbers = #tpu.dot_dimension_numbers<[1], [0], [0], [1], [0, 0, 1, 1], [], []>} : vector<2x32xbf16>, vector<32x32xbf16>, vector<2x32xf32> -> vector<2x32xf32>
    %cst_52 = arith.constant dense<0.000000e+00> : vector<2x32xf32>
    %126 = tpu.matmul %114, %5, %cst_52 {dimension_numbers = #tpu.dot_dimension_numbers<[1], [0], [0], [1], [0, 0, 1, 1], [], []>} : vector<2x32xbf16>, vector<32x32xbf16>, vector<2x32xf32> -> vector<2x32xf32>
    %127 = arith.addf %126, %19 : vector<2x32xf32>
    %128 = arith.addf %121, %124 : vector<2x32xf32>
    %129 = arith.negf %128 : vector<2x32xf32>
    %130 = math.exp %129 : vector<2x32xf32>
    %cst_53 = arith.constant 1.000000e+00 : f32
    %131 = vector.broadcast %cst_53 : f32 to vector<2x32xf32>
    %132 = arith.addf %131, %130 : vector<2x32xf32>
    %133 = arith.divf %131, %132 : vector<2x32xf32>
    %134 = arith.addf %122, %125 : vector<2x32xf32>
    %135 = arith.negf %134 : vector<2x32xf32>
    %136 = math.exp %135 : vector<2x32xf32>
    %cst_54 = arith.constant 1.000000e+00 : f32
    %137 = vector.broadcast %cst_54 : f32 to vector<2x32xf32>
    %138 = arith.addf %137, %136 : vector<2x32xf32>
    %139 = arith.divf %137, %138 : vector<2x32xf32>
    %140 = arith.mulf %133, %127 : vector<2x32xf32>
    %141 = arith.addf %123, %140 : vector<2x32xf32>
    %142 = math.tanh %141 : vector<2x32xf32>
    %143 = arith.subf %113, %142 : vector<2x32xf32>
    %144 = arith.mulf %139, %143 : vector<2x32xf32>
    %145 = arith.addf %142, %144 : vector<2x32xf32>
    %146 = arith.truncf %145 : vector<2x32xf32> to vector<2x32xbf16>
    %cst_55 = arith.constant dense<0.000000e+00> : vector<2x32xf32>
    %147 = tpu.matmul %146, %6, %cst_55 {dimension_numbers = #tpu.dot_dimension_numbers<[1], [0], [0], [1], [0, 0, 1, 1], [], []>} : vector<2x32xbf16>, vector<32x32xbf16>, vector<2x32xf32> -> vector<2x32xf32>
    %148 = arith.addf %147, %22 : vector<2x32xf32>
    %cst_56 = arith.constant dense<0.000000e+00> : vector<2x32xf32>
    %149 = tpu.matmul %146, %7, %cst_56 {dimension_numbers = #tpu.dot_dimension_numbers<[1], [0], [0], [1], [0, 0, 1, 1], [], []>} : vector<2x32xbf16>, vector<32x32xbf16>, vector<2x32xf32> -> vector<2x32xf32>
    %150 = arith.addf %149, %25 : vector<2x32xf32>
    %cst_57 = arith.constant dense<0.000000e+00> : vector<2x32xf32>
    %151 = tpu.matmul %146, %8, %cst_57 {dimension_numbers = #tpu.dot_dimension_numbers<[1], [0], [0], [1], [0, 0, 1, 1], [], []>} : vector<2x32xbf16>, vector<32x32xbf16>, vector<2x32xf32> -> vector<2x32xf32>
    %152 = arith.addf %151, %28 : vector<2x32xf32>
    %153 = vector.extract_strided_slice %48 {offsets = [6, 0], sizes = [2, 32], strides = [1, 1]} : vector<16x32xf32> to vector<2x32xf32>
    %154 = vector.extract_strided_slice %51 {offsets = [6, 0], sizes = [2, 32], strides = [1, 1]} : vector<16x32xf32> to vector<2x32xf32>
    %155 = vector.extract_strided_slice %54 {offsets = [6, 0], sizes = [2, 32], strides = [1, 1]} : vector<16x32xf32> to vector<2x32xf32>
    %cst_58 = arith.constant dense<0.000000e+00> : vector<2x32xf32>
    %156 = tpu.matmul %146, %3, %cst_58 {dimension_numbers = #tpu.dot_dimension_numbers<[1], [0], [0], [1], [0, 0, 1, 1], [], []>} : vector<2x32xbf16>, vector<32x32xbf16>, vector<2x32xf32> -> vector<2x32xf32>
    %cst_59 = arith.constant dense<0.000000e+00> : vector<2x32xf32>
    %157 = tpu.matmul %146, %4, %cst_59 {dimension_numbers = #tpu.dot_dimension_numbers<[1], [0], [0], [1], [0, 0, 1, 1], [], []>} : vector<2x32xbf16>, vector<32x32xbf16>, vector<2x32xf32> -> vector<2x32xf32>
    %cst_60 = arith.constant dense<0.000000e+00> : vector<2x32xf32>
    %158 = tpu.matmul %146, %5, %cst_60 {dimension_numbers = #tpu.dot_dimension_numbers<[1], [0], [0], [1], [0, 0, 1, 1], [], []>} : vector<2x32xbf16>, vector<32x32xbf16>, vector<2x32xf32> -> vector<2x32xf32>
    %159 = arith.addf %158, %19 : vector<2x32xf32>
    %160 = arith.addf %153, %156 : vector<2x32xf32>
    %161 = arith.negf %160 : vector<2x32xf32>
    %162 = math.exp %161 : vector<2x32xf32>
    %cst_61 = arith.constant 1.000000e+00 : f32
    %163 = vector.broadcast %cst_61 : f32 to vector<2x32xf32>
    %164 = arith.addf %163, %162 : vector<2x32xf32>
    %165 = arith.divf %163, %164 : vector<2x32xf32>
    %166 = arith.addf %154, %157 : vector<2x32xf32>
    %167 = arith.negf %166 : vector<2x32xf32>
    %168 = math.exp %167 : vector<2x32xf32>
    %cst_62 = arith.constant 1.000000e+00 : f32
    %169 = vector.broadcast %cst_62 : f32 to vector<2x32xf32>
    %170 = arith.addf %169, %168 : vector<2x32xf32>
    %171 = arith.divf %169, %170 : vector<2x32xf32>
    %172 = arith.mulf %165, %159 : vector<2x32xf32>
    %173 = arith.addf %155, %172 : vector<2x32xf32>
    %174 = math.tanh %173 : vector<2x32xf32>
    %175 = arith.subf %145, %174 : vector<2x32xf32>
    %176 = arith.mulf %171, %175 : vector<2x32xf32>
    %177 = arith.addf %174, %176 : vector<2x32xf32>
    %178 = arith.truncf %177 : vector<2x32xf32> to vector<2x32xbf16>
    %cst_63 = arith.constant dense<0.000000e+00> : vector<2x32xf32>
    %179 = tpu.matmul %178, %6, %cst_63 {dimension_numbers = #tpu.dot_dimension_numbers<[1], [0], [0], [1], [0, 0, 1, 1], [], []>} : vector<2x32xbf16>, vector<32x32xbf16>, vector<2x32xf32> -> vector<2x32xf32>
    %180 = arith.addf %179, %22 : vector<2x32xf32>
    %cst_64 = arith.constant dense<0.000000e+00> : vector<2x32xf32>
    %181 = tpu.matmul %178, %7, %cst_64 {dimension_numbers = #tpu.dot_dimension_numbers<[1], [0], [0], [1], [0, 0, 1, 1], [], []>} : vector<2x32xbf16>, vector<32x32xbf16>, vector<2x32xf32> -> vector<2x32xf32>
    %182 = arith.addf %181, %25 : vector<2x32xf32>
    %cst_65 = arith.constant dense<0.000000e+00> : vector<2x32xf32>
    %183 = tpu.matmul %178, %8, %cst_65 {dimension_numbers = #tpu.dot_dimension_numbers<[1], [0], [0], [1], [0, 0, 1, 1], [], []>} : vector<2x32xbf16>, vector<32x32xbf16>, vector<2x32xf32> -> vector<2x32xf32>
    %184 = arith.addf %183, %28 : vector<2x32xf32>
    %185 = vector.extract_strided_slice %48 {offsets = [8, 0], sizes = [2, 32], strides = [1, 1]} : vector<16x32xf32> to vector<2x32xf32>
    %186 = vector.extract_strided_slice %51 {offsets = [8, 0], sizes = [2, 32], strides = [1, 1]} : vector<16x32xf32> to vector<2x32xf32>
    %187 = vector.extract_strided_slice %54 {offsets = [8, 0], sizes = [2, 32], strides = [1, 1]} : vector<16x32xf32> to vector<2x32xf32>
    %cst_66 = arith.constant dense<0.000000e+00> : vector<2x32xf32>
    %188 = tpu.matmul %178, %3, %cst_66 {dimension_numbers = #tpu.dot_dimension_numbers<[1], [0], [0], [1], [0, 0, 1, 1], [], []>} : vector<2x32xbf16>, vector<32x32xbf16>, vector<2x32xf32> -> vector<2x32xf32>
    %cst_67 = arith.constant dense<0.000000e+00> : vector<2x32xf32>
    %189 = tpu.matmul %178, %4, %cst_67 {dimension_numbers = #tpu.dot_dimension_numbers<[1], [0], [0], [1], [0, 0, 1, 1], [], []>} : vector<2x32xbf16>, vector<32x32xbf16>, vector<2x32xf32> -> vector<2x32xf32>
    %cst_68 = arith.constant dense<0.000000e+00> : vector<2x32xf32>
    %190 = tpu.matmul %178, %5, %cst_68 {dimension_numbers = #tpu.dot_dimension_numbers<[1], [0], [0], [1], [0, 0, 1, 1], [], []>} : vector<2x32xbf16>, vector<32x32xbf16>, vector<2x32xf32> -> vector<2x32xf32>
    %191 = arith.addf %190, %19 : vector<2x32xf32>
    %192 = arith.addf %185, %188 : vector<2x32xf32>
    %193 = arith.negf %192 : vector<2x32xf32>
    %194 = math.exp %193 : vector<2x32xf32>
    %cst_69 = arith.constant 1.000000e+00 : f32
    %195 = vector.broadcast %cst_69 : f32 to vector<2x32xf32>
    %196 = arith.addf %195, %194 : vector<2x32xf32>
    %197 = arith.divf %195, %196 : vector<2x32xf32>
    %198 = arith.addf %186, %189 : vector<2x32xf32>
    %199 = arith.negf %198 : vector<2x32xf32>
    %200 = math.exp %199 : vector<2x32xf32>
    %cst_70 = arith.constant 1.000000e+00 : f32
    %201 = vector.broadcast %cst_70 : f32 to vector<2x32xf32>
    %202 = arith.addf %201, %200 : vector<2x32xf32>
    %203 = arith.divf %201, %202 : vector<2x32xf32>
    %204 = arith.mulf %197, %191 : vector<2x32xf32>
    %205 = arith.addf %187, %204 : vector<2x32xf32>
    %206 = math.tanh %205 : vector<2x32xf32>
    %207 = arith.subf %177, %206 : vector<2x32xf32>
    %208 = arith.mulf %203, %207 : vector<2x32xf32>
    %209 = arith.addf %206, %208 : vector<2x32xf32>
    %210 = arith.truncf %209 : vector<2x32xf32> to vector<2x32xbf16>
    %cst_71 = arith.constant dense<0.000000e+00> : vector<2x32xf32>
    %211 = tpu.matmul %210, %6, %cst_71 {dimension_numbers = #tpu.dot_dimension_numbers<[1], [0], [0], [1], [0, 0, 1, 1], [], []>} : vector<2x32xbf16>, vector<32x32xbf16>, vector<2x32xf32> -> vector<2x32xf32>
    %212 = arith.addf %211, %22 : vector<2x32xf32>
    %cst_72 = arith.constant dense<0.000000e+00> : vector<2x32xf32>
    %213 = tpu.matmul %210, %7, %cst_72 {dimension_numbers = #tpu.dot_dimension_numbers<[1], [0], [0], [1], [0, 0, 1, 1], [], []>} : vector<2x32xbf16>, vector<32x32xbf16>, vector<2x32xf32> -> vector<2x32xf32>
    %214 = arith.addf %213, %25 : vector<2x32xf32>
    %cst_73 = arith.constant dense<0.000000e+00> : vector<2x32xf32>
    %215 = tpu.matmul %210, %8, %cst_73 {dimension_numbers = #tpu.dot_dimension_numbers<[1], [0], [0], [1], [0, 0, 1, 1], [], []>} : vector<2x32xbf16>, vector<32x32xbf16>, vector<2x32xf32> -> vector<2x32xf32>
    %216 = arith.addf %215, %28 : vector<2x32xf32>
    %217 = vector.extract_strided_slice %48 {offsets = [10, 0], sizes = [2, 32], strides = [1, 1]} : vector<16x32xf32> to vector<2x32xf32>
    %218 = vector.extract_strided_slice %51 {offsets = [10, 0], sizes = [2, 32], strides = [1, 1]} : vector<16x32xf32> to vector<2x32xf32>
    %219 = vector.extract_strided_slice %54 {offsets = [10, 0], sizes = [2, 32], strides = [1, 1]} : vector<16x32xf32> to vector<2x32xf32>
    %cst_74 = arith.constant dense<0.000000e+00> : vector<2x32xf32>
    %220 = tpu.matmul %210, %3, %cst_74 {dimension_numbers = #tpu.dot_dimension_numbers<[1], [0], [0], [1], [0, 0, 1, 1], [], []>} : vector<2x32xbf16>, vector<32x32xbf16>, vector<2x32xf32> -> vector<2x32xf32>
    %cst_75 = arith.constant dense<0.000000e+00> : vector<2x32xf32>
    %221 = tpu.matmul %210, %4, %cst_75 {dimension_numbers = #tpu.dot_dimension_numbers<[1], [0], [0], [1], [0, 0, 1, 1], [], []>} : vector<2x32xbf16>, vector<32x32xbf16>, vector<2x32xf32> -> vector<2x32xf32>
    %cst_76 = arith.constant dense<0.000000e+00> : vector<2x32xf32>
    %222 = tpu.matmul %210, %5, %cst_76 {dimension_numbers = #tpu.dot_dimension_numbers<[1], [0], [0], [1], [0, 0, 1, 1], [], []>} : vector<2x32xbf16>, vector<32x32xbf16>, vector<2x32xf32> -> vector<2x32xf32>
    %223 = arith.addf %222, %19 : vector<2x32xf32>
    %224 = arith.addf %217, %220 : vector<2x32xf32>
    %225 = arith.negf %224 : vector<2x32xf32>
    %226 = math.exp %225 : vector<2x32xf32>
    %cst_77 = arith.constant 1.000000e+00 : f32
    %227 = vector.broadcast %cst_77 : f32 to vector<2x32xf32>
    %228 = arith.addf %227, %226 : vector<2x32xf32>
    %229 = arith.divf %227, %228 : vector<2x32xf32>
    %230 = arith.addf %218, %221 : vector<2x32xf32>
    %231 = arith.negf %230 : vector<2x32xf32>
    %232 = math.exp %231 : vector<2x32xf32>
    %cst_78 = arith.constant 1.000000e+00 : f32
    %233 = vector.broadcast %cst_78 : f32 to vector<2x32xf32>
    %234 = arith.addf %233, %232 : vector<2x32xf32>
    %235 = arith.divf %233, %234 : vector<2x32xf32>
    %236 = arith.mulf %229, %223 : vector<2x32xf32>
    %237 = arith.addf %219, %236 : vector<2x32xf32>
    %238 = math.tanh %237 : vector<2x32xf32>
    %239 = arith.subf %209, %238 : vector<2x32xf32>
    %240 = arith.mulf %235, %239 : vector<2x32xf32>
    %241 = arith.addf %238, %240 : vector<2x32xf32>
    %242 = arith.truncf %241 : vector<2x32xf32> to vector<2x32xbf16>
    %cst_79 = arith.constant dense<0.000000e+00> : vector<2x32xf32>
    %243 = tpu.matmul %242, %6, %cst_79 {dimension_numbers = #tpu.dot_dimension_numbers<[1], [0], [0], [1], [0, 0, 1, 1], [], []>} : vector<2x32xbf16>, vector<32x32xbf16>, vector<2x32xf32> -> vector<2x32xf32>
    %244 = arith.addf %243, %22 : vector<2x32xf32>
    %cst_80 = arith.constant dense<0.000000e+00> : vector<2x32xf32>
    %245 = tpu.matmul %242, %7, %cst_80 {dimension_numbers = #tpu.dot_dimension_numbers<[1], [0], [0], [1], [0, 0, 1, 1], [], []>} : vector<2x32xbf16>, vector<32x32xbf16>, vector<2x32xf32> -> vector<2x32xf32>
    %246 = arith.addf %245, %25 : vector<2x32xf32>
    %cst_81 = arith.constant dense<0.000000e+00> : vector<2x32xf32>
    %247 = tpu.matmul %242, %8, %cst_81 {dimension_numbers = #tpu.dot_dimension_numbers<[1], [0], [0], [1], [0, 0, 1, 1], [], []>} : vector<2x32xbf16>, vector<32x32xbf16>, vector<2x32xf32> -> vector<2x32xf32>
    %248 = arith.addf %247, %28 : vector<2x32xf32>
    %249 = vector.extract_strided_slice %48 {offsets = [12, 0], sizes = [2, 32], strides = [1, 1]} : vector<16x32xf32> to vector<2x32xf32>
    %250 = vector.extract_strided_slice %51 {offsets = [12, 0], sizes = [2, 32], strides = [1, 1]} : vector<16x32xf32> to vector<2x32xf32>
    %251 = vector.extract_strided_slice %54 {offsets = [12, 0], sizes = [2, 32], strides = [1, 1]} : vector<16x32xf32> to vector<2x32xf32>
    %cst_82 = arith.constant dense<0.000000e+00> : vector<2x32xf32>
    %252 = tpu.matmul %242, %3, %cst_82 {dimension_numbers = #tpu.dot_dimension_numbers<[1], [0], [0], [1], [0, 0, 1, 1], [], []>} : vector<2x32xbf16>, vector<32x32xbf16>, vector<2x32xf32> -> vector<2x32xf32>
    %cst_83 = arith.constant dense<0.000000e+00> : vector<2x32xf32>
    %253 = tpu.matmul %242, %4, %cst_83 {dimension_numbers = #tpu.dot_dimension_numbers<[1], [0], [0], [1], [0, 0, 1, 1], [], []>} : vector<2x32xbf16>, vector<32x32xbf16>, vector<2x32xf32> -> vector<2x32xf32>
    %cst_84 = arith.constant dense<0.000000e+00> : vector<2x32xf32>
    %254 = tpu.matmul %242, %5, %cst_84 {dimension_numbers = #tpu.dot_dimension_numbers<[1], [0], [0], [1], [0, 0, 1, 1], [], []>} : vector<2x32xbf16>, vector<32x32xbf16>, vector<2x32xf32> -> vector<2x32xf32>
    %255 = arith.addf %254, %19 : vector<2x32xf32>
    %256 = arith.addf %249, %252 : vector<2x32xf32>
    %257 = arith.negf %256 : vector<2x32xf32>
    %258 = math.exp %257 : vector<2x32xf32>
    %cst_85 = arith.constant 1.000000e+00 : f32
    %259 = vector.broadcast %cst_85 : f32 to vector<2x32xf32>
    %260 = arith.addf %259, %258 : vector<2x32xf32>
    %261 = arith.divf %259, %260 : vector<2x32xf32>
    %262 = arith.addf %250, %253 : vector<2x32xf32>
    %263 = arith.negf %262 : vector<2x32xf32>
    %264 = math.exp %263 : vector<2x32xf32>
    %cst_86 = arith.constant 1.000000e+00 : f32
    %265 = vector.broadcast %cst_86 : f32 to vector<2x32xf32>
    %266 = arith.addf %265, %264 : vector<2x32xf32>
    %267 = arith.divf %265, %266 : vector<2x32xf32>
    %268 = arith.mulf %261, %255 : vector<2x32xf32>
    %269 = arith.addf %251, %268 : vector<2x32xf32>
    %270 = math.tanh %269 : vector<2x32xf32>
    %271 = arith.subf %241, %270 : vector<2x32xf32>
    %272 = arith.mulf %267, %271 : vector<2x32xf32>
    %273 = arith.addf %270, %272 : vector<2x32xf32>
    %274 = arith.truncf %273 : vector<2x32xf32> to vector<2x32xbf16>
    %cst_87 = arith.constant dense<0.000000e+00> : vector<2x32xf32>
    %275 = tpu.matmul %274, %6, %cst_87 {dimension_numbers = #tpu.dot_dimension_numbers<[1], [0], [0], [1], [0, 0, 1, 1], [], []>} : vector<2x32xbf16>, vector<32x32xbf16>, vector<2x32xf32> -> vector<2x32xf32>
    %276 = arith.addf %275, %22 : vector<2x32xf32>
    %cst_88 = arith.constant dense<0.000000e+00> : vector<2x32xf32>
    %277 = tpu.matmul %274, %7, %cst_88 {dimension_numbers = #tpu.dot_dimension_numbers<[1], [0], [0], [1], [0, 0, 1, 1], [], []>} : vector<2x32xbf16>, vector<32x32xbf16>, vector<2x32xf32> -> vector<2x32xf32>
    %278 = arith.addf %277, %25 : vector<2x32xf32>
    %cst_89 = arith.constant dense<0.000000e+00> : vector<2x32xf32>
    %279 = tpu.matmul %274, %8, %cst_89 {dimension_numbers = #tpu.dot_dimension_numbers<[1], [0], [0], [1], [0, 0, 1, 1], [], []>} : vector<2x32xbf16>, vector<32x32xbf16>, vector<2x32xf32> -> vector<2x32xf32>
    %280 = arith.addf %279, %28 : vector<2x32xf32>
    %281 = vector.extract_strided_slice %48 {offsets = [14, 0], sizes = [2, 32], strides = [1, 1]} : vector<16x32xf32> to vector<2x32xf32>
    %282 = vector.extract_strided_slice %51 {offsets = [14, 0], sizes = [2, 32], strides = [1, 1]} : vector<16x32xf32> to vector<2x32xf32>
    %283 = vector.extract_strided_slice %54 {offsets = [14, 0], sizes = [2, 32], strides = [1, 1]} : vector<16x32xf32> to vector<2x32xf32>
    %cst_90 = arith.constant dense<0.000000e+00> : vector<2x32xf32>
    %284 = tpu.matmul %274, %3, %cst_90 {dimension_numbers = #tpu.dot_dimension_numbers<[1], [0], [0], [1], [0, 0, 1, 1], [], []>} : vector<2x32xbf16>, vector<32x32xbf16>, vector<2x32xf32> -> vector<2x32xf32>
    %cst_91 = arith.constant dense<0.000000e+00> : vector<2x32xf32>
    %285 = tpu.matmul %274, %4, %cst_91 {dimension_numbers = #tpu.dot_dimension_numbers<[1], [0], [0], [1], [0, 0, 1, 1], [], []>} : vector<2x32xbf16>, vector<32x32xbf16>, vector<2x32xf32> -> vector<2x32xf32>
    %cst_92 = arith.constant dense<0.000000e+00> : vector<2x32xf32>
    %286 = tpu.matmul %274, %5, %cst_92 {dimension_numbers = #tpu.dot_dimension_numbers<[1], [0], [0], [1], [0, 0, 1, 1], [], []>} : vector<2x32xbf16>, vector<32x32xbf16>, vector<2x32xf32> -> vector<2x32xf32>
    %287 = arith.addf %286, %19 : vector<2x32xf32>
    %288 = arith.addf %281, %284 : vector<2x32xf32>
    %289 = arith.negf %288 : vector<2x32xf32>
    %290 = math.exp %289 : vector<2x32xf32>
    %cst_93 = arith.constant 1.000000e+00 : f32
    %291 = vector.broadcast %cst_93 : f32 to vector<2x32xf32>
    %292 = arith.addf %291, %290 : vector<2x32xf32>
    %293 = arith.divf %291, %292 : vector<2x32xf32>
    %294 = arith.addf %282, %285 : vector<2x32xf32>
    %295 = arith.negf %294 : vector<2x32xf32>
    %296 = math.exp %295 : vector<2x32xf32>
    %cst_94 = arith.constant 1.000000e+00 : f32
    %297 = vector.broadcast %cst_94 : f32 to vector<2x32xf32>
    %298 = arith.addf %297, %296 : vector<2x32xf32>
    %299 = arith.divf %297, %298 : vector<2x32xf32>
    %300 = arith.mulf %293, %287 : vector<2x32xf32>
    %301 = arith.addf %283, %300 : vector<2x32xf32>
    %302 = math.tanh %301 : vector<2x32xf32>
    %303 = arith.subf %273, %302 : vector<2x32xf32>
    %304 = arith.mulf %299, %303 : vector<2x32xf32>
    %305 = arith.addf %302, %304 : vector<2x32xf32>
    %306 = arith.truncf %305 : vector<2x32xf32> to vector<2x32xbf16>
    %cst_95 = arith.constant dense<0.000000e+00> : vector<2x32xf32>
    %307 = tpu.matmul %306, %6, %cst_95 {dimension_numbers = #tpu.dot_dimension_numbers<[1], [0], [0], [1], [0, 0, 1, 1], [], []>} : vector<2x32xbf16>, vector<32x32xbf16>, vector<2x32xf32> -> vector<2x32xf32>
    %308 = arith.addf %307, %22 : vector<2x32xf32>
    %cst_96 = arith.constant dense<0.000000e+00> : vector<2x32xf32>
    %309 = tpu.matmul %306, %7, %cst_96 {dimension_numbers = #tpu.dot_dimension_numbers<[1], [0], [0], [1], [0, 0, 1, 1], [], []>} : vector<2x32xbf16>, vector<32x32xbf16>, vector<2x32xf32> -> vector<2x32xf32>
    %310 = arith.addf %309, %25 : vector<2x32xf32>
    %cst_97 = arith.constant dense<0.000000e+00> : vector<2x32xf32>
    %311 = tpu.matmul %306, %8, %cst_97 {dimension_numbers = #tpu.dot_dimension_numbers<[1], [0], [0], [1], [0, 0, 1, 1], [], []>} : vector<2x32xbf16>, vector<32x32xbf16>, vector<2x32xf32> -> vector<2x32xf32>
    %312 = arith.addf %311, %28 : vector<2x32xf32>
    %cst_98 = arith.constant 0.000000e+00 : f32
    %313 = vector.broadcast %cst_98 : f32 to vector<2x32xf32>
    %cst_99 = arith.constant 0.000000e+00 : bf16
    %314 = vector.broadcast %cst_99 : bf16 to vector<2x32xbf16>
    %cst_100 = arith.constant dense<0.000000e+00> : vector<2x32xf32>
    %315 = tpu.matmul %314, %9, %cst_100 {dimension_numbers = #tpu.dot_dimension_numbers<[1], [0], [0], [1], [0, 0, 1, 1], [], []>} : vector<2x32xbf16>, vector<32x32xbf16>, vector<2x32xf32> -> vector<2x32xf32>
    %cst_101 = arith.constant dense<0.000000e+00> : vector<2x32xf32>
    %316 = tpu.matmul %314, %10, %cst_101 {dimension_numbers = #tpu.dot_dimension_numbers<[1], [0], [0], [1], [0, 0, 1, 1], [], []>} : vector<2x32xbf16>, vector<32x32xbf16>, vector<2x32xf32> -> vector<2x32xf32>
    %cst_102 = arith.constant dense<0.000000e+00> : vector<2x32xf32>
    %317 = tpu.matmul %314, %11, %cst_102 {dimension_numbers = #tpu.dot_dimension_numbers<[1], [0], [0], [1], [0, 0, 1, 1], [], []>} : vector<2x32xbf16>, vector<32x32xbf16>, vector<2x32xf32> -> vector<2x32xf32>
    %318 = arith.addf %317, %31 : vector<2x32xf32>
    %319 = arith.addf %84, %315 : vector<2x32xf32>
    %320 = arith.negf %319 : vector<2x32xf32>
    %321 = math.exp %320 : vector<2x32xf32>
    %cst_103 = arith.constant 1.000000e+00 : f32
    %322 = vector.broadcast %cst_103 : f32 to vector<2x32xf32>
    %323 = arith.addf %322, %321 : vector<2x32xf32>
    %324 = arith.divf %322, %323 : vector<2x32xf32>
    %325 = arith.addf %86, %316 : vector<2x32xf32>
    %326 = arith.negf %325 : vector<2x32xf32>
    %327 = math.exp %326 : vector<2x32xf32>
    %cst_104 = arith.constant 1.000000e+00 : f32
    %328 = vector.broadcast %cst_104 : f32 to vector<2x32xf32>
    %329 = arith.addf %328, %327 : vector<2x32xf32>
    %330 = arith.divf %328, %329 : vector<2x32xf32>
    %331 = arith.mulf %324, %318 : vector<2x32xf32>
    %332 = arith.addf %88, %331 : vector<2x32xf32>
    %333 = math.tanh %332 : vector<2x32xf32>
    %334 = arith.subf %313, %333 : vector<2x32xf32>
    %335 = arith.mulf %330, %334 : vector<2x32xf32>
    %336 = arith.addf %333, %335 : vector<2x32xf32>
    %337 = arith.truncf %336 : vector<2x32xf32> to vector<2x32xbf16>
    %cst_105 = arith.constant dense<0.000000e+00> : vector<2x32xf32>
    %338 = tpu.matmul %337, %12, %cst_105 {dimension_numbers = #tpu.dot_dimension_numbers<[1], [0], [0], [1], [0, 0, 1, 1], [], []>} : vector<2x32xbf16>, vector<32x32xbf16>, vector<2x32xf32> -> vector<2x32xf32>
    %339 = arith.addf %338, %34 : vector<2x32xf32>
    %340 = math.tanh %339 : vector<2x32xf32>
    %341 = arith.mulf %340, %37 : vector<2x32xf32>
    %cst_106 = arith.constant dense<0.000000e+00> : vector<2xf32>
    %342 = vector.multi_reduction <add>, %341, %cst_106 [1] : vector<2x32xf32> to vector<2xf32>
    %343 = vector.shape_cast %342 : vector<2xf32> to vector<2x1xf32>
    %344 = vector.shape_cast %343 : vector<2x1xf32> to vector<2x1xf32>
    %345 = vector.broadcast %344 : vector<2x1xf32> to vector<2x2xf32>
    %cst_107 = arith.constant dense<0.000000e+00> : vector<2x32xf32>
    %346 = tpu.matmul %337, %9, %cst_107 {dimension_numbers = #tpu.dot_dimension_numbers<[1], [0], [0], [1], [0, 0, 1, 1], [], []>} : vector<2x32xbf16>, vector<32x32xbf16>, vector<2x32xf32> -> vector<2x32xf32>
    %cst_108 = arith.constant dense<0.000000e+00> : vector<2x32xf32>
    %347 = tpu.matmul %337, %10, %cst_108 {dimension_numbers = #tpu.dot_dimension_numbers<[1], [0], [0], [1], [0, 0, 1, 1], [], []>} : vector<2x32xbf16>, vector<32x32xbf16>, vector<2x32xf32> -> vector<2x32xf32>
    %cst_109 = arith.constant dense<0.000000e+00> : vector<2x32xf32>
    %348 = tpu.matmul %337, %11, %cst_109 {dimension_numbers = #tpu.dot_dimension_numbers<[1], [0], [0], [1], [0, 0, 1, 1], [], []>} : vector<2x32xbf16>, vector<32x32xbf16>, vector<2x32xf32> -> vector<2x32xf32>
    %349 = arith.addf %348, %31 : vector<2x32xf32>
    %350 = arith.addf %116, %346 : vector<2x32xf32>
    %351 = arith.negf %350 : vector<2x32xf32>
    %352 = math.exp %351 : vector<2x32xf32>
    %cst_110 = arith.constant 1.000000e+00 : f32
    %353 = vector.broadcast %cst_110 : f32 to vector<2x32xf32>
    %354 = arith.addf %353, %352 : vector<2x32xf32>
    %355 = arith.divf %353, %354 : vector<2x32xf32>
    %356 = arith.addf %118, %347 : vector<2x32xf32>
    %357 = arith.negf %356 : vector<2x32xf32>
    %358 = math.exp %357 : vector<2x32xf32>
    %cst_111 = arith.constant 1.000000e+00 : f32
    %359 = vector.broadcast %cst_111 : f32 to vector<2x32xf32>
    %360 = arith.addf %359, %358 : vector<2x32xf32>
    %361 = arith.divf %359, %360 : vector<2x32xf32>
    %362 = arith.mulf %355, %349 : vector<2x32xf32>
    %363 = arith.addf %120, %362 : vector<2x32xf32>
    %364 = math.tanh %363 : vector<2x32xf32>
    %365 = arith.subf %336, %364 : vector<2x32xf32>
    %366 = arith.mulf %361, %365 : vector<2x32xf32>
    %367 = arith.addf %364, %366 : vector<2x32xf32>
    %368 = arith.truncf %367 : vector<2x32xf32> to vector<2x32xbf16>
    %cst_112 = arith.constant dense<0.000000e+00> : vector<2x32xf32>
    %369 = tpu.matmul %368, %12, %cst_112 {dimension_numbers = #tpu.dot_dimension_numbers<[1], [0], [0], [1], [0, 0, 1, 1], [], []>} : vector<2x32xbf16>, vector<32x32xbf16>, vector<2x32xf32> -> vector<2x32xf32>
    %370 = arith.addf %369, %34 : vector<2x32xf32>
    %371 = math.tanh %370 : vector<2x32xf32>
    %372 = arith.mulf %371, %37 : vector<2x32xf32>
    %cst_113 = arith.constant dense<0.000000e+00> : vector<2xf32>
    %373 = vector.multi_reduction <add>, %372, %cst_113 [1] : vector<2x32xf32> to vector<2xf32>
    %374 = vector.shape_cast %373 : vector<2xf32> to vector<2x1xf32>
    %375 = vector.shape_cast %374 : vector<2x1xf32> to vector<2x1xf32>
    %376 = vector.broadcast %375 : vector<2x1xf32> to vector<2x2xf32>
    %cst_114 = arith.constant dense<0.000000e+00> : vector<2x32xf32>
    %377 = tpu.matmul %368, %9, %cst_114 {dimension_numbers = #tpu.dot_dimension_numbers<[1], [0], [0], [1], [0, 0, 1, 1], [], []>} : vector<2x32xbf16>, vector<32x32xbf16>, vector<2x32xf32> -> vector<2x32xf32>
    %cst_115 = arith.constant dense<0.000000e+00> : vector<2x32xf32>
    %378 = tpu.matmul %368, %10, %cst_115 {dimension_numbers = #tpu.dot_dimension_numbers<[1], [0], [0], [1], [0, 0, 1, 1], [], []>} : vector<2x32xbf16>, vector<32x32xbf16>, vector<2x32xf32> -> vector<2x32xf32>
    %cst_116 = arith.constant dense<0.000000e+00> : vector<2x32xf32>
    %379 = tpu.matmul %368, %11, %cst_116 {dimension_numbers = #tpu.dot_dimension_numbers<[1], [0], [0], [1], [0, 0, 1, 1], [], []>} : vector<2x32xbf16>, vector<32x32xbf16>, vector<2x32xf32> -> vector<2x32xf32>
    %380 = arith.addf %379, %31 : vector<2x32xf32>
    %381 = arith.addf %148, %377 : vector<2x32xf32>
    %382 = arith.negf %381 : vector<2x32xf32>
    %383 = math.exp %382 : vector<2x32xf32>
    %cst_117 = arith.constant 1.000000e+00 : f32
    %384 = vector.broadcast %cst_117 : f32 to vector<2x32xf32>
    %385 = arith.addf %384, %383 : vector<2x32xf32>
    %386 = arith.divf %384, %385 : vector<2x32xf32>
    %387 = arith.addf %150, %378 : vector<2x32xf32>
    %388 = arith.negf %387 : vector<2x32xf32>
    %389 = math.exp %388 : vector<2x32xf32>
    %cst_118 = arith.constant 1.000000e+00 : f32
    %390 = vector.broadcast %cst_118 : f32 to vector<2x32xf32>
    %391 = arith.addf %390, %389 : vector<2x32xf32>
    %392 = arith.divf %390, %391 : vector<2x32xf32>
    %393 = arith.mulf %386, %380 : vector<2x32xf32>
    %394 = arith.addf %152, %393 : vector<2x32xf32>
    %395 = math.tanh %394 : vector<2x32xf32>
    %396 = arith.subf %367, %395 : vector<2x32xf32>
    %397 = arith.mulf %392, %396 : vector<2x32xf32>
    %398 = arith.addf %395, %397 : vector<2x32xf32>
    %399 = arith.truncf %398 : vector<2x32xf32> to vector<2x32xbf16>
    %cst_119 = arith.constant dense<0.000000e+00> : vector<2x32xf32>
    %400 = tpu.matmul %399, %12, %cst_119 {dimension_numbers = #tpu.dot_dimension_numbers<[1], [0], [0], [1], [0, 0, 1, 1], [], []>} : vector<2x32xbf16>, vector<32x32xbf16>, vector<2x32xf32> -> vector<2x32xf32>
    %401 = arith.addf %400, %34 : vector<2x32xf32>
    %402 = math.tanh %401 : vector<2x32xf32>
    %403 = arith.mulf %402, %37 : vector<2x32xf32>
    %cst_120 = arith.constant dense<0.000000e+00> : vector<2xf32>
    %404 = vector.multi_reduction <add>, %403, %cst_120 [1] : vector<2x32xf32> to vector<2xf32>
    %405 = vector.shape_cast %404 : vector<2xf32> to vector<2x1xf32>
    %406 = vector.shape_cast %405 : vector<2x1xf32> to vector<2x1xf32>
    %407 = vector.broadcast %406 : vector<2x1xf32> to vector<2x2xf32>
    %cst_121 = arith.constant dense<0.000000e+00> : vector<2x32xf32>
    %408 = tpu.matmul %399, %9, %cst_121 {dimension_numbers = #tpu.dot_dimension_numbers<[1], [0], [0], [1], [0, 0, 1, 1], [], []>} : vector<2x32xbf16>, vector<32x32xbf16>, vector<2x32xf32> -> vector<2x32xf32>
    %cst_122 = arith.constant dense<0.000000e+00> : vector<2x32xf32>
    %409 = tpu.matmul %399, %10, %cst_122 {dimension_numbers = #tpu.dot_dimension_numbers<[1], [0], [0], [1], [0, 0, 1, 1], [], []>} : vector<2x32xbf16>, vector<32x32xbf16>, vector<2x32xf32> -> vector<2x32xf32>
    %cst_123 = arith.constant dense<0.000000e+00> : vector<2x32xf32>
    %410 = tpu.matmul %399, %11, %cst_123 {dimension_numbers = #tpu.dot_dimension_numbers<[1], [0], [0], [1], [0, 0, 1, 1], [], []>} : vector<2x32xbf16>, vector<32x32xbf16>, vector<2x32xf32> -> vector<2x32xf32>
    %411 = arith.addf %410, %31 : vector<2x32xf32>
    %412 = arith.addf %180, %408 : vector<2x32xf32>
    %413 = arith.negf %412 : vector<2x32xf32>
    %414 = math.exp %413 : vector<2x32xf32>
    %cst_124 = arith.constant 1.000000e+00 : f32
    %415 = vector.broadcast %cst_124 : f32 to vector<2x32xf32>
    %416 = arith.addf %415, %414 : vector<2x32xf32>
    %417 = arith.divf %415, %416 : vector<2x32xf32>
    %418 = arith.addf %182, %409 : vector<2x32xf32>
    %419 = arith.negf %418 : vector<2x32xf32>
    %420 = math.exp %419 : vector<2x32xf32>
    %cst_125 = arith.constant 1.000000e+00 : f32
    %421 = vector.broadcast %cst_125 : f32 to vector<2x32xf32>
    %422 = arith.addf %421, %420 : vector<2x32xf32>
    %423 = arith.divf %421, %422 : vector<2x32xf32>
    %424 = arith.mulf %417, %411 : vector<2x32xf32>
    %425 = arith.addf %184, %424 : vector<2x32xf32>
    %426 = math.tanh %425 : vector<2x32xf32>
    %427 = arith.subf %398, %426 : vector<2x32xf32>
    %428 = arith.mulf %423, %427 : vector<2x32xf32>
    %429 = arith.addf %426, %428 : vector<2x32xf32>
    %430 = arith.truncf %429 : vector<2x32xf32> to vector<2x32xbf16>
    %cst_126 = arith.constant dense<0.000000e+00> : vector<2x32xf32>
    %431 = tpu.matmul %430, %12, %cst_126 {dimension_numbers = #tpu.dot_dimension_numbers<[1], [0], [0], [1], [0, 0, 1, 1], [], []>} : vector<2x32xbf16>, vector<32x32xbf16>, vector<2x32xf32> -> vector<2x32xf32>
    %432 = arith.addf %431, %34 : vector<2x32xf32>
    %433 = math.tanh %432 : vector<2x32xf32>
    %434 = arith.mulf %433, %37 : vector<2x32xf32>
    %cst_127 = arith.constant dense<0.000000e+00> : vector<2xf32>
    %435 = vector.multi_reduction <add>, %434, %cst_127 [1] : vector<2x32xf32> to vector<2xf32>
    %436 = vector.shape_cast %435 : vector<2xf32> to vector<2x1xf32>
    %437 = vector.shape_cast %436 : vector<2x1xf32> to vector<2x1xf32>
    %438 = vector.broadcast %437 : vector<2x1xf32> to vector<2x2xf32>
    %cst_128 = arith.constant dense<0.000000e+00> : vector<2x32xf32>
    %439 = tpu.matmul %430, %9, %cst_128 {dimension_numbers = #tpu.dot_dimension_numbers<[1], [0], [0], [1], [0, 0, 1, 1], [], []>} : vector<2x32xbf16>, vector<32x32xbf16>, vector<2x32xf32> -> vector<2x32xf32>
    %cst_129 = arith.constant dense<0.000000e+00> : vector<2x32xf32>
    %440 = tpu.matmul %430, %10, %cst_129 {dimension_numbers = #tpu.dot_dimension_numbers<[1], [0], [0], [1], [0, 0, 1, 1], [], []>} : vector<2x32xbf16>, vector<32x32xbf16>, vector<2x32xf32> -> vector<2x32xf32>
    %cst_130 = arith.constant dense<0.000000e+00> : vector<2x32xf32>
    %441 = tpu.matmul %430, %11, %cst_130 {dimension_numbers = #tpu.dot_dimension_numbers<[1], [0], [0], [1], [0, 0, 1, 1], [], []>} : vector<2x32xbf16>, vector<32x32xbf16>, vector<2x32xf32> -> vector<2x32xf32>
    %442 = arith.addf %441, %31 : vector<2x32xf32>
    %443 = arith.addf %212, %439 : vector<2x32xf32>
    %444 = arith.negf %443 : vector<2x32xf32>
    %445 = math.exp %444 : vector<2x32xf32>
    %cst_131 = arith.constant 1.000000e+00 : f32
    %446 = vector.broadcast %cst_131 : f32 to vector<2x32xf32>
    %447 = arith.addf %446, %445 : vector<2x32xf32>
    %448 = arith.divf %446, %447 : vector<2x32xf32>
    %449 = arith.addf %214, %440 : vector<2x32xf32>
    %450 = arith.negf %449 : vector<2x32xf32>
    %451 = math.exp %450 : vector<2x32xf32>
    %cst_132 = arith.constant 1.000000e+00 : f32
    %452 = vector.broadcast %cst_132 : f32 to vector<2x32xf32>
    %453 = arith.addf %452, %451 : vector<2x32xf32>
    %454 = arith.divf %452, %453 : vector<2x32xf32>
    %455 = arith.mulf %448, %442 : vector<2x32xf32>
    %456 = arith.addf %216, %455 : vector<2x32xf32>
    %457 = math.tanh %456 : vector<2x32xf32>
    %458 = arith.subf %429, %457 : vector<2x32xf32>
    %459 = arith.mulf %454, %458 : vector<2x32xf32>
    %460 = arith.addf %457, %459 : vector<2x32xf32>
    %461 = arith.truncf %460 : vector<2x32xf32> to vector<2x32xbf16>
    %cst_133 = arith.constant dense<0.000000e+00> : vector<2x32xf32>
    %462 = tpu.matmul %461, %12, %cst_133 {dimension_numbers = #tpu.dot_dimension_numbers<[1], [0], [0], [1], [0, 0, 1, 1], [], []>} : vector<2x32xbf16>, vector<32x32xbf16>, vector<2x32xf32> -> vector<2x32xf32>
    %463 = arith.addf %462, %34 : vector<2x32xf32>
    %464 = math.tanh %463 : vector<2x32xf32>
    %465 = arith.mulf %464, %37 : vector<2x32xf32>
    %cst_134 = arith.constant dense<0.000000e+00> : vector<2xf32>
    %466 = vector.multi_reduction <add>, %465, %cst_134 [1] : vector<2x32xf32> to vector<2xf32>
    %467 = vector.shape_cast %466 : vector<2xf32> to vector<2x1xf32>
    %468 = vector.shape_cast %467 : vector<2x1xf32> to vector<2x1xf32>
    %469 = vector.broadcast %468 : vector<2x1xf32> to vector<2x2xf32>
    %cst_135 = arith.constant dense<0.000000e+00> : vector<2x32xf32>
    %470 = tpu.matmul %461, %9, %cst_135 {dimension_numbers = #tpu.dot_dimension_numbers<[1], [0], [0], [1], [0, 0, 1, 1], [], []>} : vector<2x32xbf16>, vector<32x32xbf16>, vector<2x32xf32> -> vector<2x32xf32>
    %cst_136 = arith.constant dense<0.000000e+00> : vector<2x32xf32>
    %471 = tpu.matmul %461, %10, %cst_136 {dimension_numbers = #tpu.dot_dimension_numbers<[1], [0], [0], [1], [0, 0, 1, 1], [], []>} : vector<2x32xbf16>, vector<32x32xbf16>, vector<2x32xf32> -> vector<2x32xf32>
    %cst_137 = arith.constant dense<0.000000e+00> : vector<2x32xf32>
    %472 = tpu.matmul %461, %11, %cst_137 {dimension_numbers = #tpu.dot_dimension_numbers<[1], [0], [0], [1], [0, 0, 1, 1], [], []>} : vector<2x32xbf16>, vector<32x32xbf16>, vector<2x32xf32> -> vector<2x32xf32>
    %473 = arith.addf %472, %31 : vector<2x32xf32>
    %474 = arith.addf %244, %470 : vector<2x32xf32>
    %475 = arith.negf %474 : vector<2x32xf32>
    %476 = math.exp %475 : vector<2x32xf32>
    %cst_138 = arith.constant 1.000000e+00 : f32
    %477 = vector.broadcast %cst_138 : f32 to vector<2x32xf32>
    %478 = arith.addf %477, %476 : vector<2x32xf32>
    %479 = arith.divf %477, %478 : vector<2x32xf32>
    %480 = arith.addf %246, %471 : vector<2x32xf32>
    %481 = arith.negf %480 : vector<2x32xf32>
    %482 = math.exp %481 : vector<2x32xf32>
    %cst_139 = arith.constant 1.000000e+00 : f32
    %483 = vector.broadcast %cst_139 : f32 to vector<2x32xf32>
    %484 = arith.addf %483, %482 : vector<2x32xf32>
    %485 = arith.divf %483, %484 : vector<2x32xf32>
    %486 = arith.mulf %479, %473 : vector<2x32xf32>
    %487 = arith.addf %248, %486 : vector<2x32xf32>
    %488 = math.tanh %487 : vector<2x32xf32>
    %489 = arith.subf %460, %488 : vector<2x32xf32>
    %490 = arith.mulf %485, %489 : vector<2x32xf32>
    %491 = arith.addf %488, %490 : vector<2x32xf32>
    %492 = arith.truncf %491 : vector<2x32xf32> to vector<2x32xbf16>
    %cst_140 = arith.constant dense<0.000000e+00> : vector<2x32xf32>
    %493 = tpu.matmul %492, %12, %cst_140 {dimension_numbers = #tpu.dot_dimension_numbers<[1], [0], [0], [1], [0, 0, 1, 1], [], []>} : vector<2x32xbf16>, vector<32x32xbf16>, vector<2x32xf32> -> vector<2x32xf32>
    %494 = arith.addf %493, %34 : vector<2x32xf32>
    %495 = math.tanh %494 : vector<2x32xf32>
    %496 = arith.mulf %495, %37 : vector<2x32xf32>
    %cst_141 = arith.constant dense<0.000000e+00> : vector<2xf32>
    %497 = vector.multi_reduction <add>, %496, %cst_141 [1] : vector<2x32xf32> to vector<2xf32>
    %498 = vector.shape_cast %497 : vector<2xf32> to vector<2x1xf32>
    %499 = vector.shape_cast %498 : vector<2x1xf32> to vector<2x1xf32>
    %500 = vector.broadcast %499 : vector<2x1xf32> to vector<2x2xf32>
    %cst_142 = arith.constant dense<0.000000e+00> : vector<2x32xf32>
    %501 = tpu.matmul %492, %9, %cst_142 {dimension_numbers = #tpu.dot_dimension_numbers<[1], [0], [0], [1], [0, 0, 1, 1], [], []>} : vector<2x32xbf16>, vector<32x32xbf16>, vector<2x32xf32> -> vector<2x32xf32>
    %cst_143 = arith.constant dense<0.000000e+00> : vector<2x32xf32>
    %502 = tpu.matmul %492, %10, %cst_143 {dimension_numbers = #tpu.dot_dimension_numbers<[1], [0], [0], [1], [0, 0, 1, 1], [], []>} : vector<2x32xbf16>, vector<32x32xbf16>, vector<2x32xf32> -> vector<2x32xf32>
    %cst_144 = arith.constant dense<0.000000e+00> : vector<2x32xf32>
    %503 = tpu.matmul %492, %11, %cst_144 {dimension_numbers = #tpu.dot_dimension_numbers<[1], [0], [0], [1], [0, 0, 1, 1], [], []>} : vector<2x32xbf16>, vector<32x32xbf16>, vector<2x32xf32> -> vector<2x32xf32>
    %504 = arith.addf %503, %31 : vector<2x32xf32>
    %505 = arith.addf %276, %501 : vector<2x32xf32>
    %506 = arith.negf %505 : vector<2x32xf32>
    %507 = math.exp %506 : vector<2x32xf32>
    %cst_145 = arith.constant 1.000000e+00 : f32
    %508 = vector.broadcast %cst_145 : f32 to vector<2x32xf32>
    %509 = arith.addf %508, %507 : vector<2x32xf32>
    %510 = arith.divf %508, %509 : vector<2x32xf32>
    %511 = arith.addf %278, %502 : vector<2x32xf32>
    %512 = arith.negf %511 : vector<2x32xf32>
    %513 = math.exp %512 : vector<2x32xf32>
    %cst_146 = arith.constant 1.000000e+00 : f32
    %514 = vector.broadcast %cst_146 : f32 to vector<2x32xf32>
    %515 = arith.addf %514, %513 : vector<2x32xf32>
    %516 = arith.divf %514, %515 : vector<2x32xf32>
    %517 = arith.mulf %510, %504 : vector<2x32xf32>
    %518 = arith.addf %280, %517 : vector<2x32xf32>
    %519 = math.tanh %518 : vector<2x32xf32>
    %520 = arith.subf %491, %519 : vector<2x32xf32>
    %521 = arith.mulf %516, %520 : vector<2x32xf32>
    %522 = arith.addf %519, %521 : vector<2x32xf32>
    %523 = arith.truncf %522 : vector<2x32xf32> to vector<2x32xbf16>
    %cst_147 = arith.constant dense<0.000000e+00> : vector<2x32xf32>
    %524 = tpu.matmul %523, %12, %cst_147 {dimension_numbers = #tpu.dot_dimension_numbers<[1], [0], [0], [1], [0, 0, 1, 1], [], []>} : vector<2x32xbf16>, vector<32x32xbf16>, vector<2x32xf32> -> vector<2x32xf32>
    %525 = arith.addf %524, %34 : vector<2x32xf32>
    %526 = math.tanh %525 : vector<2x32xf32>
    %527 = arith.mulf %526, %37 : vector<2x32xf32>
    %cst_148 = arith.constant dense<0.000000e+00> : vector<2xf32>
    %528 = vector.multi_reduction <add>, %527, %cst_148 [1] : vector<2x32xf32> to vector<2xf32>
    %529 = vector.shape_cast %528 : vector<2xf32> to vector<2x1xf32>
    %530 = vector.shape_cast %529 : vector<2x1xf32> to vector<2x1xf32>
    %531 = vector.broadcast %530 : vector<2x1xf32> to vector<2x2xf32>
    %cst_149 = arith.constant dense<0.000000e+00> : vector<2x32xf32>
    %532 = tpu.matmul %523, %9, %cst_149 {dimension_numbers = #tpu.dot_dimension_numbers<[1], [0], [0], [1], [0, 0, 1, 1], [], []>} : vector<2x32xbf16>, vector<32x32xbf16>, vector<2x32xf32> -> vector<2x32xf32>
    %cst_150 = arith.constant dense<0.000000e+00> : vector<2x32xf32>
    %533 = tpu.matmul %523, %10, %cst_150 {dimension_numbers = #tpu.dot_dimension_numbers<[1], [0], [0], [1], [0, 0, 1, 1], [], []>} : vector<2x32xbf16>, vector<32x32xbf16>, vector<2x32xf32> -> vector<2x32xf32>
    %cst_151 = arith.constant dense<0.000000e+00> : vector<2x32xf32>
    %534 = tpu.matmul %523, %11, %cst_151 {dimension_numbers = #tpu.dot_dimension_numbers<[1], [0], [0], [1], [0, 0, 1, 1], [], []>} : vector<2x32xbf16>, vector<32x32xbf16>, vector<2x32xf32> -> vector<2x32xf32>
    %535 = arith.addf %534, %31 : vector<2x32xf32>
    %536 = arith.addf %308, %532 : vector<2x32xf32>
    %537 = arith.negf %536 : vector<2x32xf32>
    %538 = math.exp %537 : vector<2x32xf32>
    %cst_152 = arith.constant 1.000000e+00 : f32
    %539 = vector.broadcast %cst_152 : f32 to vector<2x32xf32>
    %540 = arith.addf %539, %538 : vector<2x32xf32>
    %541 = arith.divf %539, %540 : vector<2x32xf32>
    %542 = arith.addf %310, %533 : vector<2x32xf32>
    %543 = arith.negf %542 : vector<2x32xf32>
    %544 = math.exp %543 : vector<2x32xf32>
    %cst_153 = arith.constant 1.000000e+00 : f32
    %545 = vector.broadcast %cst_153 : f32 to vector<2x32xf32>
    %546 = arith.addf %545, %544 : vector<2x32xf32>
    %547 = arith.divf %545, %546 : vector<2x32xf32>
    %548 = arith.mulf %541, %535 : vector<2x32xf32>
    %549 = arith.addf %312, %548 : vector<2x32xf32>
    %550 = math.tanh %549 : vector<2x32xf32>
    %551 = arith.subf %522, %550 : vector<2x32xf32>
    %552 = arith.mulf %547, %551 : vector<2x32xf32>
    %553 = arith.addf %550, %552 : vector<2x32xf32>
    %554 = arith.truncf %553 : vector<2x32xf32> to vector<2x32xbf16>
    %cst_154 = arith.constant dense<0.000000e+00> : vector<2x32xf32>
    %555 = tpu.matmul %554, %12, %cst_154 {dimension_numbers = #tpu.dot_dimension_numbers<[1], [0], [0], [1], [0, 0, 1, 1], [], []>} : vector<2x32xbf16>, vector<32x32xbf16>, vector<2x32xf32> -> vector<2x32xf32>
    %556 = arith.addf %555, %34 : vector<2x32xf32>
    %557 = math.tanh %556 : vector<2x32xf32>
    %558 = arith.mulf %557, %37 : vector<2x32xf32>
    %cst_155 = arith.constant dense<0.000000e+00> : vector<2xf32>
    %559 = vector.multi_reduction <add>, %558, %cst_155 [1] : vector<2x32xf32> to vector<2xf32>
    %560 = vector.shape_cast %559 : vector<2xf32> to vector<2x1xf32>
    %561 = vector.shape_cast %560 : vector<2x1xf32> to vector<2x1xf32>
    %562 = vector.broadcast %561 : vector<2x1xf32> to vector<2x2xf32>
    %563 = tpu.concatenate %337, %368, %399, %430, %461, %492, %523, %554 in 0 : vector<2x32xbf16>, vector<2x32xbf16>, vector<2x32xbf16>, vector<2x32xbf16>, vector<2x32xbf16>, vector<2x32xbf16>, vector<2x32xbf16>, vector<2x32xbf16> -> vector<16x32xbf16>
    %564 = tpu.concatenate %345, %376, %407, %438, %469, %500, %531, %562 in 1 : vector<2x2xf32>, vector<2x2xf32>, vector<2x2xf32>, vector<2x2xf32>, vector<2x2xf32>, vector<2x2xf32>, vector<2x2xf32>, vector<2x2xf32> -> vector<2x16xf32>
    %565 = tpu.iota {dimensions = array<i32: 1>} : vector<2x16xi32>
    %566 = tpu.iota {dimensions = array<i32: 0>} : vector<2x16xi32>
    %c2_i32 = arith.constant 2 : i32
    %c0_i32 = arith.constant 0 : i32
    %567 = arith.cmpi eq, %c2_i32, %c0_i32 : i32
    %c1_i32 = arith.constant 1 : i32
    %568 = arith.select %567, %c1_i32, %c2_i32 : i32
    %569 = vector.broadcast %568 : i32 to vector<2x16xi32>
    %570 = arith.remsi %565, %569 : vector<2x16xi32>
    %c0_i32_156 = arith.constant 0 : i32
    %571 = vector.broadcast %c0_i32_156 : i32 to vector<2x16xi32>
    %572 = arith.cmpi ne, %570, %571 : vector<2x16xi32>
    %c0_i32_157 = arith.constant 0 : i32
    %573 = vector.broadcast %c0_i32_157 : i32 to vector<2x16xi32>
    %574 = arith.cmpi slt, %570, %573 : vector<2x16xi32>
    %c0_i32_158 = arith.constant 0 : i32
    %575 = arith.cmpi slt, %568, %c0_i32_158 : i32
    %576 = vector.broadcast %575 : i1 to vector<2x16xi1>
    %577 = vector.broadcast %576 : vector<2x16xi1> to vector<2x16xi1>
    %578 = arith.xori %574, %577 : vector<2x16xi1>
    %579 = arith.andi %578, %572 : vector<2x16xi1>
    %580 = vector.broadcast %568 : i32 to vector<2x16xi32>
    %581 = arith.addi %570, %580 : vector<2x16xi32>
    %582 = arith.select %579, %581, %570 : vector<2x16xi1>, vector<2x16xi32>
    %583 = arith.cmpi eq, %582, %566 : vector<2x16xi32>
    %cst_159 = arith.constant -1.000000e+30 : f32
    %584 = vector.broadcast %cst_159 : f32 to vector<2x16xf32>
    %585 = arith.select %583, %564, %584 : vector<2x16xi1>, vector<2x16xf32>
    %cst_160 = arith.constant dense<0xFF800000> : vector<2xf32>
    %586 = vector.multi_reduction <maximumf>, %585, %cst_160 [1] : vector<2x16xf32> to vector<2xf32>
    %587 = vector.shape_cast %586 : vector<2xf32> to vector<2x1xf32>
    %588 = vector.broadcast %587 : vector<2x1xf32> to vector<2x16xf32>
    %589 = arith.subf %585, %588 : vector<2x16xf32>
    %590 = math.exp %589 : vector<2x16xf32>
    %cst_161 = arith.constant dense<0.000000e+00> : vector<2xf32>
    %591 = vector.multi_reduction <add>, %590, %cst_161 [1] : vector<2x16xf32> to vector<2xf32>
    %592 = vector.shape_cast %591 : vector<2xf32> to vector<2x1xf32>
    %593 = vector.broadcast %592 : vector<2x1xf32> to vector<2x16xf32>
    %594 = arith.divf %590, %593 : vector<2x16xf32>
    %595 = arith.truncf %594 : vector<2x16xf32> to vector<2x16xbf16>
    %cst_162 = arith.constant dense<0.000000e+00> : vector<2x32xf32>
    %596 = tpu.matmul %595, %563, %cst_162 {dimension_numbers = #tpu.dot_dimension_numbers<[1], [0], [0], [1], [0, 0, 1, 1], [], []>} : vector<2x16xbf16>, vector<16x32xbf16>, vector<2x32xf32> -> vector<2x32xf32>
    %597 = arith.truncf %596 : vector<2x32xf32> to vector<2x32xbf16>
    %cst_163 = arith.constant dense<0.000000e+00> : vector<2x32xf32>
    %598 = tpu.matmul %597, %13, %cst_163 {dimension_numbers = #tpu.dot_dimension_numbers<[1], [0], [0], [1], [0, 0, 1, 1], [], []>} : vector<2x32xbf16>, vector<32x32xbf16>, vector<2x32xf32> -> vector<2x32xf32>
    %599 = arith.addf %598, %40 : vector<2x32xf32>
    %cst_164 = arith.constant 0.000000e+00 : f32
    %600 = vector.broadcast %cst_164 : f32 to vector<2x32xf32>
    %601 = arith.maximumf %599, %600 : vector<2x32xf32>
    %602 = arith.mulf %601, %43 : vector<2x32xf32>
    %cst_165 = arith.constant dense<0.000000e+00> : vector<2xf32>
    %603 = vector.multi_reduction <add>, %602, %cst_165 [1] : vector<2x32xf32> to vector<2xf32>
    %604 = vector.shape_cast %603 : vector<2xf32> to vector<2x1xf32>
    %cst_166 = arith.constant dense<0.000000e+00> : vector<1xf32>
    %605 = vector.multi_reduction <add>, %44, %cst_166 [1] : vector<1x32xf32> to vector<1xf32>
    %606 = vector.shape_cast %605 : vector<1xf32> to vector<1x1xf32>
    %607 = vector.broadcast %606 : vector<1x1xf32> to vector<2x1xf32>
    %608 = arith.addf %604, %607 : vector<2x1xf32>
    %609 = arith.negf %608 : vector<2x1xf32>
    %610 = math.exp %609 : vector<2x1xf32>
    %cst_167 = arith.constant 1.000000e+00 : f32
    %611 = vector.broadcast %cst_167 : f32 to vector<2x1xf32>
    %612 = arith.addf %611, %610 : vector<2x1xf32>
    %613 = arith.divf %611, %612 : vector<2x1xf32>
    %c0_168 = arith.constant 0 : index
    %c0_169 = arith.constant 0 : index
    %614 = vector.load %arg3[%c0_168, %c0_169] : memref<2x1xf32, #tpu.memory_space<vmem>>, vector<2x1xf32>
    tpu.vector_store %arg3[%c0_168, %c0_169], %613 {strides = array<i32>} : memref<2x1xf32, #tpu.memory_space<vmem>>, vector<2x1xf32>,
    return
  }
}

</mosaic_0001>

<bundles_post_ra>
// kernel: tpu_custom_call.1
= control target key start
LH: loop header
LB: loop body
LE: loop exit
PB: predicated region body
PF: predicated region fallthrough
CT: control target
= control target key end

     0   :  { %vm101_vm0 = vcmask 130048   ;;  %v2918_v10 = vmov 0   ;;  %vm173_vm9 = vcmask 261120   ;;  %s3697_s1 = inlined_call_operand.vmem [shape: bf16[400,32], index: 1, kind: input, shape index: {}]   ;;  %s3698_s0 = inlined_call_operand.vmem [shape: bf16[16,16], index: 0, kind: input, shape index: {}]   ;;  %s3699_s2 = inlined_call_operand.vmem [shape: f32[16,32], index: 2, kind: input, shape index: {}]   ;;  %s3700_s3 = inlined_call_operand.vmem [shape: f32[2,1], index: 3, kind: output, shape index: {}]  }
   0x1   :  { %v2678_v0 = vld [vmem:[%s3697_s1] sm:$0xff]  ;;  %v2953_v3 = vld [vmem:[%s3697_s1 + $0x30] sm:$0xff]  ;;  %v2679_v4 = vld [vmem:[%s3697_s1 + $0x8] sm:$0xff] }
   0x2   :  { %v2945_v1 = vld [vmem:[%s3697_s1 + $0x20] sm:$0xff]  ;;  %112 = vmatpush.bf16.msra.mxu0 %v2678_v0  ;;  %v2962_v5 = vld [vmem:[%s3697_s1 + $0x18] sm:$0xff]  ;;  %v2680_v7 = vld [vmem:[%s3697_s1 + $0x10] sm:$0xff]  ;;  %133 = vmatpush.bf16.msra.mxu1 %v2679_v4 }
   0x3   :  { %v2703_v2 = vld [vmem:[%s3698_s0] sm:$0xff]  ;;  %183 = vmatpush.bf16.msra.mxu3 %v2945_v1  ;;  %v2976_v8 = vld [vmem:[%s3697_s1 + $0x28] sm:$0xff]  ;;  %v2981_v9 = vld [vmem:[%s3697_s1 + $0x38] sm:$0xff]  ;;  %154 = vmatpush.bf16.msra.mxu2 %v2680_v7 }
   0x4   :  { %v2967_v6 = vld [vmem:[%s3697_s1 + $0x40] sm:$0xff]  ;;  %v3020_v27 = vld [vmem:[%s3697_s1 + $0x50] sm:$0xff]  ;;  %v3039_v32 = vld [vmem:[%s3697_s1 + $0x48] sm:$0xff] }
   0x5   :  { %2470 = vmatmul.msk.bf16.vlgmr.msra.gmra.mxu0 %vm101_vm0, %v2703_v2  ;;  %2475 = vmatmul.msk.bf16.vlgmr.msra.gmra.mxu1 %vm101_vm0, %v2703_v2  ;;  %v2998_v13 = vld [vmem:[%s3699_s2] ss:$0 sm:$0xff]  ;;  %v3008_v16 = vld [vmem:[%s3699_s2 + $0x1] ss:$0 sm:$0xff]  ;;  %v3030_v29 = vld [vmem:[%s3697_s1 + $0x70] sm:$0xff] }
   0x6   :  { %208 = vmatpush.bf16.msrb.mxu0 %v2953_v3  ;;  %233 = vmatpush.bf16.msrb.mxu1 %v2967_v6  ;;  %v3025_v28 = vld [vmem:[%s3697_s1 + $0x60] sm:$0xff]  ;;  %v3044_v33 = vld [vmem:[%s3697_s1 + $0x58] sm:$0xff]  ;;  %v3049_v34 = vld [vmem:[%s3697_s1 + $0x68] sm:$0xff] }
   0x7   :  { %184 = vmatpush.bf16.msra.mxu3 %v2962_v5  ;;  %2480 = vmatmul.msk.bf16.vlgmr.msra.gmra.mxu2 %vm101_vm0, %v2703_v2  ;;  %v3064_v41 = vld [vmem:[%s3699_s2 + $0x3] ss:$0 sm:$0xff]  ;;  %v3069_v46 = vld [vmem:[%s3699_s2 + $0x2] ss:$0 sm:$0xff] }
   0x8   :  { %308 = vmatpush.bf16.msrb.mxu2 %v3020_v27 }
   0xa   :  { %209 = vmatpush.bf16.msrb.mxu0 %v2976_v8  ;;  %234 = vmatpush.bf16.msrb.mxu1 %v2981_v9 }
   0xb   :  { %185 = vmatmul.bf16.vlgmr.msra.gmra.mxu3 %v2918_v10 }
   0xc   :  { %333 = vmatpush.bf16.msrb.mxu3 %v3025_v28  ;;  %309 = vmatpush.bf16.msrb.mxu2 %v3039_v32 }
   0xe   :  { %371 = vmatpush.bf16.msra.mxu1 %v2945_v1  ;;  %358 = vmatpush.bf16.msra.mxu0 %v3030_v29 }
  0x10   :  { %334 = vmatpush.bf16.msrb.mxu3 %v3044_v33  ;;  %384 = vmatpush.bf16.msra.mxu2 %v2953_v3 }
  0x12   :  { %372 = vmatpush.bf16.msra.mxu1 %v2962_v5  ;;  %359 = vmatpush.bf16.msra.mxu0 %v3049_v34 }
  0x14   :  { %397 = vmatpush.bf16.msra.mxu3 %v2967_v6  ;;  %385 = vmatpush.bf16.msra.mxu2 %v2976_v8 }
  0x15   :  { %210 = vmatmul.bf16.vlgmr.msrb.gmra.mxu0 %v2918_v10  ;;  %235 = vmatmul.bf16.vlgmr.msrb.gmra.mxu1 %v2918_v10 }
  0x16   :  { %490 = vmatpush.bf16.msrb.mxu1 %v3025_v28  ;;  %477 = vmatpush.bf16.msrb.mxu0 %v3020_v27 }
  0x18   :  { %398 = vmatpush.bf16.msra.mxu3 %v2981_v9 }
  0x1a   :  { %491 = vmatpush.bf16.msrb.mxu1 %v3044_v33  ;;  %478 = vmatpush.bf16.msrb.mxu0 %v3039_v32 }
  0x82   :  { %v114_v11 = vpop.f32.mrf.mxu0  ;;  %v135_v12 = vpop.f32.mrf.mxu1 }
  0x83   :  { %v3001_v14 = vadd.f32 %v2998_v13, %v114_v11  ;;  %v3014_v21 = vadd.f32 %v3008_v16, %v135_v12 }
  0x8a   :  { %v3003_v15 = vpop.f32.mrf.mxu0  ;;  %v3010_v17 = vpop.f32.mrf.mxu1 }
  0x8b   :  { %v156_v52 = vpop.f32.mrf.mxu2 }
  0x8c   :  { %v3073_v55 = vadd.f32 %v3069_v46, %v156_v52 }
  0x8e   :  { %v186_v18 = vpop.f32.mrf.mxu3 }
  0x8f   :  { %v240_v19 = vadd.f32 %v186_v18, %v3001_v14 }
  0x91   :  { %v2505_v20 = vmul.f32 -1.442695, %v240_v19 }
  0x92   :  { %v211_v22 = vpop.f32.mrf.mxu0  ;;  %v236_v24 = vpop.f32.mrf.mxu1 }
  0x93   :  { %2717 = vpow2.f32 %v2505_v20  ;;  %v260_v23 = vadd.f32 %v211_v22, %v3014_v21  ;;  %v237_v49 = vadd.f32 %v3064_v41, %v236_v24  ;;  %v3098_v19 = vpop.f32.mrf.mxu2 }
  0x95   :  { %v2506_v26 = vmul.f32 -1.442695, %v260_v23 }
  0x96   :  { %v188_v25 = vpop.f32.mrf.mxu3 }
  0x97   :  { %2719 = vpow2.f32 %v2506_v26 }
  0x99   :  { %v2718_v30 = vpop.eup %2717 }
  0x9a   :  { %v244_v31 = vadd.f32 1.0, %v2718_v30  ;;  %v213_v35 = vpop.f32.mrf.mxu0  ;;  %v238_v36 = vpop.f32.mrf.mxu1 }
  0x9c   :  { %2721 = vrcp.f32 %v244_v31  ;;  %v256_v43 = vand.u32 2147483648, %v244_v31  ;;  %v254_v45 = vand.u32 2147483647, %v244_v31  ;;  %vm250_vm2 = vweird.f32 %v244_v31 }
  0x9d   :  { %v2720_v37 = vpop.eup %2719 }
  0x9e   :  { %v264_v38 = vadd.f32 1.0, %v2720_v37  ;;  %v257_v51 = vor.u32 1.1754944e-38, %v256_v43  ;;  %vm255_vm4 = vcmp.eq.f32.partialorder %v254_v45, 8.507059e+37 }
  0xa0   :  { %2723 = vrcp.f32 %v264_v38  ;;  %vm270_vm5 = vweird.f32 %v264_v38  ;;  %v276_v61 = vand.u32 2147483648, %v264_v38  ;;  %v274_v62 = vand.u32 2147483647, %v264_v38 }
  0xa2   :  { %v2722_v39 = vpop.eup %2721  ;;  %v277_v2 = vor.u32 1.1754944e-38, %v276_v61  ;;  %vm275_vm8 = vcmp.eq.f32.partialorder %v274_v62, 8.507059e+37 }
  0xa3   :  { %v246_v40 = vmul.f32 %v2722_v39, %v244_v31  ;;  %vm251_vm1 = vweird.f32 %v2722_v39 }
  0xa4   :  { %vm252_vm3 = vmor %vm250_vm2, %vm251_vm1 }
  0xa5   :  { %v247_v42 = vsub.f32 1.0, %v246_v40 }
  0xa6   :  { %v2724_v47 = vpop.eup %2723 }
  0xa7   :  { %v248_v44 = vmul.f32 %v2722_v39, %v247_v42  ;;  %v266_v48 = vmul.f32 %v2724_v47, %v264_v38  ;;  %vm271_vm6 = vweird.f32 %v2724_v47 }
  0xa8   :  { %vm272_vm7 = vmor %vm270_vm5, %vm271_vm6 }
  0xa9   :  { %v249_v50 = vadd.f32 %v2722_v39, %v248_v44  ;;  %v267_v53 = vsub.f32 1.0, %v266_v48 }
  0xab   :  { %v253_v54 = vsel %vm252_vm3, %v2722_v39, %v249_v50  ;;  %v268_v58 = vmul.f32 %v2724_v47, %v267_v53 }
  0xac   :  { %v258_v56 = vsel %vm255_vm4, %v257_v51, %v253_v54 }
  0xad   :  { %v280_v57 = vmul.f32 %v258_v56, %v237_v49  ;;  %v269_v60 = vadd.f32 %v2724_v47, %v268_v58 }
  0xaf   :  { %v281_v59 = vadd.f32 %v280_v57, %v3073_v55  ;;  %v273_v63 = vsel %vm272_vm7, %v2724_v47, %v269_v60 }
  0xb0   :  { %v278_v7 = vsel %vm275_vm8, %v277_v2, %v273_v63 }
  0xb1   :  { %2725 = vtanh.f32 %v281_v59 }
  0xb7   :  { %v2726_v0 = vpop.eup %2725 }
  0xb8   :  { %v283_v4 = vsub.f32 0.0, %v2726_v0 }
  0xba   :  { %v284_v11 = vmul.f32 %v283_v4, %v278_v7 }
  0xbc   :  { %v3076_v12 = vadd.f32 %v2726_v0, %v284_v11 }
  0xbe   :  { %v286_v18 = vpack.c.bf16 %v3076_v12, %v3076_v12 }
  0xc0   :  { %2515 = vmatmul.msk.bf16.vlgmr.msrb.gmra.mxu2 %vm173_vm9, %v286_v18  ;;  %2524 = vmatmul.msk.bf16.vlgmr.msrb.gmra.mxu3 %vm173_vm9, %v286_v18 }
  0xc1   :  { %2533 = vmatmul.msk.bf16.vlgmr.msra.gmra.mxu0 %vm173_vm9, %v286_v18  ;;  %2534 = vmatmul.msk.bf16.vlgmr.msra.gmra.mxu1 %vm173_vm9, %v286_v18 }
  0xc2   :  { %516 = vmatpush.bf16.msrb.mxu3 %v2945_v1  ;;  %503 = vmatpush.bf16.msrb.mxu2 %v3030_v29 }
  0xc3   :  { %529 = vmatpush.bf16.msra.mxu0 %v2953_v3  ;;  %542 = vmatpush.bf16.msra.mxu1 %v2967_v6 }
  0xc6   :  { %517 = vmatpush.bf16.msrb.mxu3 %v2962_v5  ;;  %504 = vmatpush.bf16.msrb.mxu2 %v3049_v34 }
  0xc7   :  { %530 = vmatpush.bf16.msra.mxu0 %v2976_v8  ;;  %543 = vmatpush.bf16.msra.mxu1 %v2981_v9 }
  0xd0   :  { %2535 = vmatmul.msk.bf16.vlgmr.msra.gmra.mxu2 %vm173_vm9, %v286_v18  ;;  %2536 = vmatmul.msk.bf16.vlgmr.msra.gmra.mxu3 %vm173_vm9, %v286_v18 }
  0xd1   :  { %622 = vmatpush.bf16.msra.mxu2 %v3020_v27  ;;  %635 = vmatpush.bf16.msra.mxu3 %v3025_v28 }
  0xd5   :  { %623 = vmatpush.bf16.msra.mxu2 %v3039_v32  ;;  %636 = vmatpush.bf16.msra.mxu3 %v3044_v33 }
 0x13e   :  { %v3100_v20 = vpop.f32.mrf.mxu0  ;;  %v374_v22 = vpop.f32.mrf.mxu1 }
 0x13f   :  { %v405_v23 = vrot.slane %v374_v22, 6 }
 0x141   :  { %v407_v24 = vadd.f32 %v405_v23, %v3001_v14 }
 0x143   :  { %v2537_v25 = vmul.f32 -1.442695, %v407_v24  ;;  %v3103_v26 = vpop.f32.mrf.mxu2  ;;  %v3105_v30 = vpop.f32.mrf.mxu3 }
 0x145   :  { %2727 = vpow2.f32 %v2537_v25 }
 0x146   :  { %v363_v31 = vpop.f32.mrf.mxu0  ;;  %v376_v35 = vpop.f32.mrf.mxu1 }
 0x14b   :  { %v2728_v36 = vpop.eup %2727  ;;  %v313_v37 = vpop.f32.mrf.mxu2 }
 0x14c   :  { %v338_v38 = vpop.f32.mrf.mxu3  ;;  %v411_v39 = vadd.f32 1.0, %v2728_v36 }
 0x14e   :  { %2729 = vrcp.f32 %v411_v39  ;;  %v423_v50 = vand.u32 2147483648, %v411_v39  ;;  %v421_v53 = vand.u32 2147483647, %v411_v39  ;;  %vm417_vm11 = vweird.f32 %v411_v39 }
 0x150   :  { %v424_v58 = vor.u32 1.1754944e-38, %v423_v50  ;;  %vm422_vm13 = vcmp.eq.f32.partialorder %v421_v53, 8.507059e+37 }
 0x153   :  { %v387_v40 = vpop.f32.mrf.mxu2 }
 0x154   :  { %v400_v42 = vpop.f32.mrf.mxu3  ;;  %v2730_v43 = vpop.eup %2729  ;;  %v428_v44 = vrot.slane %v387_v40, 6 }
 0x155   :  { %v413_v45 = vmul.f32 %v2730_v43, %v411_v39  ;;  %v401_v51 = vadd.f32 %v3064_v41, %v400_v42  ;;  %vm418_vm10 = vweird.f32 %v2730_v43 }
 0x156   :  { %v430_v47 = vadd.f32 %v428_v44, %v3014_v21  ;;  %vm419_vm12 = vmor %vm417_vm11, %vm418_vm10 }
 0x157   :  { %v414_v48 = vsub.f32 1.0, %v413_v45  ;;  %v451_v60 = vrot.slane %v401_v51, 6 }
 0x158   :  { %v2538_v49 = vmul.f32 -1.442695, %v430_v47 }
 0x159   :  { %v415_v52 = vmul.f32 %v2730_v43, %v414_v48 }
 0x15a   :  { %2731 = vpow2.f32 %v2538_v49 }
 0x15b   :  { %v416_v54 = vadd.f32 %v2730_v43, %v415_v52  ;;  %v389_v56 = vpop.f32.mrf.mxu2 }
 0x15c   :  { %v402_v57 = vpop.f32.mrf.mxu3 }
 0x15d   :  { %v420_v59 = vsel %vm419_vm12, %v2730_v43, %v416_v54 }
 0x15e   :  { %v425_v61 = vsel %vm422_vm13, %v424_v58, %v420_v59 }
 0x15f   :  { %v453_v62 = vmul.f32 %v451_v60, %v425_v61 }
 0x160   :  { %v2732_v63 = vpop.eup %2731 }
 0x161   :  { %v434_v0 = vadd.f32 1.0, %v2732_v63  ;;  %v454_v2 = vadd.f32 %v453_v62, %v3073_v55 }
 0x163   :  { %2733 = vrcp.f32 %v434_v0  ;;  %v446_v23 = vand.u32 2147483648, %v434_v0  ;;  %v444_v25 = vand.u32 2147483647, %v434_v0  ;;  %vm440_vm15 = vweird.f32 %v434_v0 }
 0x164   :  { %2735 = vtanh.f32 %v454_v2 }
 0x165   :  { %v447_v36 = vor.u32 1.1754944e-38, %v446_v23  ;;  %vm445_vm2 = vcmp.eq.f32.partialorder %v444_v25, 8.507059e+37 }
 0x169   :  { %v2734_v4 = vpop.eup %2733 }
 0x16a   :  { %v2736_v7 = vpop.eup %2735  ;;  %v436_v11 = vmul.f32 %v2734_v4, %v434_v0  ;;  %vm441_vm14 = vweird.f32 %v2734_v4 }
 0x16b   :  { %v457_v18 = vrot.slane %v2736_v7, 2  ;;  %vm442_vm1 = vmor %vm440_vm15, %vm441_vm14 }
 0x16c   :  { %v437_v22 = vsub.f32 1.0, %v436_v11 }
 0x16d   :  { %v459_v31 = vsub.f32 %v3076_v12, %v457_v18 }
 0x16e   :  { %v438_v24 = vmul.f32 %v2734_v4, %v437_v22 }
 0x16f   :  { %v461_v38 = vrot.slane %v459_v31, 6 }
 0x170   :  { %v439_v35 = vadd.f32 %v2734_v4, %v438_v24 }
 0x172   :  { %v443_v37 = vsel %vm442_vm1, %v2734_v4, %v439_v35 }
 0x173   :  { %v448_v39 = vsel %vm445_vm2, %v447_v36, %v443_v37 }
 0x174   :  { %v463_v40 = vmul.f32 %v461_v38, %v448_v39 }
 0x176   :  { %v3111_v42 = vadd.f32 %v2736_v7, %v463_v40 }
 0x178   :  { %v465_v43 = vpack.c.bf16 %v3111_v42, %v3111_v42 }
 0x17a   :  { %v467_v44 = vrot.slane %v465_v43, 1 }
 0x17c   :  { %2539 = vmatmul.msk.bf16.vlgmr.msrb.gmra.mxu0 %vm173_vm9, %v467_v44  ;;  %2540 = vmatmul.msk.bf16.vlgmr.msrb.gmra.mxu1 %vm173_vm9, %v467_v44 }
 0x17d   :  { %2541 = vmatmul.msk.bf16.vlgmr.msrb.gmra.mxu2 %vm173_vm9, %v467_v44  ;;  %2542 = vmatmul.msk.bf16.vlgmr.msrb.gmra.mxu3 %vm173_vm9, %v467_v44 }
 0x17e   :  { %661 = vmatpush.bf16.msrb.mxu1 %v2945_v1  ;;  %648 = vmatpush.bf16.msrb.mxu0 %v3030_v29 }
 0x17f   :  { %674 = vmatpush.bf16.msrb.mxu2 %v2953_v3  ;;  %687 = vmatpush.bf16.msrb.mxu3 %v2967_v6 }
 0x182   :  { %649 = vmatpush.bf16.msrb.mxu0 %v3049_v34  ;;  %662 = vmatpush.bf16.msrb.mxu1 %v2962_v5 }
 0x183   :  { %675 = vmatpush.bf16.msrb.mxu2 %v2976_v8  ;;  %688 = vmatpush.bf16.msrb.mxu3 %v2981_v9 }
 0x18c   :  { %2543 = vmatmul.msk.bf16.vlgmr.msra.gmra.mxu0 %vm173_vm9, %v467_v44  ;;  %2544 = vmatmul.msk.bf16.vlgmr.msra.gmra.mxu1 %vm173_vm9, %v467_v44 }
 0x18d   :  { %767 = vmatpush.bf16.msra.mxu0 %v3020_v27  ;;  %780 = vmatpush.bf16.msra.mxu1 %v3025_v28 }
 0x191   :  { %768 = vmatpush.bf16.msra.mxu0 %v3039_v32  ;;  %781 = vmatpush.bf16.msra.mxu1 %v3044_v33 }
 0x1f9   :  { %v3133_v12 = vpop.f32.mrf.mxu0  ;;  %v3135_v45 = vpop.f32.mrf.mxu1 }
 0x200   :  { %v3137_v47 = vpop.f32.mrf.mxu2  ;;  %v519_v48 = vpop.f32.mrf.mxu3 }
 0x201   :  { %v550_v49 = vrot.slane %v519_v48, 4  ;;  %v482_v50 = vpop.f32.mrf.mxu0  ;;  %v495_v51 = vpop.f32.mrf.mxu1 }
 0x203   :  { %v552_v52 = vadd.f32 %v550_v49, %v3001_v14 }
 0x205   :  { %v2545_v53 = vmul.f32 -1.442695, %v552_v52 }
 0x207   :  { %2737 = vpow2.f32 %v2545_v53 }
 0x208   :  { %v508_v54 = vpop.f32.mrf.mxu2  ;;  %v521_v56 = vpop.f32.mrf.mxu3 }
 0x209   :  { %v532_v57 = vpop.f32.mrf.mxu0  ;;  %v545_v58 = vpop.f32.mrf.mxu1 }
 0x20a   :  { %v573_v59 = vrot.slane %v532_v57, 4  ;;  %v546_v24 = vadd.f32 %v3064_v41, %v545_v58 }
 0x20c   :  { %v575_v60 = vadd.f32 %v573_v59, %v3014_v21  ;;  %v596_v38 = vrot.slane %v546_v24, 4 }
 0x20d   :  { %v2738_v61 = vpop.eup %2737 }
 0x20e   :  { %v556_v62 = vadd.f32 1.0, %v2738_v61  ;;  %v2546_v63 = vmul.f32 -1.442695, %v575_v60 }
 0x210   :  { %2739 = vrcp.f32 %v556_v62  ;;  %v568_v23 = vand.u32 2147483648, %v556_v62  ;;  %v566_v31 = vand.u32 2147483647, %v556_v62  ;;  %vm562_vm4 = vweird.f32 %v556_v62 }
 0x211   :  { %2741 = vpow2.f32 %v2546_v63  ;;  %v534_v0 = vpop.f32.mrf.mxu0  ;;  %v547_v2 = vpop.f32.mrf.mxu1 }
 0x212   :  { %v569_v36 = vor.u32 1.1754944e-38, %v568_v23  ;;  %vm567_vm6 = vcmp.eq.f32.partialorder %v566_v31, 8.507059e+37 }
 0x216   :  { %v2740_v4 = vpop.eup %2739 }
 0x217   :  { %v2742_v7 = vpop.eup %2741  ;;  %v558_v11 = vmul.f32 %v2740_v4, %v556_v62  ;;  %vm563_vm3 = vweird.f32 %v2740_v4 }
 0x218   :  { %v579_v18 = vadd.f32 1.0, %v2742_v7  ;;  %vm564_vm5 = vmor %vm562_vm4, %vm563_vm3 }
 0x219   :  { %v559_v22 = vsub.f32 1.0, %v558_v11 }
 0x21a   :  { %2743 = vrcp.f32 %v579_v18  ;;  %v591_v53 = vand.u32 2147483648, %v579_v18  ;;  %vm585_vm8 = vweird.f32 %v579_v18  ;;  %v589_v54 = vand.u32 2147483647, %v579_v18 }
 0x21b   :  { %v560_v25 = vmul.f32 %v2740_v4, %v559_v22 }
 0x21c   :  { %v592_v59 = vor.u32 1.1754944e-38, %v591_v53  ;;  %vm590_vm11 = vcmp.eq.f32.partialorder %v589_v54, 8.507059e+37 }
 0x21d   :  { %v561_v35 = vadd.f32 %v2740_v4, %v560_v25 }
 0x21f   :  { %v565_v37 = vsel %vm564_vm5, %v2740_v4, %v561_v35 }
 0x220   :  { %v2744_v39 = vpop.eup %2743  ;;  %v570_v40 = vsel %vm567_vm6, %v569_v36, %v565_v37 }
 0x221   :  { %v581_v43 = vmul.f32 %v2744_v39, %v579_v18  ;;  %v598_v44 = vmul.f32 %v596_v38, %v570_v40  ;;  %vm586_vm7 = vweird.f32 %v2744_v39 }
 0x222   :  { %vm587_vm10 = vmor %vm585_vm8, %vm586_vm7 }
 0x223   :  { %v582_v48 = vsub.f32 1.0, %v581_v43  ;;  %v599_v49 = vadd.f32 %v598_v44, %v3073_v55 }
 0x225   :  { %2745 = vtanh.f32 %v599_v49  ;;  %v583_v50 = vmul.f32 %v2744_v39, %v582_v48 }
 0x227   :  { %v584_v51 = vadd.f32 %v2744_v39, %v583_v50 }
 0x229   :  { %v588_v57 = vsel %vm587_vm10, %v2744_v39, %v584_v51 }
 0x22a   :  { %v593_v61 = vsel %vm590_vm11, %v592_v59, %v588_v57 }
 0x22b   :  { %v2746_v52 = vpop.eup %2745 }
 0x22c   :  { %v602_v56 = vrot.slane %v2746_v52, 2 }
 0x22e   :  { %v604_v58 = vsub.f32 %v3111_v42, %v602_v56 }
 0x230   :  { %v606_v60 = vrot.slane %v604_v58, 6 }
 0x232   :  { %v608_v62 = vmul.f32 %v606_v60, %v593_v61 }
 0x234   :  { %v3144_v63 = vadd.f32 %v2746_v52, %v608_v62 }
 0x236   :  { %v610_v0 = vpack.c.bf16 %v3144_v63, %v3144_v63 }
 0x238   :  { %v612_v2 = vrot.slane %v610_v0, 2 }
 0x23a   :  { %2547 = vmatmul.msk.bf16.vlgmr.msra.gmra.mxu2 %vm173_vm9, %v612_v2  ;;  %2548 = vmatmul.msk.bf16.vlgmr.msra.gmra.mxu3 %vm173_vm9, %v612_v2 }
 0x23b   :  { %2549 = vmatmul.msk.bf16.vlgmr.msrb.gmra.mxu0 %vm173_vm9, %v612_v2  ;;  %2550 = vmatmul.msk.bf16.vlgmr.msrb.gmra.mxu1 %vm173_vm9, %v612_v2 }
 0x23c   :  { %806 = vmatpush.bf16.msra.mxu3 %v2945_v1  ;;  %793 = vmatpush.bf16.msra.mxu2 %v3030_v29 }
 0x23d   :  { %819 = vmatpush.bf16.msrb.mxu0 %v2953_v3  ;;  %832 = vmatpush.bf16.msrb.mxu1 %v2967_v6 }
 0x240   :  { %807 = vmatpush.bf16.msra.mxu3 %v2962_v5  ;;  %794 = vmatpush.bf16.msra.mxu2 %v3049_v34 }
 0x241   :  { %820 = vmatpush.bf16.msrb.mxu0 %v2976_v8  ;;  %833 = vmatpush.bf16.msrb.mxu1 %v2981_v9 }
 0x24a   :  { %2551 = vmatmul.msk.bf16.vlgmr.msrb.gmra.mxu2 %vm173_vm9, %v612_v2  ;;  %2552 = vmatmul.msk.bf16.vlgmr.msrb.gmra.mxu3 %vm173_vm9, %v612_v2 }
 0x24b   :  { %901 = vmatpush.bf16.msrb.mxu2 %v3020_v27  ;;  %914 = vmatpush.bf16.msrb.mxu3 %v3025_v28 }
 0x24f   :  { %902 = vmatpush.bf16.msrb.mxu2 %v3039_v32  ;;  %915 = vmatpush.bf16.msrb.mxu3 %v3044_v33 }
 0x2b8   :  { %v3166_v42 = vpop.f32.mrf.mxu0  ;;  %v664_v4 = vpop.f32.mrf.mxu1 }
 0x2b9   :  { %v695_v7 = vrot.slane %v664_v4, 2 }
 0x2bb   :  { %v697_v11 = vadd.f32 %v695_v7, %v3001_v14 }
 0x2bd   :  { %v2553_v18 = vmul.f32 -1.442695, %v697_v11  ;;  %v3169_v22 = vpop.f32.mrf.mxu2  ;;  %v3171_v23 = vpop.f32.mrf.mxu3 }
 0x2bf   :  { %2747 = vpow2.f32 %v2553_v18 }
 0x2c0   :  { %v653_v24 = vpop.f32.mrf.mxu0  ;;  %v666_v25 = vpop.f32.mrf.mxu1 }
 0x2c5   :  { %v2748_v31 = vpop.eup %2747  ;;  %v627_v35 = vpop.f32.mrf.mxu2 }
 0x2c6   :  { %v640_v36 = vpop.f32.mrf.mxu3  ;;  %v701_v37 = vadd.f32 1.0, %v2748_v31 }
 0x2c8   :  { %2749 = vrcp.f32 %v701_v37  ;;  %v713_v50 = vand.u32 2147483648, %v701_v37  ;;  %v711_v53 = vand.u32 2147483647, %v701_v37  ;;  %vm707_vm13 = vweird.f32 %v701_v37 }
 0x2ca   :  { %v714_v58 = vor.u32 1.1754944e-38, %v713_v50  ;;  %vm712_vm15 = vcmp.eq.f32.partialorder %v711_v53, 8.507059e+37  ;;  %v3205_v50 = vadd.f32 %v2998_v13, %v3003_v15 }
 0x2cd   :  { %v677_v38 = vpop.f32.mrf.mxu2 }
 0x2ce   :  { %v690_v39 = vpop.f32.mrf.mxu3  ;;  %v2750_v40 = vpop.eup %2749  ;;  %v718_v43 = vrot.slane %v677_v38, 2 }
 0x2cf   :  { %v703_v44 = vmul.f32 %v2750_v40, %v701_v37  ;;  %v691_v51 = vadd.f32 %v3064_v41, %v690_v39  ;;  %vm708_vm12 = vweird.f32 %v2750_v40 }
 0x2d0   :  { %v720_v14 = vadd.f32 %v718_v43, %v3014_v21  ;;  %vm709_vm14 = vmor %vm707_vm13, %vm708_vm12 }
 0x2d1   :  { %v704_v48 = vsub.f32 1.0, %v703_v44  ;;  %v741_v60 = vrot.slane %v691_v51, 2 }
 0x2d2   :  { %v2554_v49 = vmul.f32 -1.442695, %v720_v14 }
 0x2d3   :  { %v705_v52 = vmul.f32 %v2750_v40, %v704_v48 }
 0x2d4   :  { %2751 = vpow2.f32 %v2554_v49 }
 0x2d5   :  { %v706_v54 = vadd.f32 %v2750_v40, %v705_v52  ;;  %v679_v56 = vpop.f32.mrf.mxu2 }
 0x2d6   :  { %v692_v57 = vpop.f32.mrf.mxu3 }
 0x2d7   :  { %v710_v59 = vsel %vm709_vm14, %v2750_v40, %v706_v54 }
 0x2d8   :  { %v715_v61 = vsel %vm712_vm15, %v714_v58, %v710_v59  ;;  %v3212_v58 = vadd.f32 %v3008_v16, %v3010_v17 }
 0x2d9   :  { %v743_v21 = vmul.f32 %v741_v60, %v715_v61 }
 0x2da   :  { %v2752_v62 = vpop.eup %2751 }
 0x2db   :  { %v724_v0 = vadd.f32 1.0, %v2752_v62  ;;  %v744_v2 = vadd.f32 %v743_v21, %v3073_v55 }
 0x2dd   :  { %2753 = vrcp.f32 %v724_v0  ;;  %v736_v25 = vand.u32 2147483648, %v724_v0  ;;  %v734_v35 = vand.u32 2147483647, %v724_v0  ;;  %vm730_vm2 = vweird.f32 %v724_v0 }
 0x2de   :  { %2755 = vtanh.f32 %v744_v2 }
 0x2df   :  { %v737_v38 = vor.u32 1.1754944e-38, %v736_v25  ;;  %vm735_vm4 = vcmp.eq.f32.partialorder %v734_v35, 8.507059e+37 }
 0x2e3   :  { %v2754_v4 = vpop.eup %2753 }
 0x2e4   :  { %v2756_v7 = vpop.eup %2755  ;;  %v726_v11 = vmul.f32 %v2754_v4, %v724_v0  ;;  %vm731_vm1 = vweird.f32 %v2754_v4 }
 0x2e5   :  { %v747_v18 = vrot.slane %v2756_v7, 2  ;;  %vm732_vm3 = vmor %vm730_vm2, %vm731_vm1 }
 0x2e6   :  { %v727_v24 = vsub.f32 1.0, %v726_v11 }
 0x2e7   :  { %v749_v36 = vsub.f32 %v3144_v63, %v747_v18 }
 0x2e8   :  { %v728_v31 = vmul.f32 %v2754_v4, %v727_v24 }
 0x2e9   :  { %v751_v55 = vrot.slane %v749_v36, 6 }
 0x2ea   :  { %v729_v37 = vadd.f32 %v2754_v4, %v728_v31 }
 0x2ec   :  { %v733_v39 = vsel %vm732_vm3, %v2754_v4, %v729_v37 }
 0x2ed   :  { %v738_v40 = vsel %vm735_vm4, %v737_v38, %v733_v39 }
 0x2ee   :  { %v753_v43 = vmul.f32 %v751_v55, %v738_v40  ;;  %v3218_v40 = vadd.f32 %v3069_v46, %v3098_v19 }
 0x2f0   :  { %v3177_v44 = vadd.f32 %v2756_v7, %v753_v43 }
 0x2f2   :  { %v755_v14 = vpack.c.bf16 %v3177_v44, %v3177_v44 }
 0x2f4   :  { %v757_v48 = vrot.slane %v755_v14, 3 }
 0x2f6   :  { %2555 = vmatmul.msk.bf16.vlgmr.msra.gmra.mxu0 %vm173_vm9, %v757_v48  ;;  %2556 = vmatmul.msk.bf16.vlgmr.msra.gmra.mxu1 %vm173_vm9, %v757_v48 }
 0x2f7   :  { %2557 = vmatmul.msk.bf16.vlgmr.msra.gmra.mxu2 %vm173_vm9, %v757_v48  ;;  %2558 = vmatmul.msk.bf16.vlgmr.msra.gmra.mxu3 %vm173_vm9, %v757_v48 }
 0x2f8   :  { %940 = vmatpush.bf16.msra.mxu1 %v2945_v1  ;;  %927 = vmatpush.bf16.msra.mxu0 %v3030_v29 }
 0x2f9   :  { %953 = vmatpush.bf16.msra.mxu2 %v2953_v3  ;;  %966 = vmatpush.bf16.msra.mxu3 %v2967_v6 }
 0x2fc   :  { %928 = vmatpush.bf16.msra.mxu0 %v3049_v34  ;;  %941 = vmatpush.bf16.msra.mxu1 %v2962_v5 }
 0x2fd   :  { %954 = vmatpush.bf16.msra.mxu2 %v2976_v8  ;;  %967 = vmatpush.bf16.msra.mxu3 %v2981_v9 }
 0x306   :  { %2559 = vmatmul.msk.bf16.vlgmr.msrb.gmra.mxu0 %vm173_vm9, %v757_v48  ;;  %2560 = vmatmul.msk.bf16.vlgmr.msrb.gmra.mxu1 %vm173_vm9, %v757_v48 }
 0x307   :  { %1046 = vmatpush.bf16.msrb.mxu0 %v3020_v27  ;;  %1059 = vmatpush.bf16.msrb.mxu1 %v3025_v28 }
 0x30b   :  { %1047 = vmatpush.bf16.msrb.mxu0 %v3039_v32  ;;  %1060 = vmatpush.bf16.msrb.mxu1 %v3044_v33 }
 0x373   :  { %v3199_v63 = vpop.f32.mrf.mxu0  ;;  %v3201_v49 = vpop.f32.mrf.mxu1 }
 0x37a   :  { %v3207_v51 = vpop.f32.mrf.mxu2  ;;  %v809_v52 = vpop.f32.mrf.mxu3 }
 0x37b   :  { %v839_v53 = vadd.f32 %v809_v52, %v3205_v50  ;;  %v772_v54 = vpop.f32.mrf.mxu0  ;;  %v785_v56 = vpop.f32.mrf.mxu1 }
 0x37d   :  { %v2561_v57 = vmul.f32 -1.442695, %v839_v53 }
 0x37f   :  { %2757 = vpow2.f32 %v2561_v57 }
 0x382   :  { %v798_v59 = vpop.f32.mrf.mxu2  ;;  %v811_v60 = vpop.f32.mrf.mxu3 }
 0x383   :  { %v822_v61 = vpop.f32.mrf.mxu0  ;;  %v835_v21 = vpop.f32.mrf.mxu1 }
 0x384   :  { %v859_v13 = vadd.f32 %v822_v61, %v3212_v58  ;;  %v836_v37 = vadd.f32 %v3064_v41, %v835_v21 }
 0x385   :  { %v2758_v15 = vpop.eup %2757 }
 0x386   :  { %v843_v62 = vadd.f32 1.0, %v2758_v15  ;;  %v2562_v0 = vmul.f32 -1.442695, %v859_v13 }
 0x388   :  { %2759 = vrcp.f32 %v843_v62  ;;  %v855_v16 = vand.u32 2147483648, %v843_v62  ;;  %v853_v31 = vand.u32 2147483647, %v843_v62  ;;  %vm849_vm6 = vweird.f32 %v843_v62 }
 0x389   :  { %2761 = vpow2.f32 %v2562_v0 }
 0x38a   :  { %v856_v36 = vor.u32 1.1754944e-38, %v855_v16  ;;  %vm854_vm8 = vcmp.eq.f32.partialorder %v853_v31, 8.507059e+37 }
 0x38b   :  { %v824_v2 = vpop.f32.mrf.mxu0  ;;  %v837_v4 = vpop.f32.mrf.mxu1 }
 0x38e   :  { %v2760_v7 = vpop.eup %2759 }
 0x38f   :  { %v2762_v11 = vpop.eup %2761  ;;  %v845_v18 = vmul.f32 %v2760_v7, %v843_v62  ;;  %vm850_vm5 = vweird.f32 %v2760_v7 }
 0x390   :  { %v863_v24 = vadd.f32 1.0, %v2762_v11  ;;  %vm851_vm7 = vmor %vm849_vm6, %vm850_vm5 }
 0x391   :  { %v846_v25 = vsub.f32 1.0, %v845_v18 }
 0x392   :  { %2763 = vrcp.f32 %v863_v24  ;;  %v875_v57 = vand.u32 2147483648, %v863_v24  ;;  %vm869_vm11 = vweird.f32 %v863_v24  ;;  %v873_v59 = vand.u32 2147483647, %v863_v24 }
 0x393   :  { %v847_v17 = vmul.f32 %v2760_v7, %v846_v25 }
 0x394   :  { %v876_v46 = vor.u32 1.1754944e-38, %v875_v57  ;;  %vm874_vm13 = vcmp.eq.f32.partialorder %v873_v59, 8.507059e+37 }
 0x395   :  { %v848_v35 = vadd.f32 %v2760_v7, %v847_v17 }
 0x397   :  { %v852_v38 = vsel %vm851_vm7, %v2760_v7, %v848_v35 }
 0x398   :  { %v2764_v39 = vpop.eup %2763  ;;  %v857_v55 = vsel %vm854_vm8, %v856_v36, %v852_v38 }
 0x399   :  { %v865_v43 = vmul.f32 %v2764_v39, %v863_v24  ;;  %v879_v14 = vmul.f32 %v857_v55, %v836_v37  ;;  %vm870_vm10 = vweird.f32 %v2764_v39 }
 0x39a   :  { %vm871_vm12 = vmor %vm869_vm11, %vm870_vm10 }
 0x39b   :  { %v866_v48 = vsub.f32 1.0, %v865_v43  ;;  %v880_v52 = vadd.f32 %v879_v14, %v3218_v40 }
 0x39d   :  { %2765 = vtanh.f32 %v880_v52  ;;  %v867_v53 = vmul.f32 %v2764_v39, %v866_v48 }
 0x39f   :  { %v868_v54 = vadd.f32 %v2764_v39, %v867_v53 }
 0x3a1   :  { %v872_v61 = vsel %vm871_vm12, %v2764_v39, %v868_v54 }
 0x3a2   :  { %v877_v13 = vsel %vm874_vm13, %v876_v46, %v872_v61 }
 0x3a3   :  { %v2766_v56 = vpop.eup %2765 }
 0x3a4   :  { %v883_v60 = vrot.slane %v2766_v56, 2 }
 0x3a6   :  { %v885_v21 = vsub.f32 %v3177_v44, %v883_v60 }
 0x3a8   :  { %v887_v19 = vrot.slane %v885_v21, 6 }
 0x3aa   :  { %v889_v15 = vmul.f32 %v887_v19, %v877_v13 }
 0x3ac   :  { %v3222_v62 = vadd.f32 %v2766_v56, %v889_v15 }
 0x3ae   :  { %v891_v0 = vpack.c.bf16 %v3222_v62, %v3222_v62 }
 0x3b0   :  { %2563 = vmatmul.msk.bf16.vlgmr.msrb.gmra.mxu2 %vm173_vm9, %v891_v0  ;;  %2564 = vmatmul.msk.bf16.vlgmr.msrb.gmra.mxu3 %vm173_vm9, %v891_v0 }
 0x3b1   :  { %2565 = vmatmul.msk.bf16.vlgmr.msra.gmra.mxu0 %vm173_vm9, %v891_v0  ;;  %2566 = vmatmul.msk.bf16.vlgmr.msra.gmra.mxu1 %vm173_vm9, %v891_v0 }
 0x3b2   :  { %1085 = vmatpush.bf16.msrb.mxu3 %v2945_v1  ;;  %1072 = vmatpush.bf16.msrb.mxu2 %v3030_v29 }
 0x3b3   :  { %1098 = vmatpush.bf16.msra.mxu0 %v2953_v3  ;;  %1111 = vmatpush.bf16.msra.mxu1 %v2967_v6 }
 0x3b6   :  { %1086 = vmatpush.bf16.msrb.mxu3 %v2962_v5  ;;  %1073 = vmatpush.bf16.msrb.mxu2 %v3049_v34 }
 0x3b7   :  { %1099 = vmatpush.bf16.msra.mxu0 %v2976_v8  ;;  %1112 = vmatpush.bf16.msra.mxu1 %v2981_v9 }
 0x3c0   :  { %2567 = vmatmul.msk.bf16.vlgmr.msra.gmra.mxu2 %vm173_vm9, %v891_v0  ;;  %2568 = vmatmul.msk.bf16.vlgmr.msra.gmra.mxu3 %vm173_vm9, %v891_v0 }
 0x3c1   :  { %1191 = vmatpush.bf16.msra.mxu2 %v3020_v27  ;;  %1204 = vmatpush.bf16.msra.mxu3 %v3025_v28 }
 0x3c5   :  { %1192 = vmatpush.bf16.msra.mxu2 %v3039_v32  ;;  %1205 = vmatpush.bf16.msra.mxu3 %v3044_v33 }
 0x42e   :  { %v3244_v1 = vpop.f32.mrf.mxu0  ;;  %v943_v3 = vpop.f32.mrf.mxu1 }
 0x42f   :  { %v974_v5 = vrot.slane %v943_v3, 6 }
 0x431   :  { %v976_v6 = vadd.f32 %v974_v5, %v3205_v50 }
 0x433   :  { %v2569_v8 = vmul.f32 -1.442695, %v976_v6  ;;  %v3247_v9 = vpop.f32.mrf.mxu2  ;;  %v3249_v44 = vpop.f32.mrf.mxu3 }
 0x435   :  { %2767 = vpow2.f32 %v2569_v8 }
 0x436   :  { %v932_v2 = vpop.f32.mrf.mxu0  ;;  %v945_v4 = vpop.f32.mrf.mxu1 }
 0x43b   :  { %v2768_v7 = vpop.eup %2767  ;;  %v906_v11 = vpop.f32.mrf.mxu2 }
 0x43c   :  { %v919_v18 = vpop.f32.mrf.mxu3  ;;  %v980_v24 = vadd.f32 1.0, %v2768_v7 }
 0x43e   :  { %2769 = vrcp.f32 %v980_v24  ;;  %v992_v39 = vand.u32 2147483648, %v980_v24  ;;  %v990_v14 = vand.u32 2147483647, %v980_v24  ;;  %vm986_vm15 = vweird.f32 %v980_v24 }
 0x440   :  { %v993_v54 = vor.u32 1.1754944e-38, %v992_v39  ;;  %vm991_vm2 = vcmp.eq.f32.partialorder %v990_v14, 8.507059e+37 }
 0x443   :  { %v956_v25 = vpop.f32.mrf.mxu2 }
 0x444   :  { %v969_v16 = vpop.f32.mrf.mxu3  ;;  %v2770_v17 = vpop.eup %2769  ;;  %v997_v31 = vrot.slane %v956_v25, 6 }
 0x445   :  { %v982_v35 = vmul.f32 %v2770_v17, %v980_v24  ;;  %v970_v55 = vadd.f32 %v3064_v41, %v969_v16  ;;  %vm987_vm14 = vweird.f32 %v2770_v17 }
 0x446   :  { %v999_v36 = vadd.f32 %v997_v31, %v3212_v58  ;;  %vm988_vm1 = vmor %vm986_vm15, %vm987_vm14  ;;  %v2902_v31 = vld [vmem:[%s3697_s1 + $0x30] sm:$0xff] }
 0x447   :  { %v983_v37 = vsub.f32 1.0, %v982_v35  ;;  %v1020_v57 = vrot.slane %v970_v55, 6  ;;  %v2903_v35 = vld [vmem:[%s3697_s1 + $0x40] sm:$0xff] }
 0x448   :  { %v2570_v38 = vmul.f32 -1.442695, %v999_v36  ;;  %v2904_v36 = vld [vmem:[%s3697_s1 + $0x18] sm:$0xff] }
 0x449   :  { %v984_v43 = vmul.f32 %v2770_v17, %v983_v37  ;;  %v2906_v37 = vld [vmem:[%s3697_s1 + $0x38] sm:$0xff] }
 0x44a   :  { %2771 = vpow2.f32 %v2570_v38 }
 0x44b   :  { %v985_v48 = vadd.f32 %v2770_v17, %v984_v43  ;;  %v958_v52 = vpop.f32.mrf.mxu2 }
 0x44c   :  { %v971_v53 = vpop.f32.mrf.mxu3 }
 0x44d   :  { %v989_v56 = vsel %vm988_vm1, %v2770_v17, %v985_v48 }
 0x44e   :  { %v994_v59 = vsel %vm991_vm2, %v993_v54, %v989_v56 }
 0x44f   :  { %v1022_v60 = vmul.f32 %v1020_v57, %v994_v59 }
 0x450   :  { %v2772_v61 = vpop.eup %2771 }
 0x451   :  { %v1003_v21 = vadd.f32 1.0, %v2772_v61  ;;  %v1023_v46 = vadd.f32 %v1022_v60, %v3218_v40 }
 0x453   :  { %2773 = vrcp.f32 %v1003_v21  ;;  %v1015_v3 = vand.u32 2147483648, %v1003_v21  ;;  %v1013_v6 = vand.u32 2147483647, %v1003_v21  ;;  %vm1009_vm4 = vweird.f32 %v1003_v21 }
 0x454   :  { %2775 = vtanh.f32 %v1023_v46 }
 0x455   :  { %v1016_v4 = vor.u32 1.1754944e-38, %v1015_v3  ;;  %vm1014_vm6 = vcmp.eq.f32.partialorder %v1013_v6, 8.507059e+37  ;;  %v3300_v3 = vld [vmem:[%s3699_s2 + $0x3] ss:$0 sm:$0xff] }
 0x459   :  { %v2774_v41 = vpop.eup %2773 }
 0x45a   :  { %v2776_v19 = vpop.eup %2775  ;;  %v1005_v13 = vmul.f32 %v2774_v41, %v1003_v21  ;;  %vm1010_vm3 = vweird.f32 %v2774_v41 }
 0x45b   :  { %v1026_v15 = vrot.slane %v2776_v19, 2  ;;  %vm1011_vm5 = vmor %vm1009_vm4, %vm1010_vm3 }
 0x45c   :  { %v1006_v0 = vsub.f32 1.0, %v1005_v13 }
 0x45d   :  { %v1028_v8 = vsub.f32 %v3222_v62, %v1026_v15  ;;  %v2901_v62 = vld [vmem:[%s3697_s1 + $0x20] sm:$0xff] }
 0x45e   :  { %v1007_v5 = vmul.f32 %v2774_v41, %v1006_v0 }
 0x45f   :  { %v1030_v11 = vrot.slane %v1028_v8, 6 }
 0x460   :  { %v1008_v2 = vadd.f32 %v2774_v41, %v1007_v5 }
 0x462   :  { %v1012_v7 = vsel %vm1011_vm5, %v2774_v41, %v1008_v2 }
 0x463   :  { %v1017_v18 = vsel %vm1014_vm6, %v1016_v4, %v1012_v7 }
 0x464   :  { %v1032_v24 = vmul.f32 %v1030_v11, %v1017_v18 }
 0x466   :  { %v3255_v25 = vadd.f32 %v2776_v19, %v1032_v24 }
 0x468   :  { %v1034_v16 = vpack.c.bf16 %v3255_v25, %v3255_v25 }
 0x46a   :  { %v1036_v17 = vrot.slane %v1034_v16, 1 }
 0x46c   :  { %2571 = vmatmul.msk.bf16.vlgmr.msrb.gmra.mxu0 %vm173_vm9, %v1036_v17  ;;  %2572 = vmatmul.msk.bf16.vlgmr.msrb.gmra.mxu1 %vm173_vm9, %v1036_v17 }
 0x46d   :  { %2573 = vmatmul.msk.bf16.vlgmr.msrb.gmra.mxu2 %vm173_vm9, %v1036_v17  ;;  %2574 = vmatmul.msk.bf16.vlgmr.msrb.gmra.mxu3 %vm173_vm9, %v1036_v17 }
 0x46e   :  { %1230 = vmatpush.bf16.msrb.mxu1 %v2901_v62  ;;  %1217 = vmatpush.bf16.msrb.mxu0 %v3030_v29  ;;  %v2905_v29 = vld [vmem:[%s3697_s1 + $0x28] sm:$0xff] }
 0x46f   :  { %1243 = vmatpush.bf16.msrb.mxu2 %v2902_v31  ;;  %1256 = vmatpush.bf16.msrb.mxu3 %v2903_v35 }
 0x472   :  { %1218 = vmatpush.bf16.msrb.mxu0 %v3049_v34  ;;  %1231 = vmatpush.bf16.msrb.mxu1 %v2904_v36 }
 0x473   :  { %1244 = vmatpush.bf16.msrb.mxu2 %v2905_v29  ;;  %1257 = vmatpush.bf16.msrb.mxu3 %v2906_v37 }
 0x47c   :  { %2575 = vmatmul.msk.bf16.vlgmr.msra.gmra.mxu0 %vm173_vm9, %v1036_v17  ;;  %2576 = vmatmul.msk.bf16.vlgmr.msra.gmra.mxu1 %vm173_vm9, %v1036_v17 }
 0x47d   :  { %1336 = vmatpush.bf16.msra.mxu0 %v3020_v27  ;;  %1349 = vmatpush.bf16.msra.mxu1 %v3025_v28 }
 0x481   :  { %1337 = vmatpush.bf16.msra.mxu0 %v3039_v32  ;;  %1350 = vmatpush.bf16.msra.mxu1 %v3044_v33 }
 0x4e9   :  { %v3289_v34 = vpop.f32.mrf.mxu0  ;;  %v3291_v38 = vpop.f32.mrf.mxu1 }
 0x4f0   :  { %v3293_v39 = vpop.f32.mrf.mxu2  ;;  %v1088_v55 = vpop.f32.mrf.mxu3 }
 0x4f1   :  { %v1119_v43 = vrot.slane %v1088_v55, 4  ;;  %v1051_v14 = vpop.f32.mrf.mxu0  ;;  %v1064_v48 = vpop.f32.mrf.mxu1 }
 0x4f3   :  { %v1121_v52 = vadd.f32 %v1119_v43, %v3205_v50 }
 0x4f5   :  { %v2577_v53 = vmul.f32 -1.442695, %v1121_v52 }
 0x4f7   :  { %2777 = vpow2.f32 %v2577_v53 }
 0x4f8   :  { %v1077_v27 = vpop.f32.mrf.mxu2  ;;  %v1090_v28 = vpop.f32.mrf.mxu3 }
 0x4f9   :  { %v1101_v54 = vpop.f32.mrf.mxu0  ;;  %v1114_v32 = vpop.f32.mrf.mxu1 }
 0x4fa   :  { %v1142_v56 = vrot.slane %v1101_v54, 4  ;;  %v1115_v5 = vadd.f32 %v3300_v3, %v1114_v32 }
 0x4fc   :  { %v1144_v33 = vadd.f32 %v1142_v56, %v3212_v58  ;;  %v1165_v11 = vrot.slane %v1115_v5, 4 }
 0x4fd   :  { %v2778_v57 = vpop.eup %2777 }
 0x4fe   :  { %v1125_v59 = vadd.f32 1.0, %v2778_v57  ;;  %v2578_v60 = vmul.f32 -1.442695, %v1144_v33  ;;  %v3312_v33 = vld [vmem:[%s3697_s1 + $0x80] sm:$0xff]  ;;  %v2908_v57 = vld [vmem:[%s3697_s1 + $0x70] sm:$0xff] }
 0x500   :  { %2779 = vrcp.f32 %v1125_v59  ;;  %v1137_v0 = vand.u32 2147483648, %v1125_v59  ;;  %v1135_v8 = vand.u32 2147483647, %v1125_v59  ;;  %vm1131_vm8 = vweird.f32 %v1125_v59 }
 0x501   :  { %2781 = vpow2.f32 %v2578_v60  ;;  %v1103_v61 = vpop.f32.mrf.mxu0  ;;  %v1116_v21 = vpop.f32.mrf.mxu1 }
 0x502   :  { %v1138_v4 = vor.u32 1.1754944e-38, %v1137_v0  ;;  %vm1136_vm11 = vcmp.eq.f32.partialorder %v1135_v8, 8.507059e+37 }
 0x506   :  { %v2780_v46 = vpop.eup %2779 }
 0x507   :  { %v2782_v41 = vpop.eup %2781  ;;  %v1127_v19 = vmul.f32 %v2780_v46, %v1125_v59  ;;  %vm1132_vm7 = vweird.f32 %v2780_v46  ;;  %v2909_v59 = vld [vmem:[%s3697_s1 + $0x68] sm:$0xff] }
 0x508   :  { %v1148_v13 = vadd.f32 1.0, %v2782_v41  ;;  %vm1133_vm10 = vmor %vm1131_vm8, %vm1132_vm7 }
 0x509   :  { %v1128_v15 = vsub.f32 1.0, %v1127_v19 }
 0x50a   :  { %2783 = vrcp.f32 %v1148_v13  ;;  %v1160_v37 = vand.u32 2147483648, %v1148_v13  ;;  %vm1154_vm13 = vweird.f32 %v1148_v13  ;;  %v1158_v55 = vand.u32 2147483647, %v1148_v13 }
 0x50b   :  { %v1129_v6 = vmul.f32 %v2780_v46, %v1128_v15 }
 0x50c   :  { %v1161_v52 = vor.u32 1.1754944e-38, %v1160_v37  ;;  %vm1159_vm15 = vcmp.eq.f32.partialorder %v1158_v55, 8.507059e+37 }
 0x50d   :  { %v1130_v2 = vadd.f32 %v2780_v46, %v1129_v6 }
 0x50f   :  { %v1134_v7 = vsel %vm1133_vm10, %v2780_v46, %v1130_v2 }
 0x510   :  { %v2784_v18 = vpop.eup %2783  ;;  %v1139_v24 = vsel %vm1136_vm11, %v1138_v4, %v1134_v7 }
 0x511   :  { %v1150_v16 = vmul.f32 %v2784_v18, %v1148_v13  ;;  %v1167_v17 = vmul.f32 %v1165_v11, %v1139_v24  ;;  %vm1155_vm12 = vweird.f32 %v2784_v18 }
 0x512   :  { %vm1156_vm14 = vmor %vm1154_vm13, %vm1155_vm12 }
 0x513   :  { %v1151_v62 = vsub.f32 1.0, %v1150_v16  ;;  %v1168_v31 = vadd.f32 %v1167_v17, %v3218_v40 }
 0x515   :  { %2785 = vtanh.f32 %v1168_v31  ;;  %v1152_v35 = vmul.f32 %v2784_v18, %v1151_v62 }
 0x517   :  { %v1153_v36 = vadd.f32 %v2784_v18, %v1152_v35 }
 0x519   :  { %v1157_v14 = vsel %vm1156_vm14, %v2784_v18, %v1153_v36 }
 0x51a   :  { %v1162_v27 = vsel %vm1159_vm15, %v1161_v52, %v1157_v14  ;;  %v3360_v52 = vld [vmem:[%s3699_s2 + $0x4] ss:$0 sm:$0xff] }
 0x51b   :  { %v2786_v29 = vpop.eup %2785 }
 0x51c   :  { %v1171_v43 = vrot.slane %v2786_v29, 2 }
 0x51e   :  { %v1173_v48 = vsub.f32 %v3255_v25, %v1171_v43  ;;  %v3322_v25 = vld [vmem:[%s3697_s1 + $0x78] sm:$0xff] }
 0x520   :  { %v1175_v53 = vrot.slane %v1173_v48, 6 }
 0x522   :  { %v1177_v28 = vmul.f32 %v1175_v53, %v1162_v27 }
 0x524   :  { %v3305_v54 = vadd.f32 %v2786_v29, %v1177_v28  ;;  %v3366_v28 = vld [vmem:[%s3697_s1 + $0x88] sm:$0xff] }
 0x526   :  { %v1179_v32 = vpack.c.bf16 %v3305_v54, %v3305_v54 }
 0x528   :  { %v1181_v56 = vrot.slane %v1179_v32, 2  ;;  %v3372_v32 = vld [vmem:[%s3697_s1 + $0x98] sm:$0xff] }
 0x52a   :  { %2579 = vmatmul.msk.bf16.vlgmr.msra.gmra.mxu2 %vm173_vm9, %v1181_v56  ;;  %2580 = vmatmul.msk.bf16.vlgmr.msra.gmra.mxu3 %vm173_vm9, %v1181_v56 }
 0x52b   :  { %2581 = vmatmul.msk.bf16.vlgmr.msrb.gmra.mxu0 %vm173_vm9, %v1181_v56  ;;  %2582 = vmatmul.msk.bf16.vlgmr.msrb.gmra.mxu1 %vm173_vm9, %v1181_v56 }
 0x52c   :  { %1387 = vmatpush.bf16.msra.mxu3 %v3312_v33  ;;  %1362 = vmatpush.bf16.msra.mxu2 %v2908_v57 }
 0x530   :  { %1388 = vmatpush.bf16.msra.mxu3 %v3322_v25  ;;  %1363 = vmatpush.bf16.msra.mxu2 %v2909_v59 }
 0x53a   :  { %2583 = vmatmul.msk.bf16.vlgmr.msrb.gmra.mxu2 %vm173_vm9, %v1181_v56  ;;  %2584 = vmatmul.msk.bf16.vlgmr.msrb.gmra.mxu3 %vm173_vm9, %v1181_v56 }
 0x53b   :  { %1531 = vmatpush.bf16.msrb.mxu3 %v3312_v33 }
 0x53f   :  { %1532 = vmatpush.bf16.msrb.mxu3 %v3322_v25 }
 0x54a   :  { %1389 = vmatmul.bf16.vlgmr.msra.gmra.mxu3 %v2918_v10 }
 0x54b   :  { %1638 = vmatpush.bf16.msra.mxu3 %v3312_v33 }
 0x54f   :  { %1639 = vmatpush.bf16.msra.mxu3 %v3322_v25 }
 0x5a8   :  { %v3338_v60 = vpop.f32.mrf.mxu0  ;;  %v1233_v61 = vpop.f32.mrf.mxu1 }
 0x5a9   :  { %v1264_v21 = vrot.slane %v1233_v61, 2  ;;  %v312_v61 = vadd.f32 %v3360_v52, %v3103_v26 }
 0x5ab   :  { %v1266_v46 = vadd.f32 %v1264_v21, %v3205_v50 }
 0x5ad   :  { %v2585_v41 = vmul.f32 -1.442695, %v1266_v46  ;;  %v3341_v19 = vpop.f32.mrf.mxu2  ;;  %v3343_v13 = vpop.f32.mrf.mxu3 }
 0x5af   :  { %2787 = vpow2.f32 %v2585_v41 }
 0x5b0   :  { %v1222_v15 = vpop.f32.mrf.mxu0  ;;  %v1235_v0 = vpop.f32.mrf.mxu1 }
 0x5b5   :  { %v2788_v5 = vpop.eup %2787  ;;  %v1196_v6 = vpop.f32.mrf.mxu2 }
 0x5b6   :  { %v1209_v8 = vpop.f32.mrf.mxu3  ;;  %v1270_v2 = vadd.f32 1.0, %v2788_v5 }
 0x5b8   :  { %2789 = vrcp.f32 %v1270_v2  ;;  %v1282_v62 = vand.u32 2147483648, %v1270_v2  ;;  %v1280_v36 = vand.u32 2147483647, %v1270_v2  ;;  %vm1276_vm2 = vweird.f32 %v1270_v2 }
 0x5ba   :  { %v1283_v43 = vor.u32 1.1754944e-38, %v1282_v62  ;;  %vm1281_vm4 = vcmp.eq.f32.partialorder %v1280_v36, 8.507059e+37 }
 0x5bd   :  { %v1246_v4 = vpop.f32.mrf.mxu2 }
 0x5be   :  { %v1259_v7 = vpop.f32.mrf.mxu3  ;;  %v2790_v11 = vpop.eup %2789  ;;  %v1287_v18 = vrot.slane %v1246_v4, 2 }
 0x5bf   :  { %v1272_v24 = vmul.f32 %v2790_v11, %v1270_v2  ;;  %v1260_v31 = vadd.f32 %v3300_v3, %v1259_v7  ;;  %vm1277_vm1 = vweird.f32 %v2790_v11  ;;  %v3355_v3 = vld [vmem:[%s3697_s1 + $0xa0] sm:$0xff] }
 0x5c0   :  { %v1289_v50 = vadd.f32 %v1287_v18, %v3212_v58  ;;  %vm1278_vm3 = vmor %vm1276_vm2, %vm1277_vm1  ;;  %v3350_v58 = vld [vmem:[%s3697_s1 + $0x90] sm:$0xff]  ;;  %1437 = vmatpush.bf16.msrb.mxu1 %v3355_v3 }
 0x5c1   :  { %v1273_v16 = vsub.f32 1.0, %v1272_v24  ;;  %v1310_v48 = vrot.slane %v1260_v31, 2  ;;  %1412 = vmatpush.bf16.msrb.mxu0 %v3350_v58 }
 0x5c2   :  { %v2586_v17 = vmul.f32 -1.442695, %v1289_v50 }
 0x5c3   :  { %v1274_v35 = vmul.f32 %v2790_v11, %v1273_v16 }
 0x5c4   :  { %2791 = vpow2.f32 %v2586_v17  ;;  %1438 = vmatpush.bf16.msrb.mxu1 %v3372_v32 }
 0x5c5   :  { %v1275_v29 = vadd.f32 %v2790_v11, %v1274_v35  ;;  %v1248_v37 = vpop.f32.mrf.mxu2  ;;  %1413 = vmatpush.bf16.msrb.mxu0 %v3366_v28 }
 0x5c6   :  { %v1261_v55 = vpop.f32.mrf.mxu3 }
 0x5c7   :  { %v1279_v14 = vsel %vm1278_vm3, %v2790_v11, %v1275_v29  ;;  %vm1521_vm3 = vcmask 254976  }
 0x5c8   :  { %v1284_v53 = vsel %vm1281_vm4, %v1283_v43, %v1279_v14 }
 0x5c9   :  { %v1312_v27 = vmul.f32 %v1310_v48, %v1284_v53 }
 0x5ca   :  { %v2792_v56 = vpop.eup %2791 }
 0x5cb   :  { %v1293_v57 = vadd.f32 1.0, %v2792_v56  ;;  %v1313_v59 = vadd.f32 %v1312_v27, %v3218_v40  ;;  %v3402_v56 = vld [vmem:[%s3699_s2 + $0x5] ss:$0 sm:$0xff] }
 0x5cd   :  { %2793 = vrcp.f32 %v1293_v57  ;;  %v1305_v2 = vand.u32 2147483648, %v1293_v57  ;;  %v1303_v40 = vand.u32 2147483647, %v1293_v57  ;;  %vm1299_vm6 = vweird.f32 %v1293_v57 }
 0x5ce   :  { %v1390_v21 = vpop.f32.mrf.mxu3  ;;  %2795 = vtanh.f32 %v1313_v59 }
 0x5cf   :  { %v1444_v46 = vadd.f32 %v1390_v21, %v312_v61  ;;  %v1306_v11 = vor.u32 1.1754944e-38, %v1305_v2  ;;  %vm1304_vm8 = vcmp.eq.f32.partialorder %v1303_v40, 8.507059e+37  ;;  %v3407_v61 = vld [vmem:[%s3699_s2 + $0x7] ss:$0 sm:$0xff] }
 0x5d3   :  { %v2794_v41 = vpop.eup %2793 }
 0x5d4   :  { %v2796_v15 = vpop.eup %2795  ;;  %v1295_v0 = vmul.f32 %v2794_v41, %v1293_v57  ;;  %vm1300_vm5 = vweird.f32 %v2794_v41 }
 0x5d5   :  { %v1316_v5 = vrot.slane %v2796_v15, 2  ;;  %vm1301_vm7 = vmor %vm1299_vm6, %vm1300_vm5 }
 0x5d6   :  { %v1392_v6 = vpop.f32.mrf.mxu3  ;;  %v1296_v8 = vsub.f32 1.0, %v1295_v0 }
 0x5d7   :  { %v1318_v26 = vsub.f32 %v3305_v54, %v1316_v5  ;;  %v2614_v54 = vmul.f32 -1.442695, %v1444_v46  ;;  %v3412_v46 = vld [vmem:[%s3697_s1 + $0xb0] sm:$0xff] }
 0x5d8   :  { %v1297_v4 = vmul.f32 %v2794_v41, %v1296_v8  ;;  %1512 = vmatpush.bf16.msrb.mxu2 %v3412_v46 }
 0x5d9   :  { %v1320_v24 = vrot.slane %v1318_v26, 6  ;;  %2797 = vpow2.f32 %v2614_v54 }
 0x5da   :  { %v1298_v7 = vadd.f32 %v2794_v41, %v1297_v4 }
 0x5dc   :  { %v1302_v18 = vsel %vm1301_vm7, %v2794_v41, %v1298_v7  ;;  %v3417_v41 = vld [vmem:[%s3699_s2 + $0x6] ss:$0 sm:$0xff]  ;;  %v3426_v7 = vld [vmem:[%s3697_s1 + $0xa8] sm:$0xff] }
 0x5dd   :  { %v1307_v50 = vsel %vm1304_vm8, %v1306_v11, %v1302_v18  ;;  %1513 = vmatpush.bf16.msrb.mxu2 %v3426_v7 }
 0x5de   :  { %v1322_v16 = vmul.f32 %v1320_v24, %v1307_v50 }
 0x5df   :  { %v2798_v35 = vpop.eup %2797 }
 0x5e0   :  { %v1323_v17 = vadd.f32 %v2796_v15, %v1322_v16  ;;  %v1448_v36 = vadd.f32 1.0, %v2798_v35  ;;  %v337_v15 = vadd.f32 %v3402_v56, %v3105_v30  ;;  %v362_v30 = vadd.f32 %v3417_v41, %v3100_v20 }
 0x5e2   :  { %v1324_v62 = vpack.c.bf16 %v1323_v17, %v1323_v17  ;;  %2799 = vrcp.f32 %v1448_v36  ;;  %v1460_v59 = vand.u32 2147483648, %v1448_v36  ;;  %vm1454_vm11 = vweird.f32 %v1448_v36 }
 0x5e3   :  { %v1458_v21 = vand.u32 2147483647, %v1448_v36 }
 0x5e4   :  { %v1326_v31 = vrot.slane %v1324_v62, 3  ;;  %v1461_v2 = vor.u32 1.1754944e-38, %v1460_v59 }
 0x5e5   :  { %vm1459_vm13 = vcmp.eq.f32.partialorder %v1458_v21, 8.507059e+37 }
 0x5e6   :  { %2587 = vmatmul.msk.bf16.vlgmr.msra.gmra.mxu0 %vm173_vm9, %v1326_v31  ;;  %2588 = vmatmul.msk.bf16.vlgmr.msra.gmra.mxu1 %vm173_vm9, %v1326_v31 }
 0x5e7   :  { %2589 = vmatmul.msk.bf16.vlgmr.msra.gmra.mxu2 %vm173_vm9, %v1326_v31  ;;  %1544 = vmatpush.bf16.msra.mxu0 %v3350_v58 }
 0x5e8   :  { %1557 = vmatpush.bf16.msra.mxu1 %v3355_v3  ;;  %v2800_v29 = vpop.eup %2799  ;;  %1620 = vmatpush.bf16.msra.mxu2 %v3412_v46 }
 0x5e9   :  { %v1450_v37 = vmul.f32 %v2800_v29, %v1448_v36  ;;  %vm1455_vm10 = vweird.f32 %v2800_v29 }
 0x5ea   :  { %vm1456_vm12 = vmor %vm1454_vm11, %vm1455_vm10 }
 0x5eb   :  { %1545 = vmatpush.bf16.msra.mxu0 %v3366_v28 }
 0x5ec   :  { %1558 = vmatpush.bf16.msra.mxu1 %v3372_v32  ;;  %1621 = vmatpush.bf16.msra.mxu2 %v3426_v7 }
 0x5f6   :  { %1414 = vmatmul.bf16.vlgmr.msrb.gmra.mxu0 %v2918_v10  ;;  %1439 = vmatmul.bf16.vlgmr.msrb.gmra.mxu1 %v2918_v10  ;;  %v1451_v10 = vsub.f32 1.0, %v1450_v37 }
 0x5f7   :  { %1651 = vmatpush.bf16.msrb.mxu0 %v3350_v58  ;;  %1664 = vmatpush.bf16.msrb.mxu1 %v3355_v3 }
 0x5f8   :  { %v1452_v48 = vmul.f32 %v2800_v29, %v1451_v10 }
 0x5fa   :  { %v1453_v57 = vadd.f32 %v2800_v29, %v1452_v48 }
 0x5fb   :  { %1652 = vmatpush.bf16.msrb.mxu0 %v3366_v28  ;;  %1665 = vmatpush.bf16.msrb.mxu1 %v3372_v32 }
 0x5fc   :  { %v1457_v5 = vsel %vm1456_vm12, %v2800_v29, %v1453_v57 }
 0x5fd   :  { %v1462_v26 = vsel %vm1459_vm13, %v1461_v2, %v1457_v5  ;;  %v3460_v2 = vld [vmem:[%s3699_s2 + $0x8] ss:$0 sm:$0xff] }
 0x663   :  { %v3393_v55 = vpop.f32.mrf.mxu0  ;;  %v3395_v43 = vpop.f32.mrf.mxu1 }
 0x66a   :  { %v3397_v14 = vpop.f32.mrf.mxu2 }
 0x66b   :  { %v1341_v53 = vpop.f32.mrf.mxu0  ;;  %v1354_v27 = vpop.f32.mrf.mxu1 }
 0x672   :  { %v1367_v0 = vpop.f32.mrf.mxu2 }
 0x673   :  { %v1415_v6 = vpop.f32.mrf.mxu0  ;;  %v1440_v8 = vpop.f32.mrf.mxu1  ;;  %v494_v0 = vadd.f32 %v3402_v56, %v3135_v45 }
 0x674   :  { %v1464_v4 = vadd.f32 %v1415_v6, %v337_v15  ;;  %v1441_v40 = vadd.f32 %v3407_v61, %v1440_v8 }
 0x676   :  { %v2615_v11 = vmul.f32 -1.442695, %v1464_v4  ;;  %v1484_v18 = vmul.f32 %v1462_v26, %v1441_v40  ;;  %v481_v40 = vadd.f32 %v3360_v52, %v3133_v12 }
 0x678   :  { %2801 = vpow2.f32 %v2615_v11  ;;  %v1485_v24 = vadd.f32 %v1484_v18, %v362_v30 }
 0x67b   :  { %v1417_v50 = vpop.f32.mrf.mxu0  ;;  %v1442_v16 = vpop.f32.mrf.mxu1 }
 0x67c   :  { %v3468_v16 = vld [vmem:[%s3699_s2 + $0x9] ss:$0 sm:$0xff] }
 0x67e   :  { %v2802_v17 = vpop.eup %2801 }
 0x67f   :  { %v1468_v62 = vadd.f32 1.0, %v2802_v17 }
 0x681   :  { %2803 = vrcp.f32 %v1468_v62  ;;  %v1480_v20 = vand.u32 2147483648, %v1468_v62  ;;  %v1478_v29 = vand.u32 2147483647, %v1468_v62  ;;  %vm1474_vm15 = vweird.f32 %v1468_v62 }
 0x682   :  { %2805 = vtanh.f32 %v1485_v24 }
 0x683   :  { %v1481_v48 = vor.u32 1.1754944e-38, %v1480_v20  ;;  %vm1479_vm2 = vcmp.eq.f32.partialorder %v1478_v29, 8.507059e+37 }
 0x687   :  { %v2804_v31 = vpop.eup %2803 }
 0x688   :  { %v1470_v54 = vmul.f32 %v2804_v31, %v1468_v62  ;;  %vm1475_vm14 = vweird.f32 %v2804_v31  ;;  %v2806_v37 = vpop.eup %2805 }
 0x689   :  { %vm1476_vm1 = vmor %vm1474_vm15, %vm1475_vm14  ;;  %v1487_v27 = vsub.f32 0.0, %v2806_v37 }
 0x68a   :  { %v1471_v35 = vsub.f32 1.0, %v1470_v54 }
 0x68c   :  { %v1472_v36 = vmul.f32 %v2804_v31, %v1471_v35 }
 0x68e   :  { %v1473_v10 = vadd.f32 %v2804_v31, %v1472_v36 }
 0x690   :  { %v1477_v53 = vsel %vm1476_vm1, %v2804_v31, %v1473_v10 }
 0x691   :  { %v1482_v57 = vsel %vm1479_vm2, %v1481_v48, %v1477_v53 }
 0x692   :  { %v1488_v59 = vmul.f32 %v1487_v27, %v1482_v57 }
 0x694   :  { %v3433_v21 = vadd.f32 %v2806_v37, %v1488_v59 }
 0x696   :  { %v3437_v15 = vpack.c.bf16 %v3433_v21, %v3433_v21 }
 0x698   :  { %2624 = vmatmul.msk.bf16.vlgmr.msrb.gmra.mxu2 %vm173_vm9, %v3437_v15  ;;  %2625 = vmatmul.msk.bf16.vlgmr.msrb.gmra.mxu3 %vm173_vm9, %v3437_v15 }
 0x699   :  { %2626 = vmatmul.msk.bf16.vlgmr.msra.gmra.mxu0 %vm173_vm9, %v3437_v15  ;;  %2627 = vmatmul.msk.bf16.vlgmr.msra.gmra.mxu1 %vm173_vm9, %v3437_v15 }
 0x69a   :  { %1745 = vmatpush.bf16.msrb.mxu3 %v3312_v33  ;;  %1727 = vmatpush.bf16.msrb.mxu2 %v3412_v46 }
 0x69b   :  { %1758 = vmatpush.bf16.msra.mxu0 %v3350_v58  ;;  %1771 = vmatpush.bf16.msra.mxu1 %v3355_v3 }
 0x69e   :  { %1746 = vmatpush.bf16.msrb.mxu3 %v3322_v25  ;;  %1728 = vmatpush.bf16.msrb.mxu2 %v3426_v7 }
 0x69f   :  { %1759 = vmatpush.bf16.msra.mxu0 %v3366_v28  ;;  %1772 = vmatpush.bf16.msra.mxu1 %v3372_v32 }
 0x716   :  { %v1547_v5 = vpop.f32.mrf.mxu0  ;;  %v1560_v6 = vpop.f32.mrf.mxu1 }
 0x717   :  { %v1584_v8 = vadd.f32 %v1547_v5, %v494_v0 }
 0x719   :  { %v2629_v4 = vmul.f32 -1.442695, %v1584_v8 }
 0x71b   :  { %v1515_v26 = vpop.f32.mrf.mxu2  ;;  %v1534_v30 = vpop.f32.mrf.mxu3  ;;  %2807 = vpow2.f32 %v2629_v4 }
 0x71c   :  { %v1516_v11 = vadd.f32 %v3460_v2, %v1515_v26  ;;  %v1564_v18 = vadd.f32 %v1534_v30, %v481_v40  ;;  %v1561_v40 = vadd.f32 %v3407_v61, %v1560_v6 }
 0x71e   :  { %2809 = vtanh.f32 %v1516_v11  ;;  %v2628_v45 = vmul.f32 -1.442695, %v1564_v18  ;;  %v1549_v24 = vpop.f32.mrf.mxu0  ;;  %v1562_v50 = vpop.f32.mrf.mxu1  ;;  %v507_v11 = vadd.f32 %v3417_v41, %v3137_v47 }
 0x720   :  { %2811 = vpow2.f32 %v2628_v45 }
 0x721   :  { %v2808_v17 = vpop.eup %2807 }
 0x722   :  { %v1588_v20 = vadd.f32 1.0, %v2808_v17 }
 0x723   :  { %v1517_v62 = vpop.f32.mrf.mxu2  ;;  %v1536_v31 = vpop.f32.mrf.mxu3 }
 0x724   :  { %v2810_v12 = vpop.eup %2809  ;;  %v1600_v17 = vand.u32 2147483648, %v1588_v20  ;;  %vm1594_vm10 = vweird.f32 %v1588_v20  ;;  %v1598_v62 = vand.u32 2147483647, %v1588_v20 }
 0x725   :  { %v1520_v54 = vmul.f32 %v2810_v12, %v3468_v16 }
 0x726   :  { %v2812_v35 = vpop.eup %2811  ;;  %vm1599_vm12 = vcmp.eq.f32.partialorder %v1598_v62, 8.507059e+37 }
 0x727   :  { %v1568_v36 = vadd.f32 1.0, %v2812_v35  ;;  %v1522_v29 = vsel %vm1521_vm3, %v1520_v54, 0.0  ;;  %v1601_v54 = vor.u32 1.1754944e-38, %v1600_v17 }
 0x728   :  { %1523 = vadd.xlane.f32.xlu0 %v1522_v29 }
 0x729   :  { %2813 = vrcp.f32 %v1568_v36  ;;  %v1580_v57 = vand.u32 2147483648, %v1568_v36  ;;  %v1578_v0 = vand.u32 2147483647, %v1568_v36  ;;  %vm1574_vm5 = vweird.f32 %v1568_v36 }
 0x72a   :  { %2815 = vrcp.f32 %v1588_v20 }
 0x72b   :  { %v1581_v4 = vor.u32 1.1754944e-38, %v1580_v57  ;;  %vm1579_vm7 = vcmp.eq.f32.partialorder %v1578_v0, 8.507059e+37 }
 0x72f   :  { %v2814_v37 = vpop.eup %2813 }
 0x730   :  { %v2816_v10 = vpop.eup %2815  ;;  %v1570_v48 = vmul.f32 %v2814_v37, %v1568_v36  ;;  %vm1575_vm4 = vweird.f32 %v2814_v37 }
 0x731   :  { %v1590_v27 = vmul.f32 %v2816_v10, %v1588_v20  ;;  %vm1576_vm6 = vmor %vm1574_vm5, %vm1575_vm4  ;;  %vm1595_vm8 = vweird.f32 %v2816_v10 }
 0x732   :  { %v1571_v53 = vsub.f32 1.0, %v1570_v48  ;;  %vm1596_vm11 = vmor %vm1594_vm10, %vm1595_vm8  ;;  %vm2304_vm8 = vcmask 1041408  }
 0x733   :  { %v1591_v8 = vsub.f32 1.0, %v1590_v27 }
 0x734   :  { %v1572_v59 = vmul.f32 %v2814_v37, %v1571_v53  ;;  %v626_v53 = vadd.f32 %v3360_v52, %v3169_v22 }
 0x735   :  { %v1592_v45 = vmul.f32 %v2816_v10, %v1591_v8 }
 0x736   :  { %v1573_v5 = vadd.f32 %v2814_v37, %v1572_v59 }
 0x737   :  { %v1593_v50 = vadd.f32 %v2816_v10, %v1592_v45 }
 0x738   :  { %v1577_v26 = vsel %vm1576_vm6, %v2814_v37, %v1573_v5 }
 0x739   :  { %v1582_v30 = vsel %vm1579_vm7, %v1581_v4, %v1577_v26  ;;  %v1597_v31 = vsel %vm1596_vm11, %v2816_v10, %v1593_v50  ;;  %vm2301_vm7 = vcmask 1040384  }
 0x73a   :  { %v1604_v18 = vmul.f32 %v1582_v30, %v1561_v40  ;;  %v1602_v35 = vsel %vm1599_vm12, %v1601_v54, %v1597_v31 }
 0x73c   :  { %v1605_v24 = vadd.f32 %v1604_v18, %v507_v11 }
 0x73e   :  { %2817 = vtanh.f32 %v1605_v24 }
 0x744   :  { %v2818_v12 = vpop.eup %2817 }
 0x745   :  { %v1607_v6 = vsub.f32 %v3433_v21, %v2818_v12  ;;  %v639_v21 = vadd.f32 %v3402_v56, %v3171_v23 }
 0x747   :  { %v1608_v36 = vmul.f32 %v1607_v6, %v1602_v35 }
 0x749   :  { %v3476_v29 = vadd.f32 %v2818_v12, %v1608_v36 }
 0x74b   :  { %v3480_v47 = vpack.c.bf16 %v3476_v29, %v3476_v29 }
 0x74d   :  { %2630 = vmatmul.msk.bf16.vlgmr.msra.gmra.mxu2 %vm173_vm9, %v3480_v47  ;;  %2631 = vmatmul.msk.bf16.vlgmr.msra.gmra.mxu3 %vm173_vm9, %v3480_v47 }
 0x74e   :  { %2632 = vmatmul.msk.bf16.vlgmr.msrb.gmra.mxu0 %vm173_vm9, %v3480_v47  ;;  %2633 = vmatmul.msk.bf16.vlgmr.msrb.gmra.mxu1 %vm173_vm9, %v3480_v47 }
 0x74f   :  { %1852 = vmatpush.bf16.msra.mxu3 %v3312_v33  ;;  %1834 = vmatpush.bf16.msra.mxu2 %v3412_v46 }
 0x750   :  { %1865 = vmatpush.bf16.msrb.mxu0 %v3350_v58  ;;  %1878 = vmatpush.bf16.msrb.mxu1 %v3355_v3 }
 0x753   :  { %1853 = vmatpush.bf16.msra.mxu3 %v3322_v25  ;;  %1835 = vmatpush.bf16.msra.mxu2 %v3426_v7 }
 0x754   :  { %1866 = vmatpush.bf16.msrb.mxu0 %v3366_v28  ;;  %1879 = vmatpush.bf16.msrb.mxu1 %v3372_v32 }
 0x7cb   :  { %v1654_v20 = vpop.f32.mrf.mxu0  ;;  %v1667_v37 = vpop.f32.mrf.mxu1 }
 0x7cc   :  { %v1691_v10 = vadd.f32 %v1654_v20, %v639_v21 }
 0x7ce   :  { %v2635_v48 = vmul.f32 -1.442695, %v1691_v10  ;;  %v1668_v10 = vadd.f32 %v3407_v61, %v1667_v37 }
 0x7d0   :  { %v1623_v27 = vpop.f32.mrf.mxu2  ;;  %v1641_v57 = vpop.f32.mrf.mxu3  ;;  %2819 = vpow2.f32 %v2635_v48 }
 0x7d1   :  { %v1624_v59 = vadd.f32 %v3460_v2, %v1623_v27  ;;  %v1671_v0 = vadd.f32 %v1641_v57, %v626_v53  ;;  %v652_v27 = vadd.f32 %v3417_v41, %v3166_v42 }
 0x7d3   :  { %2821 = vtanh.f32 %v1624_v59  ;;  %v2634_v5 = vmul.f32 -1.442695, %v1671_v0  ;;  %v1656_v8 = vpop.f32.mrf.mxu0  ;;  %v1669_v4 = vpop.f32.mrf.mxu1 }
 0x7d5   :  { %2823 = vpow2.f32 %v2634_v5 }
 0x7d6   :  { %v2820_v40 = vpop.eup %2819 }
 0x7d7   :  { %v1695_v45 = vadd.f32 1.0, %v2820_v40 }
 0x7d8   :  { %v1625_v23 = vpop.f32.mrf.mxu2  ;;  %v1643_v26 = vpop.f32.mrf.mxu3 }
 0x7d9   :  { %v2822_v30 = vpop.eup %2821  ;;  %v1707_v8 = vand.u32 2147483648, %v1695_v45  ;;  %vm1701_vm4 = vweird.f32 %v1695_v45  ;;  %v1705_v4 = vand.u32 2147483647, %v1695_v45 }
 0x7da   :  { %v1628_v11 = vmul.f32 %v2822_v30, %v3468_v16 }
 0x7db   :  { %v2824_v18 = vpop.eup %2823  ;;  %v1708_v26 = vor.u32 1.1754944e-38, %v1707_v8  ;;  %vm1706_vm6 = vcmp.eq.f32.partialorder %v1705_v4, 8.507059e+37 }
 0x7dc   :  { %v1675_v22 = vadd.f32 1.0, %v2824_v18  ;;  %v1629_v24 = vsel %vm1521_vm3, %v1628_v11, 0.0  ;;  %v2275_v11 = vunpack.c.l.b16 %v3480_v47 }
 0x7dd   :  { %1630 = vadd.xlane.f32.xlu0 %v1629_v24 }
 0x7de   :  { %2825 = vrcp.f32 %v1675_v22  ;;  %v1687_v54 = vand.u32 2147483648, %v1675_v22  ;;  %v1685_v35 = vand.u32 2147483647, %v1675_v22  ;;  %vm1681_vm14 = vweird.f32 %v1675_v22 }
 0x7df   :  { %2827 = vrcp.f32 %v1695_v45 }
 0x7e0   :  { %v1688_v20 = vor.u32 1.1754944e-38, %v1687_v54  ;;  %vm1686_vm1 = vcmp.eq.f32.partialorder %v1685_v35, 8.507059e+37 }
 0x7e4   :  { %v2826_v50 = vpop.eup %2825 }
 0x7e5   :  { %v2828_v17 = vpop.eup %2827  ;;  %v1677_v62 = vmul.f32 %v2826_v50, %v1675_v22  ;;  %vm1682_vm13 = vweird.f32 %v2826_v50  ;;  %v2276_v22 = vpack.c.b16 %v2275_v11, %v2275_v11 }
 0x7e6   :  { %v1697_v12 = vmul.f32 %v2828_v17, %v1695_v45  ;;  %vm1683_vm15 = vmor %vm1681_vm14, %vm1682_vm13  ;;  %vm1702_vm2 = vweird.f32 %v2828_v17 }
 0x7e7   :  { %v1678_v31 = vsub.f32 1.0, %v1677_v62  ;;  %vm1703_vm5 = vmor %vm1701_vm4, %vm1702_vm2  ;;  %vm2307_vm4 = vcmask 1042432  }
 0x7e8   :  { %v1698_v21 = vsub.f32 1.0, %v1697_v12 }
 0x7e9   :  { %v1679_v6 = vmul.f32 %v2826_v50, %v1678_v31  ;;  %v784_v31 = vadd.f32 %v3402_v56, %v3201_v49 }
 0x7ea   :  { %v1699_v59 = vmul.f32 %v2828_v17, %v1698_v21 }
 0x7eb   :  { %v1680_v36 = vadd.f32 %v2826_v50, %v1679_v6 }
 0x7ec   :  { %v1700_v5 = vadd.f32 %v2828_v17, %v1699_v59 }
 0x7ed   :  { %v1684_v48 = vsel %vm1683_vm15, %v2826_v50, %v1680_v36 }
 0x7ee   :  { %v1689_v53 = vsel %vm1686_vm1, %v1688_v20, %v1684_v48  ;;  %v1704_v40 = vsel %vm1703_vm5, %v2828_v17, %v1700_v5 }
 0x7ef   :  { %v1711_v57 = vmul.f32 %v1689_v53, %v1668_v10  ;;  %v1709_v30 = vsel %vm1706_vm6, %v1708_v26, %v1704_v40 }
 0x7f1   :  { %v1712_v0 = vadd.f32 %v1711_v57, %v652_v27 }
 0x7f3   :  { %2829 = vtanh.f32 %v1712_v0 }
 0x7f9   :  { %v2830_v23 = vpop.eup %2829 }
 0x7fa   :  { %v1714_v37 = vsub.f32 %v3476_v29, %v2830_v23  ;;  %v2277_v29 = vrot.slane %v2276_v22, 7 }
 0x7fc   :  { %v1715_v42 = vmul.f32 %v1714_v37, %v1709_v30  ;;  %v2303_v17 = vsel %vm2301_vm7, %v3437_v15, %v2277_v29  ;;  %v771_v15 = vadd.f32 %v3360_v52, %v3199_v63 }
 0x7fe   :  { %v3510_v18 = vadd.f32 %v2830_v23, %v1715_v42 }
 0x800   :  { %v1717_v24 = vpack.c.bf16 %v3510_v18, %v3510_v18 }
 0x802   :  { %2636 = vmatmul.msk.bf16.vlgmr.msrb.gmra.mxu2 %vm173_vm9, %v1717_v24  ;;  %2637 = vmatmul.msk.bf16.vlgmr.msrb.gmra.mxu3 %vm173_vm9, %v1717_v24  ;;  %v2279_v45 = vunpack.c.l.b16 %v1717_v24 }
 0x803   :  { %2638 = vmatmul.msk.bf16.vlgmr.msra.gmra.mxu0 %vm173_vm9, %v1717_v24  ;;  %2639 = vmatmul.msk.bf16.vlgmr.msra.gmra.mxu1 %vm173_vm9, %v1717_v24 }
 0x804   :  { %1959 = vmatpush.bf16.msrb.mxu3 %v3312_v33  ;;  %1941 = vmatpush.bf16.msrb.mxu2 %v3412_v46  ;;  %v2280_v47 = vpack.c.b16 %v2279_v45, %v2279_v45 }
 0x805   :  { %1972 = vmatpush.bf16.msra.mxu0 %v3350_v58  ;;  %1985 = vmatpush.bf16.msra.mxu1 %v3355_v3 }
 0x806   :  { %v2281_v50 = vrot.slane %v2280_v47, 6 }
 0x808   :  { %1960 = vmatpush.bf16.msrb.mxu3 %v3322_v25  ;;  %1942 = vmatpush.bf16.msrb.mxu2 %v3426_v7  ;;  %v3525_v62 = vsel %vm2304_vm8, %v2303_v17, %v2281_v50 }
 0x809   :  { %1973 = vmatpush.bf16.msra.mxu0 %v3366_v28  ;;  %1986 = vmatpush.bf16.msra.mxu1 %v3372_v32 }
 0x880   :  { %v1761_v12 = vpop.f32.mrf.mxu0  ;;  %v1774_v54 = vpop.f32.mrf.mxu1 }
 0x881   :  { %v1798_v6 = vadd.f32 %v1761_v12, %v784_v31  ;;  %v1775_v50 = vadd.f32 %v3407_v61, %v1774_v54  ;;  %v797_v12 = vadd.f32 %v3417_v41, %v3207_v51 }
 0x883   :  { %v2641_v35 = vmul.f32 -1.442695, %v1798_v6 }
 0x885   :  { %v1730_v36 = vpop.f32.mrf.mxu2  ;;  %v1748_v21 = vpop.f32.mrf.mxu3  ;;  %2831 = vpow2.f32 %v2641_v35 }
 0x886   :  { %v1731_v20 = vadd.f32 %v3460_v2, %v1730_v36  ;;  %v1778_v10 = vadd.f32 %v1748_v21, %v771_v15 }
 0x888   :  { %2833 = vtanh.f32 %v1731_v20  ;;  %v2640_v48 = vmul.f32 -1.442695, %v1778_v10  ;;  %v1763_v53 = vpop.f32.mrf.mxu0  ;;  %v1776_v27 = vpop.f32.mrf.mxu1 }
 0x88a   :  { %2835 = vpow2.f32 %v2640_v48 }
 0x88b   :  { %v2832_v57 = vpop.eup %2831 }
 0x88c   :  { %v1802_v4 = vadd.f32 1.0, %v2832_v57 }
 0x88d   :  { %v1732_v49 = vpop.f32.mrf.mxu2  ;;  %v1750_v59 = vpop.f32.mrf.mxu3 }
 0x88e   :  { %v2834_v0 = vpop.eup %2833  ;;  %v1814_v21 = vand.u32 2147483648, %v1802_v4  ;;  %vm1808_vm15 = vweird.f32 %v1802_v4  ;;  %v1812_v20 = vand.u32 2147483647, %v1802_v4 }
 0x88f   :  { %v1735_v5 = vmul.f32 %v2834_v0, %v3468_v16 }
 0x890   :  { %v2836_v8 = vpop.eup %2835  ;;  %v1815_v53 = vor.u32 1.1754944e-38, %v1814_v21  ;;  %vm1813_vm2 = vcmp.eq.f32.partialorder %v1812_v20, 8.507059e+37 }
 0x891   :  { %v1782_v63 = vadd.f32 1.0, %v2836_v8  ;;  %v1736_v40 = vsel %vm1521_vm3, %v1735_v5, 0.0 }
 0x892   :  { %1737 = vadd.xlane.f32.xlu1 %v1736_v40 }
 0x893   :  { %2837 = vrcp.f32 %v1782_v63  ;;  %v1794_v42 = vand.u32 2147483648, %v1782_v63  ;;  %v1792_v24 = vand.u32 2147483647, %v1782_v63  ;;  %vm1788_vm11 = vweird.f32 %v1782_v63 }
 0x894   :  { %2839 = vrcp.f32 %v1802_v4 }
 0x895   :  { %v1795_v47 = vor.u32 1.1754944e-38, %v1794_v42  ;;  %vm1793_vm13 = vcmp.eq.f32.partialorder %v1792_v24, 8.507059e+37 }
 0x899   :  { %v2838_v23 = vpop.eup %2837 }
 0x89a   :  { %v2840_v26 = vpop.eup %2839  ;;  %v1784_v37 = vmul.f32 %v2838_v23, %v1782_v63  ;;  %vm1789_vm10 = vweird.f32 %v2838_v23 }
 0x89b   :  { %v1804_v11 = vmul.f32 %v2840_v26, %v1802_v4  ;;  %vm1790_vm12 = vmor %vm1788_vm11, %vm1789_vm10  ;;  %vm1809_vm14 = vweird.f32 %v2840_v26 }
 0x89c   :  { %v1785_v30 = vsub.f32 1.0, %v1784_v37  ;;  %vm1810_vm1 = vmor %vm1808_vm15, %vm1809_vm14  ;;  %vm2310_vm14 = vcmask 1043456  }
 0x89d   :  { %v1805_v29 = vsub.f32 1.0, %v1804_v11 }
 0x89e   :  { %v1786_v22 = vmul.f32 %v2838_v23, %v1785_v30 }
 0x89f   :  { %v1806_v35 = vmul.f32 %v2840_v26, %v1805_v29 }
 0x8a0   :  { %v1787_v45 = vadd.f32 %v2838_v23, %v1786_v22 }
 0x8a1   :  { %v1807_v36 = vadd.f32 %v2840_v26, %v1806_v35 }
 0x8a2   :  { %v1791_v17 = vsel %vm1790_vm12, %v2838_v23, %v1787_v45  ;;  %v905_v23 = vadd.f32 %v3360_v52, %v3247_v9 }
 0x8a3   :  { %v1796_v31 = vsel %vm1793_vm13, %v1795_v47, %v1791_v17  ;;  %v1811_v10 = vsel %vm1810_vm1, %v2840_v26, %v1807_v36 }
 0x8a4   :  { %v1818_v6 = vmul.f32 %v1796_v31, %v1775_v50  ;;  %v1816_v27 = vsel %vm1813_vm2, %v1815_v53, %v1811_v10 }
 0x8a6   :  { %v1819_v15 = vadd.f32 %v1818_v6, %v797_v12 }
 0x8a8   :  { %2841 = vtanh.f32 %v1819_v15 }
 0x8ae   :  { %v2842_v48 = vpop.eup %2841 }
 0x8af   :  { %v1821_v54 = vsub.f32 %v3510_v18, %v2842_v48 }
 0x8b1   :  { %v1822_v57 = vmul.f32 %v1821_v54, %v1816_v27 }
 0x8b3   :  { %v3540_v49 = vadd.f32 %v2842_v48, %v1822_v57 }
 0x8b5   :  { %v1824_v51 = vpack.c.bf16 %v3540_v49, %v3540_v49 }
 0x8b7   :  { %2642 = vmatmul.msk.bf16.vlgmr.msra.gmra.mxu2 %vm173_vm9, %v1824_v51  ;;  %2643 = vmatmul.msk.bf16.vlgmr.msra.gmra.mxu3 %vm173_vm9, %v1824_v51  ;;  %v2283_v59 = vunpack.c.l.b16 %v1824_v51 }
 0x8b8   :  { %2644 = vmatmul.msk.bf16.vlgmr.msrb.gmra.mxu0 %vm173_vm9, %v1824_v51  ;;  %2645 = vmatmul.msk.bf16.vlgmr.msrb.gmra.mxu1 %vm173_vm9, %v1824_v51  ;;  %v931_v51 = vadd.f32 %v3417_v41, %v3244_v1 }
 0x8b9   :  { %2066 = vmatpush.bf16.msra.mxu3 %v3312_v33  ;;  %2048 = vmatpush.bf16.msra.mxu2 %v3412_v46  ;;  %v2284_v18 = vpack.c.b16 %v2283_v59, %v2283_v59  ;;  %v918_v33 = vadd.f32 %v3402_v56, %v3249_v44 }
 0x8ba   :  { %2079 = vmatpush.bf16.msrb.mxu0 %v3350_v58  ;;  %2092 = vmatpush.bf16.msrb.mxu1 %v3355_v3 }
 0x8bb   :  { %v2285_v0 = vrot.slane %v2284_v18, 5 }
 0x8bd   :  { %2067 = vmatpush.bf16.msra.mxu3 %v3322_v25  ;;  %2049 = vmatpush.bf16.msra.mxu2 %v3426_v7  ;;  %v3555_v5 = vsel %vm2307_vm4, %v3525_v62, %v2285_v0 }
 0x8be   :  { %2080 = vmatpush.bf16.msrb.mxu0 %v3366_v28  ;;  %2093 = vmatpush.bf16.msrb.mxu1 %v3372_v32 }
 0x935   :  { %v1868_v8 = vpop.f32.mrf.mxu0  ;;  %v1881_v4 = vpop.f32.mrf.mxu1 }
 0x936   :  { %v1905_v63 = vadd.f32 %v1868_v8, %v918_v33  ;;  %v1882_v54 = vadd.f32 %v3407_v61, %v1881_v4 }
 0x938   :  { %v2647_v40 = vmul.f32 -1.442695, %v1905_v63 }
 0x93a   :  { %v1837_v25 = vpop.f32.mrf.mxu2  ;;  %v1855_v26 = vpop.f32.mrf.mxu3  ;;  %2843 = vpow2.f32 %v2647_v40 }
 0x93b   :  { %v1838_v37 = vadd.f32 %v3460_v2, %v1837_v25  ;;  %v1885_v62 = vadd.f32 %v1855_v26, %v905_v23 }
 0x93d   :  { %2845 = vtanh.f32 %v1838_v37  ;;  %v2646_v30 = vmul.f32 -1.442695, %v1885_v62  ;;  %v1870_v11 = vpop.f32.mrf.mxu0  ;;  %v1883_v42 = vpop.f32.mrf.mxu1 }
 0x93f   :  { %2847 = vpow2.f32 %v2646_v30 }
 0x940   :  { %v2844_v22 = vpop.eup %2843 }
 0x941   :  { %v1909_v50 = vadd.f32 1.0, %v2844_v22  ;;  %v2911_v22 = vld [vmem:[%s3697_s1 + $0x78] sm:$0xff] }
 0x942   :  { %v1839_v44 = vpop.f32.mrf.mxu2  ;;  %v1857_v24 = vpop.f32.mrf.mxu3 }
 0x943   :  { %v2846_v45 = vpop.eup %2845  ;;  %v1921_v8 = vand.u32 2147483648, %v1909_v50  ;;  %vm1915_vm11 = vweird.f32 %v1909_v50  ;;  %v1919_v63 = vand.u32 2147483647, %v1909_v50  ;;  %v1063_v44 = vadd.f32 %v3402_v56, %v3291_v38 }
 0x944   :  { %v1842_v29 = vmul.f32 %v2846_v45, %v3468_v16 }
 0x945   :  { %v2848_v47 = vpop.eup %2847  ;;  %v1922_v25 = vor.u32 1.1754944e-38, %v1921_v8  ;;  %vm1920_vm13 = vcmp.eq.f32.partialorder %v1919_v63, 8.507059e+37  ;;  %v1076_v63 = vadd.f32 %v3417_v41, %v3293_v39 }
 0x946   :  { %v1889_v9 = vadd.f32 1.0, %v2848_v47  ;;  %v1843_v17 = vsel %vm1521_vm3, %v1842_v29, 0.0 }
 0x947   :  { %1844 = vadd.xlane.f32.xlu1 %v1843_v17 }
 0x948   :  { %2849 = vrcp.f32 %v1889_v9  ;;  %v1901_v36 = vand.u32 2147483648, %v1889_v9  ;;  %v1899_v20 = vand.u32 2147483647, %v1889_v9  ;;  %vm1895_vm6 = vweird.f32 %v1889_v9 }
 0x949   :  { %2851 = vrcp.f32 %v1909_v50 }
 0x94a   :  { %v1902_v53 = vor.u32 1.1754944e-38, %v1901_v36  ;;  %vm1900_vm8 = vcmp.eq.f32.partialorder %v1899_v20, 8.507059e+37 }
 0x94e   :  { %v2850_v31 = vpop.eup %2849 }
 0x94f   :  { %v2852_v12 = vpop.eup %2851  ;;  %v1891_v6 = vmul.f32 %v2850_v31, %v1889_v9  ;;  %vm1896_vm5 = vweird.f32 %v2850_v31 }
 0x950   :  { %v1911_v15 = vmul.f32 %v2852_v12, %v1909_v50  ;;  %vm1897_vm7 = vmor %vm1895_vm6, %vm1896_vm5  ;;  %vm1916_vm10 = vweird.f32 %v2852_v12 }
 0x951   :  { %v1892_v35 = vsub.f32 1.0, %v1891_v6  ;;  %vm1917_vm12 = vmor %vm1915_vm11, %vm1916_vm10  ;;  %vm2313_vm10 = vcmask 1044480  }
 0x952   :  { %v1912_v48 = vsub.f32 1.0, %v1911_v15 }
 0x953   :  { %v1893_v21 = vmul.f32 %v2850_v31, %v1892_v35 }
 0x954   :  { %v1913_v18 = vmul.f32 %v2852_v12, %v1912_v48 }
 0x955   :  { %v1894_v10 = vadd.f32 %v2850_v31, %v1893_v21 }
 0x956   :  { %v1914_v33 = vadd.f32 %v2852_v12, %v1913_v18 }
 0x957   :  { %v1898_v27 = vsel %vm1897_vm7, %v2850_v31, %v1894_v10 }
 0x958   :  { %v1903_v57 = vsel %vm1900_vm8, %v1902_v53, %v1898_v27  ;;  %v1918_v40 = vsel %vm1917_vm12, %v2852_v12, %v1914_v33 }
 0x959   :  { %v1925_v59 = vmul.f32 %v1903_v57, %v1882_v54  ;;  %v1923_v26 = vsel %vm1920_vm13, %v1922_v25, %v1918_v40 }
 0x95b   :  { %v1926_v0 = vadd.f32 %v1925_v59, %v931_v51 }
 0x95d   :  { %2853 = vtanh.f32 %v1926_v0 }
 0x963   :  { %v2854_v23 = vpop.eup %2853 }
 0x964   :  { %v1928_v4 = vsub.f32 %v3540_v49, %v2854_v23  ;;  %v2910_v49 = vld [vmem:[%s3697_s1 + $0x80] sm:$0xff] }
 0x966   :  { %v1929_v37 = vmul.f32 %v1928_v4, %v1923_v26 }
 0x968   :  { %v3570_v62 = vadd.f32 %v2854_v23, %v1929_v37 }
 0x96a   :  { %v1931_v1 = vpack.c.bf16 %v3570_v62, %v3570_v62 }
 0x96c   :  { %2648 = vmatmul.msk.bf16.vlgmr.msrb.gmra.mxu2 %vm173_vm9, %v1931_v1  ;;  %2649 = vmatmul.msk.bf16.vlgmr.msrb.gmra.mxu3 %vm173_vm9, %v1931_v1  ;;  %v2287_v30 = vunpack.c.l.b16 %v1931_v1 }
 0x96d   :  { %2650 = vmatmul.msk.bf16.vlgmr.msra.gmra.mxu0 %vm173_vm9, %v1931_v1  ;;  %2651 = vmatmul.msk.bf16.vlgmr.msra.gmra.mxu1 %vm173_vm9, %v1931_v1 }
 0x96e   :  { %2173 = vmatpush.bf16.msrb.mxu3 %v2910_v49  ;;  %2155 = vmatpush.bf16.msrb.mxu2 %v3412_v46  ;;  %v2288_v11 = vpack.c.b16 %v2287_v30, %v2287_v30 }
 0x96f   :  { %2186 = vmatpush.bf16.msra.mxu0 %v3350_v58  ;;  %2199 = vmatpush.bf16.msra.mxu1 %v3355_v3 }
 0x970   :  { %v3585_v42 = vsel %vm2310_vm14, %v3555_v5, %v2288_v11  ;;  %v1050_v5 = vadd.f32 %v3360_v52, %v3289_v34 }
 0x972   :  { %2174 = vmatpush.bf16.msrb.mxu3 %v2911_v22  ;;  %2156 = vmatpush.bf16.msrb.mxu2 %v3426_v7 }
 0x973   :  { %2187 = vmatpush.bf16.msra.mxu0 %v3366_v28  ;;  %2200 = vmatpush.bf16.msra.mxu1 %v3372_v32 }
 0x9ea   :  { %v1975_v58 = vpop.f32.mrf.mxu0  ;;  %v1988_v24 = vpop.f32.mrf.mxu1 }
 0x9eb   :  { %v2012_v3 = vadd.f32 %v1975_v58, %v1063_v44  ;;  %v1989_v0 = vadd.f32 %v3407_v61, %v1988_v24 }
 0x9ed   :  { %v2653_v45 = vmul.f32 -1.442695, %v2012_v3  ;;  %v1208_v3 = vadd.f32 %v3402_v56, %v3343_v13 }
 0x9ef   :  { %v1944_v29 = vpop.f32.mrf.mxu2  ;;  %v1962_v47 = vpop.f32.mrf.mxu3  ;;  %2855 = vpow2.f32 %v2653_v45 }
 0x9f0   :  { %v1945_v50 = vadd.f32 %v3460_v2, %v1944_v29  ;;  %v1992_v9 = vadd.f32 %v1962_v47, %v1050_v5 }
 0x9f2   :  { %2857 = vtanh.f32 %v1945_v50  ;;  %v2652_v28 = vmul.f32 -1.442695, %v1992_v9  ;;  %v1977_v17 = vpop.f32.mrf.mxu0  ;;  %v1990_v32 = vpop.f32.mrf.mxu1  ;;  %v3622_v50 = vld [vmem:[%s3699_s2 + $0x4] ss:$0 sm:$0xff] }
 0x9f4   :  { %2859 = vpow2.f32 %v2652_v28 }
 0x9f5   :  { %v2856_v31 = vpop.eup %2855 }
 0x9f6   :  { %v2016_v36 = vadd.f32 1.0, %v2856_v31 }
 0x9f7   :  { %v1946_v38 = vpop.f32.mrf.mxu2  ;;  %v1964_v12 = vpop.f32.mrf.mxu3 }
 0x9f8   :  { %v2858_v6 = vpop.eup %2857  ;;  %v2028_v26 = vand.u32 2147483648, %v2016_v36  ;;  %vm2022_vm6 = vweird.f32 %v2016_v36  ;;  %v2026_v37 = vand.u32 2147483647, %v2016_v36 }
 0x9f9   :  { %v1949_v35 = vmul.f32 %v2858_v6, %v3468_v16 }
 0x9fa   :  { %v2860_v15 = vpop.eup %2859  ;;  %v2029_v49 = vor.u32 1.1754944e-38, %v2028_v26  ;;  %vm2027_vm8 = vcmp.eq.f32.partialorder %v2026_v37, 8.507059e+37 }
 0x9fb   :  { %v1996_v34 = vadd.f32 1.0, %v2860_v15  ;;  %v1950_v52 = vsel %vm1521_vm3, %v1949_v35, 0.0 }
 0x9fc   :  { %1951 = vadd.xlane.f32.xlu2 %v1950_v52 }
 0x9fd   :  { %2861 = vrcp.f32 %v1996_v34  ;;  %v2008_v54 = vand.u32 2147483648, %v1996_v34  ;;  %v2006_v57 = vand.u32 2147483647, %v1996_v34  ;;  %vm2002_vm1 = vweird.f32 %v1996_v34 }
 0x9fe   :  { %2863 = vrcp.f32 %v2016_v36 }
 0x9ff   :  { %v2009_v18 = vor.u32 1.1754944e-38, %v2008_v54  ;;  %vm2007_vm4 = vcmp.eq.f32.partialorder %v2006_v57, 8.507059e+37 }
 0xa03   :  { %v2862_v21 = vpop.eup %2861 }
 0xa04   :  { %v2864_v20 = vpop.eup %2863  ;;  %v1998_v10 = vmul.f32 %v2862_v21, %v1996_v34  ;;  %vm2003_vm15 = vweird.f32 %v2862_v21 }
 0xa05   :  { %v2018_v53 = vmul.f32 %v2864_v20, %v2016_v36  ;;  %vm2004_vm2 = vmor %vm2002_vm1, %vm2003_vm15  ;;  %vm2023_vm5 = vweird.f32 %v2864_v20 }
 0xa06   :  { %v1999_v48 = vsub.f32 1.0, %v1998_v10  ;;  %vm2024_vm7 = vmor %vm2022_vm6, %vm2023_vm5  ;;  %vm2316_vm5 = vcmask 1045504  }
 0xa07   :  { %v2019_v59 = vsub.f32 1.0, %v2018_v53 }
 0xa08   :  { %v2000_v27 = vmul.f32 %v2862_v21, %v1999_v48 }
 0xa09   :  { %v2020_v23 = vmul.f32 %v2864_v20, %v2019_v59  ;;  %v3632_v59 = vld [vmem:[%s3699_s2 + $0x7] ss:$0 sm:$0xff] }
 0xa0a   :  { %v2001_v51 = vadd.f32 %v2862_v21, %v2000_v27 }
 0xa0b   :  { %v2021_v4 = vadd.f32 %v2864_v20, %v2020_v23 }
 0xa0c   :  { %v2005_v33 = vsel %vm2004_vm2, %v2862_v21, %v2001_v51 }
 0xa0d   :  { %v2010_v8 = vsel %vm2007_vm4, %v2009_v18, %v2005_v33  ;;  %v2025_v1 = vsel %vm2024_vm7, %v2864_v20, %v2021_v4 }
 0xa0e   :  { %v2032_v40 = vmul.f32 %v2010_v8, %v1989_v0  ;;  %v2030_v11 = vsel %vm2027_vm8, %v2029_v49, %v2025_v1  ;;  %v3638_v8 = vld [vmem:[%s3699_s2 + $0x6] ss:$0 sm:$0xff] }
 0xa10   :  { %v2033_v25 = vadd.f32 %v2032_v40, %v1076_v63  ;;  %v1221_v63 = vadd.f32 %v3638_v8, %v3338_v60 }
 0xa12   :  { %2865 = vtanh.f32 %v2033_v25 }
 0xa18   :  { %v2866_v30 = vpop.eup %2865 }
 0xa19   :  { %v2035_v61 = vsub.f32 %v3570_v62, %v2866_v30 }
 0xa1b   :  { %v2036_v22 = vmul.f32 %v2035_v61, %v2030_v11 }
 0xa1d   :  { %v3604_v44 = vadd.f32 %v2866_v30, %v2036_v22 }
 0xa1f   :  { %v2038_v39 = vpack.c.bf16 %v3604_v44, %v3604_v44 }
 0xa21   :  { %2654 = vmatmul.msk.bf16.vlgmr.msra.gmra.mxu2 %vm173_vm9, %v2038_v39  ;;  %2655 = vmatmul.msk.bf16.vlgmr.msra.gmra.mxu3 %vm173_vm9, %v2038_v39  ;;  %v2290_v41 = vunpack.c.l.b16 %v2038_v39 }
 0xa22   :  { %2656 = vmatmul.msk.bf16.vlgmr.msrb.gmra.mxu0 %vm173_vm9, %v2038_v39  ;;  %2657 = vmatmul.msk.bf16.vlgmr.msrb.gmra.mxu1 %vm173_vm9, %v2038_v39 }
 0xa23   :  { %2262 = vmatpush.bf16.msra.mxu2 %v3412_v46  ;;  %v2291_v58 = vpack.c.b16 %v2290_v41, %v2290_v41  ;;  %v1195_v46 = vadd.f32 %v3622_v50, %v3341_v19 }
 0xa25   :  { %v2292_v62 = vrot.slane %v2291_v58, 3 }
 0xa27   :  { %2263 = vmatpush.bf16.msra.mxu2 %v3426_v7  ;;  %v3615_v24 = vsel %vm2313_vm10, %v3585_v42, %v2292_v62 }
 0xa9f   :  { %v2082_v45 = vpop.f32.mrf.mxu0  ;;  %v2095_v5 = vpop.f32.mrf.mxu1 }
 0xaa0   :  { %v2119_v29 = vadd.f32 %v2082_v45, %v1208_v3  ;;  %v2096_v18 = vadd.f32 %v3632_v59, %v2095_v5  ;;  %v2915_v3 = vld [vmem:[%s3699_s2 + $0x5] ss:$0 sm:$0xff] }
 0xaa1   :  { %v1353_v45 = vadd.f32 %v2915_v3, %v3395_v43 }
 0xaa2   :  { %v2659_v47 = vmul.f32 -1.442695, %v2119_v29 }
 0xaa4   :  { %v2051_v9 = vpop.f32.mrf.mxu2  ;;  %v2069_v7 = vpop.f32.mrf.mxu3  ;;  %2867 = vpow2.f32 %v2659_v47 }
 0xaa5   :  { %v2052_v42 = vadd.f32 %v3460_v2, %v2051_v9  ;;  %v2099_v28 = vadd.f32 %v2069_v7, %v1195_v46  ;;  %v1340_v9 = vadd.f32 %v3622_v50, %v3393_v55 }
 0xaa7   :  { %2869 = vtanh.f32 %v2052_v42  ;;  %v2658_v13 = vmul.f32 -1.442695, %v2099_v28  ;;  %v2084_v56 = vpop.f32.mrf.mxu0  ;;  %v2097_v17 = vpop.f32.mrf.mxu1 }
 0xaa9   :  { %2871 = vpow2.f32 %v2658_v13 }
 0xaaa   :  { %v2868_v32 = vpop.eup %2867 }
 0xaab   :  { %v2123_v15 = vadd.f32 1.0, %v2868_v32 }
 0xaac   :  { %v2053_v31 = vpop.f32.mrf.mxu2  ;;  %v2071_v38 = vpop.f32.mrf.mxu3 }
 0xaad   :  { %v2870_v12 = vpop.eup %2869  ;;  %v2135_v26 = vand.u32 2147483648, %v2123_v15  ;;  %vm2129_vm1 = vweird.f32 %v2123_v15  ;;  %v2133_v37 = vand.u32 2147483647, %v2123_v15 }
 0xaae   :  { %v2056_v6 = vmul.f32 %v2870_v12, %v3468_v16 }
 0xaaf   :  { %v2872_v35 = vpop.eup %2871  ;;  %v2136_v49 = vor.u32 1.1754944e-38, %v2135_v26  ;;  %vm2134_vm4 = vcmp.eq.f32.partialorder %v2133_v37, 8.507059e+37 }
 0xab0   :  { %v2103_v19 = vadd.f32 1.0, %v2872_v35  ;;  %v2057_v36 = vsel %vm1521_vm3, %v2056_v6, 0.0 }
 0xab1   :  { %2058 = vadd.xlane.f32.xlu2 %v2057_v36 }
 0xab2   :  { %2873 = vrcp.f32 %v2103_v19  ;;  %v2115_v48 = vand.u32 2147483648, %v2103_v19  ;;  %v2113_v54 = vand.u32 2147483647, %v2103_v19  ;;  %vm2109_vm12 = vweird.f32 %v2103_v19 }
 0xab3   :  { %2875 = vrcp.f32 %v2123_v15 }
 0xab4   :  { %v2116_v51 = vor.u32 1.1754944e-38, %v2115_v48  ;;  %vm2114_vm14 = vcmp.eq.f32.partialorder %v2113_v54, 8.507059e+37 }
 0xab8   :  { %v2874_v34 = vpop.eup %2873 }
 0xab9   :  { %v2876_v52 = vpop.eup %2875  ;;  %v2105_v21 = vmul.f32 %v2874_v34, %v2103_v19  ;;  %vm2110_vm11 = vweird.f32 %v2874_v34 }
 0xaba   :  { %v2125_v10 = vmul.f32 %v2876_v52, %v2123_v15  ;;  %vm2111_vm13 = vmor %vm2109_vm12, %vm2110_vm11  ;;  %vm2130_vm15 = vweird.f32 %v2876_v52 }
 0xabb   :  { %v2106_v20 = vsub.f32 1.0, %v2105_v21  ;;  %vm2131_vm2 = vmor %vm2129_vm1, %vm2130_vm15  ;;  %vm2319_vm15 = vcmask 1046528   ;;  %vm2323_vm1 = vcmask 15360  }
 0xabc   :  { %v2126_v57 = vsub.f32 1.0, %v2125_v10 }
 0xabd   :  { %v2107_v53 = vmul.f32 %v2874_v34, %v2106_v20 }
 0xabe   :  { %v2127_v23 = vmul.f32 %v2876_v52, %v2126_v57  ;;  %v1366_v57 = vadd.f32 %v3638_v8, %v3397_v14 }
 0xabf   :  { %v2108_v27 = vadd.f32 %v2874_v34, %v2107_v53 }
 0xac0   :  { %v2128_v4 = vadd.f32 %v2876_v52, %v2127_v23 }
 0xac1   :  { %v2112_v0 = vsel %vm2111_vm13, %v2874_v34, %v2108_v27 }
 0xac2   :  { %v2117_v33 = vsel %vm2114_vm14, %v2116_v51, %v2112_v0  ;;  %v2132_v1 = vsel %vm2131_vm2, %v2876_v52, %v2128_v4  ;;  %vm2325_vm2 = vcmask 31744  }
 0xac3   :  { %v2139_v40 = vmul.f32 %v2117_v33, %v2096_v18  ;;  %v2137_v11 = vsel %vm2134_vm4, %v2136_v49, %v2132_v1  ;;  %vm2327_vm4 = vcmask 48128  }
 0xac5   :  { %v2140_v25 = vadd.f32 %v2139_v40, %v1221_v63 }
 0xac7   :  { %2877 = vtanh.f32 %v2140_v25 }
 0xacd   :  { %v2878_v30 = vpop.eup %2877 }
 0xace   :  { %v2142_v61 = vsub.f32 %v3604_v44, %v2878_v30 }
 0xad0   :  { %v2143_v22 = vmul.f32 %v2142_v61, %v2137_v11 }
 0xad2   :  { %v3643_v39 = vadd.f32 %v2878_v30, %v2143_v22  ;;  %v2916_v22 = vld [vmem:[%s3699_s2 + $0x8] ss:$0 sm:$0xff] }
 0xad4   :  { %v2145_v60 = vpack.c.bf16 %v3643_v39, %v3643_v39 }
 0xad6   :  { %2660 = vmatmul.msk.bf16.vlgmr.msrb.gmra.mxu2 %vm173_vm9, %v2145_v60  ;;  %2661 = vmatmul.msk.bf16.vlgmr.msrb.gmra.mxu3 %vm173_vm9, %v2145_v60  ;;  %v2294_v41 = vunpack.c.l.b16 %v2145_v60 }
 0xad7   :  { %2662 = vmatmul.msk.bf16.vlgmr.msra.gmra.mxu0 %vm173_vm9, %v2145_v60  ;;  %2663 = vmatmul.msk.bf16.vlgmr.msra.gmra.mxu1 %vm173_vm9, %v2145_v60 }
 0xad8   :  { %v2295_v58 = vpack.c.b16 %v2294_v41, %v2294_v41 }
 0xada   :  { %v2296_v62 = vrot.slane %v2295_v58, 2  ;;  %v2917_v58 = vld [vmem:[%s3699_s2 + $0x9] ss:$0 sm:$0xff] }
 0xadc   :  { %v3652_v44 = vsel %vm2316_vm5, %v3615_v24, %v2296_v62  ;;  %vm2329_vm5 = vcmask 64512  }
 0xb54   :  { %v2189_v5 = vpop.f32.mrf.mxu0  ;;  %v2202_v29 = vpop.f32.mrf.mxu1 }
 0xb55   :  { %v2226_v47 = vadd.f32 %v2189_v5, %v1353_v45  ;;  %v2203_v53 = vadd.f32 %v3632_v59, %v2202_v29  ;;  %v1524_v45 = vpop.xlane.xlu0 %1523  ;;  %v2337_v5 = vlaneseq  ;;  %v1952_v29 = vpop.xlane.xlu2 %1951 }
 0xb57   :  { %v2665_v46 = vmul.f32 -1.442695, %v2226_v47 }
 0xb59   :  { %v2158_v7 = vpop.f32.mrf.mxu2  ;;  %v2176_v42 = vpop.f32.mrf.mxu3  ;;  %2879 = vpow2.f32 %v2665_v46  ;;  %v2338_v46 = vand.u32 127, %v2337_v5 }
 0xb5a   :  { %v2159_v28 = vadd.f32 %v3460_v2, %v2158_v7  ;;  %v2206_v13 = vadd.f32 %v2176_v42, %v1340_v9  ;;  %v2340_v42 = vshrl.u32 %v2337_v5, 7 }
 0xb5c   :  { %2881 = vtanh.f32 %v2159_v28  ;;  %v2664_v24 = vmul.f32 -1.442695, %v2206_v13  ;;  %v2191_v56 = vpop.f32.mrf.mxu0  ;;  %v2204_v17 = vpop.f32.mrf.mxu1  ;;  %v2345_v28 = vand.u32 1, %v2338_v46 }
 0xb5d   :  { %v1631_v47 = vpop.xlane.xlu0 %1630 }
 0xb5e   :  { %2883 = vpow2.f32 %v2664_v24  ;;  %v2324_v7 = vsel %vm2323_vm1, %v1524_v45, %v1631_v47  ;;  %v2059_v24 = vpop.xlane.xlu2 %2058  ;;  %vm2431_vm1 = vcmask 253952  }
 0xb5f   :  { %v2880_v32 = vpop.eup %2879 }
 0xb60   :  { %v2230_v35 = vadd.f32 1.0, %v2880_v32 }
 0xb61   :  { %v2160_v43 = vpop.f32.mrf.mxu2  ;;  %v2178_v31 = vpop.f32.mrf.mxu3 }
 0xb62   :  { %v2882_v38 = vpop.eup %2881  ;;  %v2242_v63 = vand.u32 2147483648, %v2230_v35  ;;  %vm2236_vm12 = vweird.f32 %v2230_v35  ;;  %v2240_v40 = vand.u32 2147483647, %v2230_v35 }
 0xb63   :  { %v2163_v12 = vmul.f32 %v2882_v38, %v3468_v16 }
 0xb64   :  { %v2884_v6 = vpop.eup %2883  ;;  %v2243_v4 = vor.u32 1.1754944e-38, %v2242_v63  ;;  %vm2241_vm14 = vcmp.eq.f32.partialorder %v2240_v40, 8.507059e+37 }
 0xb65   :  { %v2210_v55 = vadd.f32 1.0, %v2884_v6  ;;  %v2164_v50 = vsel %vm1521_vm3, %v2163_v12, 0.0 }
 0xb66   :  { %2165 = vadd.xlane.f32.xlu0 %v2164_v50 }
 0xb67   :  { %2885 = vrcp.f32 %v2210_v55  ;;  %v2222_v52 = vand.u32 2147483648, %v2210_v55  ;;  %v2220_v20 = vand.u32 2147483647, %v2210_v55  ;;  %vm2216_vm7 = vweird.f32 %v2210_v55 }
 0xb68   :  { %2887 = vrcp.f32 %v2230_v35 }
 0xb69   :  { %v2223_v48 = vor.u32 1.1754944e-38, %v2222_v52  ;;  %vm2221_vm10 = vcmp.eq.f32.partialorder %v2220_v20, 8.507059e+37 }
 0xb6d   :  { %v2886_v2 = vpop.eup %2885 }
 0xb6e   :  { %v2888_v15 = vpop.eup %2887  ;;  %v2212_v19 = vmul.f32 %v2886_v2, %v2210_v55  ;;  %vm2217_vm6 = vweird.f32 %v2886_v2 }
 0xb6f   :  { %v2232_v34 = vmul.f32 %v2888_v15, %v2230_v35  ;;  %vm2218_vm8 = vmor %vm2216_vm7, %vm2217_vm6  ;;  %vm2237_vm11 = vweird.f32 %v2888_v15  ;;  %vm2331_vm6 = vcmask 80896   ;;  %vm2333_vm7 = vcmask 97280  }
 0xb70   :  { %v2213_v36 = vsub.f32 1.0, %v2212_v19  ;;  %vm2238_vm13 = vmor %vm2236_vm12, %vm2237_vm11  ;;  %vm2355_vm11 = vcmask 123904  }
 0xb71   :  { %v2233_v16 = vsub.f32 1.0, %v2232_v34  ;;  %v2701_v34 = vld [vmem:[%s3697_s1 + $0xb8] sm:$0xff] }
 0xb72   :  { %v2214_v21 = vmul.f32 %v2886_v2, %v2213_v36  ;;  %v2702_v36 = vld [vmem:[%s3697_s1 + $0xc0] sm:$0xff] }
 0xb73   :  { %v2234_v18 = vmul.f32 %v2888_v15, %v2233_v16  ;;  %2419 = vmatpush.bf16.msrb.mxu0 %v2702_v36 }
 0xb74   :  { %v2215_v10 = vadd.f32 %v2886_v2, %v2214_v21 }
 0xb75   :  { %v2235_v33 = vadd.f32 %v2888_v15, %v2234_v18 }
 0xb76   :  { %v2219_v54 = vsel %vm2218_vm8, %v2886_v2, %v2215_v10  ;;  %vm2335_vm8 = vcmask 113664  }
 0xb77   :  { %v2224_v27 = vsel %vm2221_vm10, %v2223_v48, %v2219_v54  ;;  %v2239_v23 = vsel %vm2238_vm13, %v2888_v15, %v2235_v33  ;;  %vm2353_vm10 = vcmp.eq.s32.totalorder %v2345_v28, %v2340_v42  ;;  %2420 = vmatpush.bf16.msrb.mxu0 %v2701_v34 }
 0xb78   :  { %v2246_v51 = vmul.f32 %v2224_v27, %v2203_v53  ;;  %v2244_v26 = vsel %vm2241_vm14, %v2243_v4, %v2239_v23  ;;  %v86_v23 = vld [vmem:[%s3699_s2 + $0xc] sm:$0x1]  ;;  %v2715_v4 = vld [vmem:[%s3699_s2 + $0xa] ss:$0 sm:$0xff] }
 0xb7a   :  { %v2247_v0 = vadd.f32 %v2246_v51, %v1366_v57 }
 0xb7c   :  { %2889 = vtanh.f32 %v2247_v0 }
 0xb82   :  { %v2890_v25 = vpop.eup %2889 }
 0xb83   :  { %v2249_v59 = vsub.f32 %v3643_v39, %v2890_v25 }
 0xb85   :  { %v2250_v37 = vmul.f32 %v2249_v59, %v2244_v26 }
 0xb87   :  { %v2251_v1 = vadd.f32 %v2890_v25, %v2250_v37  ;;  %v2432_v25 = vsel %vm2431_vm1, %v86_v23, 0.0  ;;  %v2716_v37 = vld [vmem:[%s3699_s2 + $0xb] ss:$0 sm:$0xff] }
 0xb89   :  { %v2252_v14 = vpack.c.bf16 %v2251_v1, %v2251_v1 }
 0xb8b   :  { %2666 = vmatmul.msk.bf16.vlgmr.msra.gmra.mxu2 %vm173_vm9, %v2252_v14  ;;  %v2298_v8 = vunpack.c.l.b16 %v2252_v14 }
 0xb8d   :  { %v2299_v30 = vpack.c.b16 %v2298_v8, %v2298_v8 }
 0xb8f   :  { %v2300_v49 = vrot.slane %v2299_v30, 1 }
 0xb91   :  { %v2321_v61 = vsel %vm2319_vm15, %v3652_v44, %v2300_v49  ;;  %v1738_v44 = vpop.xlane.xlu1 %1737 }
 0xb92   :  { %2391 = vmatpush.bf16.msra.mxu3 %v2321_v61  ;;  %v2326_v13 = vsel %vm2325_vm2, %v2324_v7, %v1738_v44 }
 0xb99   :  { %v1845_v9 = vpop.xlane.xlu1 %1844 }
 0xb9a   :  { %v2328_v56 = vsel %vm2327_vm4, %v2326_v13, %v1845_v9 }
 0xb9b   :  { %v2330_v32 = vsel %vm2329_vm5, %v2328_v56, %v1952_v29 }
 0xb9c   :  { %v2332_v43 = vsel %vm2331_vm6, %v2330_v32, %v2059_v24 }
 0xbd9   :  { %v2166_v17 = vpop.xlane.xlu0 %2165 }
 0xbda   :  { %v2334_v31 = vsel %vm2333_vm7, %v2332_v43, %v2166_v17 }
 0xc0e   :  { %v2265_v11 = vpop.f32.mrf.mxu2 }
 0xc0f   :  { %v2266_v60 = vadd.f32 %v2916_v22, %v2265_v11 }
 0xc11   :  { %2891 = vtanh.f32 %v2266_v60 }
 0xc16   :  { %v2267_v39 = vpop.f32.mrf.mxu2 }
 0xc17   :  { %v2892_v41 = vpop.eup %2891 }
 0xc18   :  { %v2270_v62 = vmul.f32 %v2917_v58, %v2892_v41 }
 0xc1a   :  { %v2271_v3 = vsel %vm1521_vm3, %v2270_v62, 0.0 }
 0xc1b   :  { %2272 = vadd.xlane.f32.xlu1 %v2271_v3 }
 0xc23   :  { %2433 = vadd.xlane.f32.xlu1 %v2432_v25 }
 0xc8e   :  { %v2273_v38 = vpop.xlane.xlu1 %2272 }
 0xc8f   :  { %v2336_v12 = vsel %vm2335_vm8, %v2334_v31, %v2273_v38 }
 0xc90   :  { %v2354_v6 = vsel %vm2353_vm10, %v2336_v12, -1e+30 }
 0xc91   :  { %v2356_v35 = vsel %vm2355_vm11, %v2354_v6, -inf }
 0xc92   :  { %2357 = vmax.xlane.f32.xlu2 %v2356_v35 }
 0xc96   :  { %v2434_v49 = vpop.xlane.xlu1 %2433 }
 0xc97   :  { %v2435_v61 = vperm.slane %v2434_v49, 0 }
 0xd05   :  { %v2358_v55 = vpop.xlane.xlu2 %2357 }
 0xd06   :  { %v2359_v50 = vsub.f32 %v2354_v6, %v2358_v55 }
 0xd08   :  { %v2360_v2 = vmul.f32 1.442695, %v2359_v50 }
 0xd0a   :  { %2893 = vpow2.f32 %v2360_v2 }
 0xd10   :  { %v2894_v15 = vpop.eup %2893 }
 0xd11   :  { %v2362_v19 = vsel %vm2355_vm11, %v2894_v15, 0.0 }
 0xd12   :  { %2363 = vadd.xlane.f32.xlu0 %v2362_v19 }
 0xd85   :  { %v2364_v52 = vpop.xlane.xlu0 %2363 }
 0xd86   :  { %2895 = vrcp.f32 %v2364_v52  ;;  %v2376_v16 = vand.u32 2147483648, %v2364_v52  ;;  %v2374_v53 = vand.u32 2147483647, %v2364_v52  ;;  %vm2370_vm13 = vweird.f32 %v2364_v52 }
 0xd88   :  { %v2377_v27 = vor.u32 1.1754944e-38, %v2376_v16  ;;  %vm2375_vm15 = vcmp.eq.f32.partialorder %v2374_v53, 8.507059e+37 }
 0xd8c   :  { %v2896_v21 = vpop.eup %2895 }
 0xd8d   :  { %v2366_v20 = vmul.f32 %v2896_v21, %v2364_v52  ;;  %vm2371_vm12 = vweird.f32 %v2896_v21 }
 0xd8e   :  { %vm2372_vm14 = vmor %vm2370_vm13, %vm2371_vm12 }
 0xd8f   :  { %v2367_v10 = vsub.f32 1.0, %v2366_v20 }
 0xd91   :  { %v2368_v48 = vmul.f32 %v2896_v21, %v2367_v10 }
 0xd93   :  { %v2369_v54 = vadd.f32 %v2896_v21, %v2368_v48 }
 0xd95   :  { %v2373_v57 = vsel %vm2372_vm14, %v2896_v21, %v2369_v54 }
 0xd96   :  { %v2378_v51 = vsel %vm2375_vm15, %v2377_v27, %v2373_v57 }
 0xd97   :  { %v2379_v18 = vmul.f32 %v2894_v15, %v2378_v51 }
 0xd99   :  { %v2380_v0 = vpack.c.bf16 %v2379_v18, %v2379_v18 }
 0xd9b   :  { %2667 = vmatmul.msk.bf16.vlgmr.msra.gmra.mxu3 %vm101_vm0, %v2380_v0 }
 0xe1e   :  { %v2393_v33 = vpop.f32.mrf.mxu3 }
 0xe1f   :  { %v2397_v63 = vpack.c.bf16 %v2393_v33, %v2393_v33 }
 0xe21   :  { %2676 = vmatmul.msk.bf16.vlgmr.msrb.gmra.mxu0 %vm173_vm9, %v2397_v63 }
 0xe26   :  { %v2395_v40 = vpop.f32.mrf.mxu3 }
 0xe9e   :  { %v2422_v59 = vpop.f32.mrf.mxu0 }
 0xe9f   :  { %v2423_v26 = vadd.f32 %v2715_v4, %v2422_v59 }
 0xea1   :  { %v2426_v1 = vmax.f32 %v2423_v26, 0.0 }
 0xea3   :  { %v2427_v14 = vmul.f32 %v2716_v37, %v2426_v1 }
 0xea5   :  { %v2428_v8 = vsel %vm1521_vm3, %v2427_v14, 0.0  ;;  %vm2456_vm3 = vcmask 1024  }
 0xea6   :  { %v2424_v30 = vpop.f32.mrf.mxu0  ;;  %2429 = vadd.xlane.f32.xlu2 %v2428_v8 }
 0xf19   :  { %v2430_v11 = vpop.xlane.xlu2 %2429 }
 0xf1a   :  { %v2436_v22 = vadd.f32 %v2435_v61, %v2430_v11 }
 0xf1c   :  { %v2677_v60 = vmul.f32 -1.442695, %v2436_v22 }
 0xf1e   :  { %2897 = vpow2.f32 %v2677_v60 }
 0xf24   :  { %v2898_v39 = vpop.eup %2897 }
 0xf25   :  { %v2440_v41 = vadd.f32 1.0, %v2898_v39 }
 0xf27   :  { %2899 = vrcp.f32 %v2440_v41  ;;  %v2452_v45 = vand.u32 2147483648, %v2440_v41  ;;  %v2450_v5 = vand.u32 2147483647, %v2440_v41  ;;  %vm2446_vm9 = vweird.f32 %v2440_v41 }
 0xf29   :  { %v2453_v47 = vor.u32 1.1754944e-38, %v2452_v45  ;;  %vm2451_vm4 = vcmp.eq.f32.partialorder %v2450_v5, 8.507059e+37 }
 0xf2d   :  { %v2900_v58 = vpop.eup %2899 }
 0xf2e   :  { %v2442_v62 = vmul.f32 %v2900_v58, %v2440_v41  ;;  %vm2447_vm0 = vweird.f32 %v2900_v58 }
 0xf2f   :  { %vm2448_vm2 = vmor %vm2446_vm9, %vm2447_vm0 }
 0xf30   :  { %v2443_v3 = vsub.f32 1.0, %v2442_v62 }
 0xf32   :  { %v2444_v44 = vmul.f32 %v2900_v58, %v2443_v3 }
 0xf34   :  { %v2445_v29 = vadd.f32 %v2900_v58, %v2444_v44 }
 0xf36   :  { %v2449_v46 = vsel %vm2448_vm2, %v2900_v58, %v2445_v29 }
 0xf37   :  { %v2454_v9 = vsel %vm2451_vm4, %v2453_v47, %v2449_v46 }
 0xf38   :  { %2457 = vst.msk [vmem:[%s3700_s3] sm:$0x3] %vm2456_vm3, %v2454_v9 }

</bundles_post_ra>
